<compile_context>
chip_gen: v5e
topology: v5e:2x2
jax: 0.10.0
libtpu: 0.0.40
codegen_flags: <defaults>
</compile_context>

<pallas_src>
import functools
import math

import jax
import jax.numpy as jnp
from jax.experimental import pallas as pl
from jax.experimental.pallas import tpu as pltpu


# ----------------------------------------------------------------------------
# Pallas kernel: fused 3x3 conv (tap-folded single matmul) + bias + ReLU.
#   x_ref : (Lf, Cin)     bf16  flat zero-padded row tile, Lf = (Th+3)*Wp
#   w_ref : (9*Cin, Tco)  bf16  folded weights, row = (dy*3+dx)*Cin + c
#   b_ref : (1, Tco)      f32
#   o_ref : (Mtf, Tco)    bf16  flat output rows, Mtf = Th*Wp (2 junk cols/row)
# ----------------------------------------------------------------------------
def _conv3x3_relu_kernel(x_ref, w_ref, b_ref, o_ref, *, mtf, wp):
    pieces = []
    for dy in range(3):                              # static unroll: 9 taps
        for dx in range(3):
            off = dy * wp + dx                       # static shift into flat tile
            pieces.append(x_ref[pl.ds(off, mtf), :])  # (Mtf, Cin) bf16
    lhs = jnp.concatenate(pieces, axis=-1)           # (Mtf, 9*Cin) folded LHS
    acc = jnp.dot(lhs, w_ref[...], preferred_element_type=jnp.float32)
    o_ref[...] = jnp.maximum(acc + b_ref[...], 0.0).astype(o_ref.dtype)


@functools.lru_cache(maxsize=None)
def _vmem_limit_bytes():
    cap = 128 * 1024 * 1024
    try:
        cap = int(pltpu.get_tpu_info().vmem_capacity_bytes)   # v7x: 64 MiB / TC
    except Exception:
        pass
    return int(min(64 * 1024 * 1024, (cap * 3) // 4))


def _pick_tile_rows(h, wp, cin):
    """Largest row-tile height Th that (a) divides H, (b) keeps the folded LHS
    at ~<=2 MiB, and (c) leaves >=2 row tiles when possible (dual-TC sharding)."""
    lhs_budget = 2 * 1024 * 1024
    max_mt = max(8, min(1024, lhs_budget // (9 * cin * 2)))
    max_th = max(1, max_mt // wp)
    th = 1
    for cand in range(1, h + 1):
        if h % cand == 0 and cand <= max_th:
            th = cand
    if th == h and h > 1:                            # prefer >=2 parallel row tiles
        for cand in range(h // 2, 0, -1):
            if h % cand == 0:
                th = cand
                break
    return th


def conv3x3_relu(x, wf, b):
    """x: (N,H,W,Cin) bf16, wf: (9*Cin,Cout) bf16, b: (1,Cout) f32 -> (N,H,W,Cout) bf16."""
    n, h, w, cin = x.shape
    k, cout = wf.shape
    assert k == 9 * cin
    wp = w + 2
    th = _pick_tile_rows(h, wp, cin)
    n_rows = h // th
    mtf = th * wp                     # flat output rows / tile (incl. 2 junk cols per row)
    lf = (th + 3) * wp                # flat input rows / tile (2-row halo + 1 spare row)
    tco = min(cout, 256)              # lane-dense output tiles (>= 64 everywhere)
    n_co = cout // tco

    # zero-pad (top 1, bottom 2, left 1, right 1), gather overlapping row tiles
    # (halo cost ~ (Th+3)/Th of the input) and flatten each tile's rows.
    xp = jnp.pad(x, ((0, 0), (1, 2), (1, 1), (0, 0)))
    row_idx = jnp.arange(n_rows)[:, None] * th + jnp.arange(th + 3)[None, :]
    xt = jnp.take(xp, row_idx, axis=1).reshape(n, n_rows, lf, cin)

    flops = 2 * n * h * w * 9 * cin * cout
    bytes_accessed = (xt.size * 2 + wf.size * 2 + n * n_rows * mtf * cout * 2 + cout * 4)

    out = pl.pallas_call(
        functools.partial(_conv3x3_relu_kernel, mtf=mtf, wp=wp),
        out_shape=jax.ShapeDtypeStruct((n, n_rows, mtf, cout), jnp.bfloat16),
        # row-tile axis innermost: weight/bias blocks stay VMEM-resident,
        # activation tiles stream; all axes independent -> "parallel".
        grid=(n, n_co, n_rows),
        in_specs=[
            pl.BlockSpec((None, None, lf, cin), lambda b_, j, i: (b_, i, 0, 0)),
            pl.BlockSpec((9 * cin, tco), lambda b_, j, i: (0, j)),
            pl.BlockSpec((1, tco), lambda b_, j, i: (0, j)),
        ],
        out_specs=pl.BlockSpec((None, None, mtf, tco), lambda b_, j, i: (b_, i, 0, j)),
        compiler_params=pltpu.CompilerParams(
            dimension_semantics=("parallel", "parallel", "parallel"),
            vmem_limit_bytes=_vmem_limit_bytes()),
        cost_estimate=pl.CostEstimate(flops=int(flops), transcendentals=0,
                                      bytes_accessed=int(bytes_accessed)),
    )(xt, wf, b)

    # drop the 2 junk columns per flat row, restore (N, H, W, Cout).
    out = out.reshape(n, n_rows, th, wp, cout)[:, :, :, :w, :]
    return out.reshape(n, h, w, cout)


def maxpool2x2(x):
    # TODO(synk): 2x2/stride-2 max-pool kept as plain-JAX reshape+max glue
    # (not yet fused into the preceding conv's epilogue).
    n, h, w, c = x.shape
    return x.reshape(n, h // 2, 2, w // 2, 2, c).max(axis=(2, 4))


# ----------------------------------------------------------------------------
# Parameters (convs actually used by the five slices: vgg19.features[0..29]).
# ----------------------------------------------------------------------------
_VGG19_CONVS = [
    ("conv1_1", 3, 64), ("conv1_2", 64, 64),
    ("conv2_1", 64, 128), ("conv2_2", 128, 128),
    ("conv3_1", 128, 256), ("conv3_2", 256, 256),
    ("conv3_3", 256, 256), ("conv3_4", 256, 256),
    ("conv4_1", 256, 512), ("conv4_2", 512, 512),
    ("conv4_3", 512, 512), ("conv4_4", 512, 512),
    ("conv5_1", 512, 512),
]


def init_vgg19_params(key):
    # TODO(synk): torchvision pretrained weights cannot be loaded here (no file
    # or network access); deterministic He-init stands in with identical layout.
    params = {}
    keys = jax.random.split(key, len(_VGG19_CONVS))
    for k, (name, cin, cout) in zip(keys, _VGG19_CONVS):
        kw, kb = jax.random.split(k)
        cin_p = 8 if cin < 8 else cin        # pad conv1_1 channels 3 -> 8 (zero taps)
        w = jax.random.normal(kw, (cout, cin, 3, 3), jnp.float32) * math.sqrt(2.0 / (cin * 9))
        b = jax.random.normal(kb, (cout,), jnp.float32) * 0.01
        wt = jnp.transpose(w, (2, 3, 1, 0))                           # (3,3,Cin,Cout)
        wt = jnp.pad(wt, ((0, 0), (0, 0), (0, cin_p - cin), (0, 0)))
        wf = wt.reshape(9 * cin_p, cout).astype(jnp.bfloat16)         # folded (dy,dx,c)
        params[name] = (wf, b.reshape(1, cout))
    return params


# ----------------------------------------------------------------------------
# Forward pass — mirrors Vgg19.forward (returns [h_relu1 .. h_relu5]).
# ----------------------------------------------------------------------------
def vgg19_forward(params, x_nchw):
    h = jnp.transpose(x_nchw, (0, 2, 3, 1)).astype(jnp.bfloat16)      # NCHW -> NHWC
    cin1 = params["conv1_1"][0].shape[0] // 9
    if h.shape[-1] < cin1:                                            # 3 -> 8 zero channels
        h = jnp.pad(h, ((0, 0), (0, 0), (0, 0), (0, cin1 - h.shape[-1])))

    h = conv3x3_relu(h, *params["conv1_1"]); h_relu1 = h
    h = conv3x3_relu(h, *params["conv1_2"]); h = maxpool2x2(h)
    h = conv3x3_relu(h, *params["conv2_1"]); h_relu2 = h
    h = conv3x3_relu(h, *params["conv2_2"]); h = maxpool2x2(h)
    h = conv3x3_relu(h, *params["conv3_1"]); h_relu3 = h
    h = conv3x3_relu(h, *params["conv3_2"])
    h = conv3x3_relu(h, *params["conv3_3"])
    h = conv3x3_relu(h, *params["conv3_4"]); h = maxpool2x2(h)
    h = conv3x3_relu(h, *params["conv4_1"]); h_relu4 = h
    h = conv3x3_relu(h, *params["conv4_2"])
    h = conv3x3_relu(h, *params["conv4_3"])
    h = conv3x3_relu(h, *params["conv4_4"]); h = maxpool2x2(h)
    h = conv3x3_relu(h, *params["conv5_1"]); h_relu5 = h

    # NHWC bf16 -> NCHW f32 at the module boundary (matches PyTorch layout).
    return [jnp.transpose(o.astype(jnp.float32), (0, 3, 1, 2))
            for o in (h_relu1, h_relu2, h_relu3, h_relu4, h_relu5)]


if __name__ == "__main__":
    N, C, H, W = 2, 3, 32, 32                # H, W multiples of 16 (four 2x2 pools)
    params = init_vgg19_params(jax.random.PRNGKey(1))
    x = jax.random.normal(jax.random.PRNGKey(0), (N, C, H, W), jnp.float32)

    # Numeric sanity check of the fused conv kernel (conv1_1) against XLA conv.
    wf, b2 = params["conv1_1"]
    cin1 = wf.shape[0] // 9
    xh = jnp.transpose(x, (0, 2, 3, 1)).astype(jnp.bfloat16)
    xh = jnp.pad(xh, ((0, 0), (0, 0), (0, 0), (0, cin1 - C)))
    got = conv3x3_relu(xh, wf, b2).astype(jnp.float32)
    ref = jax.lax.conv_general_dilated(
        xh.astype(jnp.float32), wf.astype(jnp.float32).reshape(3, 3, cin1, -1),
        window_strides=(1, 1), padding="SAME",
        dimension_numbers=("NHWC", "HWIO", "NHWC"),
        precision=jax.lax.Precision.HIGHEST)
    ref = jnp.maximum(ref + b2.reshape(1, 1, 1, -1), 0.0)
    err = float(jnp.max(jnp.abs(got - ref)))
    assert err < 0.1, f"conv kernel mismatch, max abs err = {err}"

    fwd = jax.jit(vgg19_forward)
    outs = jax.block_until_ready(fwd(params, x))

    expected = [(N, 64, H, W), (N, 128, H // 2, W // 2), (N, 256, H // 4, W // 4),
                (N, 512, H // 8, W // 8), (N, 512, H // 16, W // 16)]
    assert [tuple(o.shape) for o in outs] == expected, [o.shape for o in outs]
    for o in outs:
        assert bool(jnp.all(jnp.isfinite(o)))
        assert bool(jnp.all(o >= 0.0))       # ReLU outputs
    print("KERNEL_OK")
</pallas_src>

<mosaic_0001>
module attributes {stable_mosaic.version = 11 : i64} {
  func.func @_conv3x3_relu_kernel(%arg0: i32, %arg1: i32, %arg2: i32, %arg3: memref<1x1x646x8xbf16, #tpu.memory_space<vmem>>, %arg4: memref<72x64xbf16, #tpu.memory_space<vmem>>, %arg5: memref<1x64xf32, #tpu.memory_space<vmem>>, %arg6: memref<1x1x544x64xbf16, #tpu.memory_space<vmem>>) attributes {dimension_semantics = [#tpu.dimension_semantics<parallel>, #tpu.dimension_semantics<parallel>, #tpu.dimension_semantics<parallel>], iteration_bounds = array<i64: 2, 1, 2>, scalar_prefetch = 0 : i64, scratch_operands = 0 : i64, tpu.core_type = #tpu.core_type<tc>, window_params = [{transform_indices = @transform_0, window_bounds = array<i64: 1, 1, 646, 8>}, {transform_indices = @transform_1, window_bounds = array<i64: 72, 64>}, {transform_indices = @transform_2, window_bounds = array<i64: 1, 64>}, {transform_indices = @transform_3, window_bounds = array<i64: 1, 1, 544, 64>}]} {
    %c0 = arith.constant 0 : index
    %c0_0 = arith.constant 0 : index
    %c0_1 = arith.constant 0 : index
    %c0_2 = arith.constant 0 : index
    %0 = vector.load %arg3[%c0, %c0_0, %c0_1, %c0_2] : memref<1x1x646x8xbf16, #tpu.memory_space<vmem>>, vector<1x1x544x8xbf16>
    %1 = vector.shape_cast %0 : vector<1x1x544x8xbf16> to vector<544x8xbf16>
    %c0_3 = arith.constant 0 : index
    %c0_4 = arith.constant 0 : index
    %c1 = arith.constant 1 : index
    %c0_5 = arith.constant 0 : index
    %2 = vector.load %arg3[%c0_3, %c0_4, %c1, %c0_5] : memref<1x1x646x8xbf16, #tpu.memory_space<vmem>>, vector<1x1x544x8xbf16>
    %3 = vector.shape_cast %2 : vector<1x1x544x8xbf16> to vector<544x8xbf16>
    %c0_6 = arith.constant 0 : index
    %c0_7 = arith.constant 0 : index
    %c2 = arith.constant 2 : index
    %c0_8 = arith.constant 0 : index
    %4 = vector.load %arg3[%c0_6, %c0_7, %c2, %c0_8] : memref<1x1x646x8xbf16, #tpu.memory_space<vmem>>, vector<1x1x544x8xbf16>
    %5 = vector.shape_cast %4 : vector<1x1x544x8xbf16> to vector<544x8xbf16>
    %c0_9 = arith.constant 0 : index
    %c0_10 = arith.constant 0 : index
    %c34 = arith.constant 34 : index
    %c0_11 = arith.constant 0 : index
    %6 = vector.load %arg3[%c0_9, %c0_10, %c34, %c0_11] : memref<1x1x646x8xbf16, #tpu.memory_space<vmem>>, vector<1x1x544x8xbf16>
    %7 = vector.shape_cast %6 : vector<1x1x544x8xbf16> to vector<544x8xbf16>
    %c0_12 = arith.constant 0 : index
    %c0_13 = arith.constant 0 : index
    %c35 = arith.constant 35 : index
    %c0_14 = arith.constant 0 : index
    %8 = vector.load %arg3[%c0_12, %c0_13, %c35, %c0_14] : memref<1x1x646x8xbf16, #tpu.memory_space<vmem>>, vector<1x1x544x8xbf16>
    %9 = vector.shape_cast %8 : vector<1x1x544x8xbf16> to vector<544x8xbf16>
    %c0_15 = arith.constant 0 : index
    %c0_16 = arith.constant 0 : index
    %c36 = arith.constant 36 : index
    %c0_17 = arith.constant 0 : index
    %10 = vector.load %arg3[%c0_15, %c0_16, %c36, %c0_17] : memref<1x1x646x8xbf16, #tpu.memory_space<vmem>>, vector<1x1x544x8xbf16>
    %11 = vector.shape_cast %10 : vector<1x1x544x8xbf16> to vector<544x8xbf16>
    %c0_18 = arith.constant 0 : index
    %c0_19 = arith.constant 0 : index
    %c68 = arith.constant 68 : index
    %c0_20 = arith.constant 0 : index
    %12 = vector.load %arg3[%c0_18, %c0_19, %c68, %c0_20] : memref<1x1x646x8xbf16, #tpu.memory_space<vmem>>, vector<1x1x544x8xbf16>
    %13 = vector.shape_cast %12 : vector<1x1x544x8xbf16> to vector<544x8xbf16>
    %c0_21 = arith.constant 0 : index
    %c0_22 = arith.constant 0 : index
    %c69 = arith.constant 69 : index
    %c0_23 = arith.constant 0 : index
    %14 = vector.load %arg3[%c0_21, %c0_22, %c69, %c0_23] : memref<1x1x646x8xbf16, #tpu.memory_space<vmem>>, vector<1x1x544x8xbf16>
    %15 = vector.shape_cast %14 : vector<1x1x544x8xbf16> to vector<544x8xbf16>
    %c0_24 = arith.constant 0 : index
    %c0_25 = arith.constant 0 : index
    %c70 = arith.constant 70 : index
    %c0_26 = arith.constant 0 : index
    %16 = vector.load %arg3[%c0_24, %c0_25, %c70, %c0_26] : memref<1x1x646x8xbf16, #tpu.memory_space<vmem>>, vector<1x1x544x8xbf16>
    %17 = vector.shape_cast %16 : vector<1x1x544x8xbf16> to vector<544x8xbf16>
    %18 = tpu.concatenate %1, %3, %5, %7, %9, %11, %13, %15, %17 in 1 : vector<544x8xbf16>, vector<544x8xbf16>, vector<544x8xbf16>, vector<544x8xbf16>, vector<544x8xbf16>, vector<544x8xbf16>, vector<544x8xbf16>, vector<544x8xbf16>, vector<544x8xbf16> -> vector<544x72xbf16>
    %c0_27 = arith.constant 0 : index
    %c0_28 = arith.constant 0 : index
    %19 = vector.load %arg4[%c0_27, %c0_28] : memref<72x64xbf16, #tpu.memory_space<vmem>>, vector<72x64xbf16>
    %cst = arith.constant dense<0.000000e+00> : vector<544x64xf32>
    %20 = tpu.matmul %18, %19, %cst {dimension_numbers = #tpu.dot_dimension_numbers<[1], [0], [0], [1], [0, 0, 1, 1], [], []>} : vector<544x72xbf16>, vector<72x64xbf16>, vector<544x64xf32> -> vector<544x64xf32>
    %c0_29 = arith.constant 0 : index
    %c0_30 = arith.constant 0 : index
    %21 = vector.load %arg5[%c0_29, %c0_30] : memref<1x64xf32, #tpu.memory_space<vmem>>, vector<1x64xf32>
    %22 = vector.broadcast %21 : vector<1x64xf32> to vector<544x64xf32>
    %23 = arith.addf %20, %22 : vector<544x64xf32>
    %cst_31 = arith.constant 0.000000e+00 : f32
    %24 = vector.broadcast %cst_31 : f32 to vector<544x64xf32>
    %25 = arith.maximumf %23, %24 : vector<544x64xf32>
    %26 = arith.truncf %25 : vector<544x64xf32> to vector<544x64xbf16>
    %c0_32 = arith.constant 0 : index
    %c0_33 = arith.constant 0 : index
    %c0_34 = arith.constant 0 : index
    %c0_35 = arith.constant 0 : index
    %27 = vector.load %arg6[%c0_32, %c0_33, %c0_34, %c0_35] : memref<1x1x544x64xbf16, #tpu.memory_space<vmem>>, vector<1x1x544x64xbf16>
    %28 = vector.shape_cast %27 : vector<1x1x544x64xbf16> to vector<544x64xbf16>
    %29 = vector.shape_cast %26 : vector<544x64xbf16> to vector<1x1x544x64xbf16>
    tpu.vector_store %arg6[%c0_32, %c0_33, %c0_34, %c0_35], %29 {strides = array<i32>} : memref<1x1x544x64xbf16, #tpu.memory_space<vmem>>, vector<1x1x544x64xbf16>,
    return
  }
  func.func @transform_0(%arg0: i32, %arg1: i32, %arg2: i32) -> (i32, i32, i32, i32) {
    %c0_i32 = arith.constant 0 : i32
    %c0_i32_0 = arith.constant 0 : i32
    %c0_i32_1 = arith.constant 0 : i32
    return %arg0, %arg2, %c0_i32, %c0_i32_0 : i32, i32, i32, i32
  }
  func.func @transform_1(%arg0: i32, %arg1: i32, %arg2: i32) -> (i32, i32) {
    %c0_i32 = arith.constant 0 : i32
    %c0_i32_0 = arith.constant 0 : i32
    return %c0_i32, %arg1 : i32, i32
  }
  func.func @transform_2(%arg0: i32, %arg1: i32, %arg2: i32) -> (i32, i32) {
    %c0_i32 = arith.constant 0 : i32
    %c0_i32_0 = arith.constant 0 : i32
    return %c0_i32, %arg1 : i32, i32
  }
  func.func @transform_3(%arg0: i32, %arg1: i32, %arg2: i32) -> (i32, i32, i32, i32) {
    %c0_i32 = arith.constant 0 : i32
    %c0_i32_0 = arith.constant 0 : i32
    return %arg0, %arg2, %c0_i32, %arg1 : i32, i32, i32, i32
  }
}

</mosaic_0001>

<bundles_post_ra>
// kernel: tpu_custom_call.1
= control target key start
LH: loop header
LB: loop body
LE: loop exit
PB: predicated region body
PF: predicated region fallthrough
CT: control target
= control target key end

     0   :  { %s3563_s12 = smov 0   ;;  %s3565_s13 = smov 0   ;;  %s6520_s0 = inlined_call_operand.vmem [shape: bf16[2,2,646,8], index: 0, kind: input, shape index: {}]   ;;  %s6521_s1 = inlined_call_operand.vmem [shape: bf16[72,64], index: 1, kind: input, shape index: {}]   ;;  %s6522_s2 = inlined_call_operand.vmem [shape: f32[1,64], index: 2, kind: input, shape index: {}]   ;;  %s6523_s3 = inlined_call_operand.vmem [shape: bf16[2,2,544,64], index: 3, kind: output, shape index: {}]  }
   0x1   :  { %s3567_s14 = smov 0   ;;  %s3569_s15 = smov 0  }
   0x2   :  { %s3571_s16 = smov 0  }
   0x3 LB: > { %s25_s17 = sadd.s32 1, %s3525_s14  ;;  %s32_s18 = sadd.s32 1, %s3529_s15  ;;  %s3533_s16 = sphi %s3571_s16, %s13_s16   ;;  %s3529_s15 = sphi %s3569_s15, %s7186_s15   ;;  %s3525_s14 = sphi %s3567_s14, %s7185_s14   ;;  %s3521_s13 = sphi %s3565_s13, %s7184_s13   ;;  %s3517_s12 = sphi %s3563_s12, %s7183_s12  }
   0x4   : > { %p26_p0 = scmp.ge.s32.totalorder %s25_s17, 2  ;;  %p3118_p1 = scmp.ge.s32.totalorder %s3533_s16, 1 }
   0x5   : > { %p183_p2 = scmp.lt.s32.totalorder %s3533_s16, 5 }
   0x6   : > { %s7188_s17 = smov (%p26_p0, %s25_s17), 0  ;;  %s7190_s18 = smov (!%p26_p0, %s32_s18), %s3529_s15 }
   0x7   : > { %p184_p3 = pnand %p3118_p1, %p183_p2  ;;  %p34_p4 = scmp.ge.s32.totalorder %s7190_s18, 2 }
   0x9   : > { %s7192_s18 = smov (%p34_p4, %s7190_s18), 0  ;;  %187 = sbr.rel (%p184_p3) target bundleno = 1009 (0x3f1), region = 32 }
   0xe   : > { %p225_p5 = scmp.lt.s32.totalorder %s3521_s13, 1  ;;  %p227_p6 = scmp.lt.s32.totalorder %s3517_s12, 1  ;;  %vm513_vm0 = vsmask.f32 7424  ;;  %vm861_vm1 = vcmask 1046528   ;;  %vm1325_vm3 = vcmask 1045504  }
   0xf   : > { %s3535_s26 = smov 8   ;;  %s3536_s27 = smov 16   ;;  %vm1094_vm2 = vsmask.f32 6400  ;;  %vm1789_vm4 = vcmask 1044480   ;;  %vm1927_vm6 = vcmask 64512  }
  0x10   : > { %s7194_s13 = smov (!%p225_p5, %s3521_s13), 1  ;;  %s7196_s12 = smov (!%p227_p6, %s3517_s12), 1  ;;  %vm1558_vm5 = vsmask.f32 5376  ;;  %vm1996_vm7 = vcmask 130048   ;;  %vm2065_vm8 = vcmask 195584  }
  0x11   : > { %s3385_s19 = smul.u32 162, %s7194_s13  ;;  %s3537_s28 = smov 24   ;;  %vm2134_vm9 = vcmask 261120   ;;  %vm2588_vm10 = vcmask 1043456   ;;  %vm2203_vm11 = vcmask 326656   ;;  %vm2272_vm12 = vcmask 392192  }
  0x12   : > { %s3384_s20 = smul.u32 81, %s7196_s12  ;;  %s3538_s29 = smov 32   ;;  %vm2341_vm13 = vcmask 457728   ;;  %vm2410_vm14 = vcmask 523264   ;;  %vm2519_vm15 = vcmask 588800  }
  0x13   : > { %s3539_s30 = smov 40   ;;  %s3540_s4 = smov 48  }
  0x14   : > { %s231_s21 = sadd.s32 %s3385_s19, %s3384_s20  ;;  %s3541_s5 = smov 64  }
  0x15   : > { %s3119_s22 = sshll.u32 %s231_s21, 2  ;;  %s3542_s6 = smov 56  }
  0x16   : > { %s3602_s25 = scalar_lea.vmem %s6520_s0, %s3119_s22  ;;  %s3386_s24 = smul.u32 68, %s7196_s12 }
  0x17   : > { %v3605_v0 = vld [vmem:[%s3602_s25 + $0x20] sm:$0xff]   ;;  %v3608_v1 = vld [vmem:[%s3602_s25 + $0x28] sm:$0xff]  ;;  %v3611_v2 = vld [vmem:[%s3602_s25 + $0x10] sm:$0xff]  }
  0x18   : > { %v6526_v3 = vshll.u32 %v3605_v0, 16  ;;  %v6527_v4 = vshrl.u32 %v3605_v0, 16  ;;  %v3616_v5 = vld [vmem:[%s3602_s25 + $0x18] sm:$0xff]  ;;  %v530_v6 = vshll.u32 %v3611_v2, 16  ;;  %v534_v7 = vshrl.u32 %v3611_v2, 16  ;;  %v3353_v8 = vld [vmem:[%s3602_s25] sm:$0xff]  }
  0x19   : > { %v3622_v9 = vshll.u32 %v3608_v1, 16  ;;  %v3625_v10 = vld [vmem:[%s3602_s25 + $0x8] sm:$0xff]  ;;  %v515_v11 = vshrl.u32 %v3353_v8, 16  ;;  %v517_v12 = vshll.u32 %v3353_v8, 16  ;;  %v3628_v13 = vld [vmem:[%s3602_s25 + $0x30] sm:$0xff]  ;;  %v3631_v14 = vshrl.u32 %v3608_v1, 16 }
  0x1a   : > { %v548_v15 = vrot.slane %v6526_v3, 1  ;;  %v532_v16 = vrot.slane %v530_v6, 1  ;;  %v6524_v17 = vshll.u32 %v3616_v5, 16  ;;  %v6525_v18 = vshrl.u32 %v3616_v5, 16  ;;  %v3647_v26 = vld [vmem:[%s3602_s25 + $0x40] sm:$0xff]  ;;  %v3650_v27 = vld [vmem:[%s3602_s25 + $0x38] sm:$0xff] }
  0x1b   : > { %v556_v19 = vrot.slane %v3622_v9, 1  ;;  %v519_v20 = vrot.slane %v517_v12, 1  ;;  %v522_v21 = vshll.u32 %v3625_v10, 16  ;;  %v3640_v22 = vshll.u32 %v3628_v13, 16  ;;  %v3664_v37 = vld [vmem:[%s3602_s25 + $0x48] sm:$0xff]  ;;  %v3678_v44 = vld [vmem:[%s3602_s25 + $0x58] sm:$0xff] }
  0x1c   : > { %v552_v23 = vor.u32 %v6527_v4, %v548_v15  ;;  %v536_v24 = vor.u32 %v534_v7, %v532_v16  ;;  %v540_v25 = vrot.slane %v6524_v17, 1  ;;  %v526_v30 = vshrl.u32 %v3625_v10, 16  ;;  %v3689_v49 = vld [vmem:[%s3602_s25 + $0x50] sm:$0xff]  ;;  %v3698_v52 = vld [vmem:[%s3602_s25 + $0x60] sm:$0xff] }
  0x1d   : > { %v520_v28 = vor.u32 %v519_v20, %v515_v11  ;;  %v524_v29 = vrot.slane %v522_v21, 1  ;;  %v560_v34 = vor.u32 %v3631_v14, %v556_v19  ;;  %v564_v35 = vrot.slane %v3640_v22, 1  ;;  %v3725_v8 = vld [vmem:[%s3602_s25 + $0x70] sm:$0xff]  ;;  %v3728_v11 = vld [vmem:[%s3602_s25 + $0x68] sm:$0xff]  ;;  %v3739_v20 = vld [vmem:[%s3602_s25 + $0x78] sm:$0xff] }
  0x1e   : > { %v557_v31 = vsel %vm513_vm0, %v552_v23, %v556_v19  ;;  %v541_v32 = vsel %vm513_vm0, %v536_v24, %v540_v25  ;;  %v544_v36 = vor.u32 %v6525_v18, %v540_v25  ;;  %v3667_v38 = vshll.u32 %v3647_v26, 16  ;;  %v3839_v18 = vld [vmem:[%s3602_s25 + $0xb0] sm:$0xff] }
  0x1f   : > { %798 = vrot.lane.b32.xlu2 %v557_v31, %s3535_s26  ;;  %794 = vrot.lane.b32.xlu1 %v541_v32, %s3535_s26  ;;  %v525_v33 = vsel %vm513_vm0, %v520_v28, %v524_v29  ;;  %v3670_v39 = vshll.u32 %v3650_v27, 16  ;;  %v528_v40 = vor.u32 %v526_v30, %v524_v29  ;;  %v565_v41 = vsel %vm513_vm0, %v560_v34, %v564_v35  ;;  %v3758_v31 = vld [vmem:[%s3602_s25 + $0x88] sm:$0xff] }
  0x20   : > { %790 = vrot.lane.b32.xlu0 %v525_v33, %s3535_s26  ;;  %6686 = vst [vmem:[#allocation2_spill] sm:$0xff] %v3667_v38  ;;  %v549_v42 = vsel %vm513_vm0, %v544_v36, %v548_v15  ;;  %v3675_v43 = vshrl.u32 %v3647_v26, 16  ;;  %v580_v45 = vrot.slane %v3667_v38, 1  ;;  %v3682_v46 = vshll.u32 %v3664_v37, 16  ;;  %v3767_v36 = vld [vmem:[%s3602_s25 + $0x80] sm:$0xff] }
  0x21   : > { %6687 = vst [vmem:[#allocation3_spill] sm:$0xff] %v3670_v39  ;;  %v572_v47 = vrot.slane %v3670_v39, 1  ;;  %v3686_v48 = vshrl.u32 %v3650_v27, 16  ;;  %v533_v50 = vsel %vm513_vm0, %v528_v40, %v532_v16  ;;  %v3693_v51 = vshrl.u32 %v3628_v13, 16 }
  0x22   : > { %6688 = vst [vmem:[#allocation4_spill] sm:$0xff] %v3675_v43  ;;  %v3701_v53 = vshll.u32 %v3678_v44, 16  ;;  %v584_v54 = vor.u32 %v3675_v43, %v580_v45  ;;  %v588_v55 = vrot.slane %v3682_v46, 1  ;;  %v3708_v57 = vshll.u32 %v3689_v49, 16 }
  0x23   : > { %6689 = vst [vmem:[#allocation5_spill] sm:$0xff] %v3682_v46  ;;  %v576_v56 = vor.u32 %v3686_v48, %v572_v47  ;;  %v568_v58 = vor.u32 %v3693_v51, %v564_v35  ;;  %v3713_v60 = vshrl.u32 %v3678_v44, 16  ;;  %v3716_v61 = vshll.u32 %v3698_v52, 16 }
  0x24   : > { %6690 = vst [vmem:[#allocation6_spill] sm:$0xff] %v3686_v48  ;;  %v604_v59 = vrot.slane %v3701_v53, 1  ;;  %v589_v62 = vsel %vm513_vm0, %v584_v54, %v588_v55  ;;  %v596_v6 = vrot.slane %v3708_v57, 1  ;;  %v3722_v7 = vshrl.u32 %v3689_v49, 16 }
  0x25   : > { %6691 = vst [vmem:[#allocation7_spill] sm:$0xff] %v3701_v53  ;;  %v581_v63 = vsel %vm513_vm0, %v576_v56, %v580_v45  ;;  %v573_v12 = vsel %vm513_vm0, %v568_v58, %v572_v47  ;;  %v3732_v15 = vshrl.u32 %v3664_v37, 16  ;;  %v612_v19 = vrot.slane %v3716_v61, 1 }
  0x26   : > { %6692 = vst [vmem:[#allocation8_spill] sm:$0xff] %v3708_v57  ;;  %v608_v16 = vor.u32 %v3713_v60, %v604_v59  ;;  %v600_v21 = vor.u32 %v3722_v7, %v596_v6  ;;  %v3744_v23 = vshll.u32 %v3725_v8, 16  ;;  %v3747_v24 = vshll.u32 %v3728_v11, 16 }
  0x27   : > { %800 = vrot.lane.b32.xlu2 %v565_v41, %s3535_s26  ;;  %796 = vrot.lane.b32.xlu1 %v549_v42, %s3535_s26  ;;  %6693 = vst [vmem:[#allocation9_spill] sm:$0xff] %v3713_v60  ;;  %v592_v25 = vor.u32 %v3732_v15, %v588_v55  ;;  %v3752_v29 = vshrl.u32 %v3725_v8, 16  ;;  %v3755_v30 = vshll.u32 %v3739_v20, 16  ;;  %v3764_v35 = vshrl.u32 %v3728_v11, 16  ;;  %v3776_v42 = vld [vmem:[%s3602_s25 + $0x90] sm:$0xff] }
  0x28   : > { %792 = vrot.lane.b32.xlu0 %v533_v50, %s3535_s26  ;;  %6694 = vst [vmem:[#allocation10_spill] sm:$0xff] %v3716_v61  ;;  %v613_v28 = vsel %vm513_vm0, %v608_v16, %v612_v19  ;;  %v605_v32 = vsel %vm513_vm0, %v600_v21, %v604_v59  ;;  %v628_v33 = vrot.slane %v3744_v23, 1  ;;  %v620_v34 = vrot.slane %v3747_v24, 1  ;;  %v3803_v21 = vld [vmem:[%s3602_s25 + $0xa0] sm:$0xff] }
  0x29   : > { %6695 = vst [vmem:[#allocation11_spill] sm:$0xff] %v3722_v7  ;;  %v597_v40 = vsel %vm513_vm0, %v592_v25, %v596_v6  ;;  %v3771_v41 = vshrl.u32 %v3698_v52, 16  ;;  %v3779_v45 = vshll.u32 %v3758_v31, 16  ;;  %v636_v50 = vrot.slane %v3755_v30, 1 }
  0x2a   : > { %6696 = vst [vmem:[#allocation12_spill] sm:$0xff] %v3732_v15  ;;  %v632_v47 = vor.u32 %v3752_v29, %v628_v33  ;;  %v624_v54 = vor.u32 %v3764_v35, %v620_v34  ;;  %v3786_v55 = vshll.u32 %v3767_v36, 16  ;;  %v3791_v59 = vshrl.u32 %v3758_v31, 16  ;;  %v3366_v15 = vld [vmem:[%s3602_s25] sm:$0xf0] }
  0x2b   : > { %6697 = vst [vmem:[#allocation13_spill] sm:$0xff] %v3744_v23  ;;  %v616_v56 = vor.u32 %v3771_v41, %v612_v19  ;;  %v652_v58 = vrot.slane %v3779_v45, 1  ;;  %v3800_v16 = vshrl.u32 %v3767_v36, 16  ;;  %v3806_v19 = vld [vmem:[%s3602_s25 + $0x98] sm:$0xff] }
  0x2c   : > { %6698 = vst [vmem:[#allocation14_spill] sm:$0xff] %v3747_v24  ;;  %v629_v6 = vsel %vm513_vm0, %v624_v54, %v628_v33  ;;  %v3825_v54 = vshll.u32 %v3806_v19, 16 }
  0x2d   : > { %6699 = vst [vmem:[#allocation15_spill] sm:$0xff] %v3752_v29  ;;  %v621_v25 = vsel %vm513_vm0, %v616_v56, %v620_v34  ;;  %v3822_v34 = vshll.u32 %v3803_v21, 16 }
  0x2e   : > { %6700 = vst [vmem:[#allocation16_spill] sm:$0xff] %v3755_v30  ;;  %v3849_v30 = vshrl.u32 %v3776_v42, 16 }
  0x2f   : > { %806 = vrot.lane.b32.xlu2 %v589_v62, %s3535_s26  ;;  %804 = vrot.lane.b32.xlu1 %v581_v63, %s3535_s26  ;;  %6701 = vst [vmem:[#allocation17_spill] sm:$0xff] %v3764_v35  ;;  %v3794_v62 = vshll.u32 %v3776_v42, 16  ;;  %v637_v63 = vsel %vm513_vm0, %v632_v47, %v636_v50  ;;  %v676_v4 = vrot.slane %v3822_v34, 1 }
  0x30   : > { %802 = vrot.lane.b32.xlu0 %v573_v12, %s3535_s26  ;;  %6702 = vst [vmem:[#allocation18_spill] sm:$0xff] %v3771_v41  ;;  %v644_v12 = vrot.slane %v3786_v55, 1 }
  0x31   : > { %6703 = vst [vmem:[#allocation19_spill] sm:$0xff] %v3779_v45  ;;  %v660_v33 = vrot.slane %v3794_v62, 1 }
  0x32   : > { %6704 = vst [vmem:[#allocation20_spill] sm:$0xff] %v3786_v55  ;;  %v648_v47 = vor.u32 %v3800_v16, %v644_v12 }
  0x33   : > { %6705 = vst [vmem:[#allocation21_spill] sm:$0xff] %v3791_v59 }
  0x34   : > { %6706 = vst [vmem:[#allocation22_spill] sm:$0xff] %v3794_v62  ;;  %v653_v3 = vsel %vm513_vm0, %v648_v47, %v652_v58  ;;  %v668_v62 = vrot.slane %v3825_v54, 1  ;;  %v3860_v47 = vshll.u32 %v3839_v18, 16 }
  0x35   : > { %6707 = vst [vmem:[#allocation23_spill] sm:$0xff] %v3800_v16 }
  0x36   : > { %6709 = vst [vmem:[#allocation25_spill] sm:$0xff] %v3822_v34 }
  0x37   : > { %812 = vrot.lane.b32.xlu2 %v613_v28, %s3535_s26  ;;  %810 = vrot.lane.b32.xlu1 %v605_v32, %s3535_s26  ;;  %v3810_v28 = vshrl.u32 %v3739_v20, 16  ;;  %v656_v32 = vor.u32 %v3791_v59, %v652_v58  ;;  %6710 = vst [vmem:[#allocation26_spill] sm:$0xff] %v3825_v54  ;;  %v692_v59 = vrot.slane %v3860_v47, 1 }
  0x38   : > { %808 = vrot.lane.b32.xlu0 %v597_v40, %s3535_s26  ;;  %v3817_v40 = vld [vmem:[%s3602_s25 + $0xa8] sm:$0xff]  ;;  %6714 = vst [vmem:[#allocation30_spill] sm:$0xff] %v3849_v30 }
  0x39   : > { %6708 = vst [vmem:[#allocation24_spill] sm:$0xff] %v3810_v28  ;;  %v640_v56 = vor.u32 %v3810_v28, %v636_v50  ;;  %v3833_v17 = vshll.u32 %v3817_v40, 16  ;;  %v3845_v50 = vshrl.u32 %v3806_v19, 16  ;;  %v3854_v28 = vld [vmem:[%s3602_s25 + $0xc0] sm:$0xff] }
  0x3a   : > { %6716 = vst [vmem:[#allocation32_spill] sm:$0xff] %v3860_v47  ;;  %v3872_v45 = vshll.u32 %v3854_v28, 16 }
  0x3b   : > { %6712 = vst [vmem:[#allocation28_spill] sm:$0xff] %v3833_v17 }
  0x3c   : > { %6713 = vst [vmem:[#allocation29_spill] sm:$0xff] %v3845_v50 }
  0x3d   : > { %6718 = vst [vmem:[#allocation34_spill] sm:$0xff] %v3872_v45 }
  0x3f   : > { %818 = vrot.lane.b32.xlu2 %v637_v63, %s3535_s26  ;;  %816 = vrot.lane.b32.xlu1 %v629_v6, %s3535_s26  ;;  %v661_v63 = vsel %vm513_vm0, %v656_v32, %v660_v33  ;;  %v3830_v6 = vshrl.u32 %v3803_v21, 16  ;;  %v645_v32 = vsel %vm513_vm0, %v640_v56, %v644_v12  ;;  %v684_v56 = vrot.slane %v3833_v17, 1 }
  0x40   : > { %814 = vrot.lane.b32.xlu0 %v621_v25, %s3535_s26  ;;  %v3836_v25 = vld [vmem:[%s3602_s25 + $0xb8] sm:$0xff] }
  0x41   : > { %6711 = vst [vmem:[#allocation27_spill] sm:$0xff] %v3830_v6  ;;  %v3857_v58 = vshll.u32 %v3836_v25, 16  ;;  %v680_v12 = vor.u32 %v3830_v6, %v676_v4  ;;  %v3868_v34 = vshrl.u32 %v3836_v25, 16 }
  0x43   : > { %6715 = vst [vmem:[#allocation31_spill] sm:$0xff] %v3857_v58  ;;  %v700_v54 = vrot.slane %v3857_v58, 1  ;;  %v685_v17 = vsel %vm513_vm0, %v680_v12, %v684_v56  ;;  %v708_v12 = vrot.slane %v3872_v45, 1 }
  0x44   : > { %6717 = vst [vmem:[#allocation33_spill] sm:$0xff] %v3868_v34 }
  0x45   : > { %v704_v47 = vor.u32 %v3868_v34, %v700_v54 }
  0x47   : > { %824 = vrot.lane.b32.xlu2 %v661_v63, %s3535_s26  ;;  %822 = vrot.lane.b32.xlu1 %v653_v3, %s3535_s26  ;;  %v672_v63 = vor.u32 %v3845_v50, %v668_v62  ;;  %v664_v3 = vor.u32 %v3849_v30, %v660_v33  ;;  %v3881_v50 = vld [vmem:[%s3602_s25 + $0xd0] sm:$0xff]  ;;  %v3884_v33 = vld [vmem:[%s3602_s25 + $0xc8] sm:$0xff]  ;;  %v3888_v30 = vshrl.u32 %v3817_v40, 16 }
  0x48   : > { %820 = vrot.lane.b32.xlu0 %v645_v32, %s3535_s26  ;;  %v3876_v32 = vshrl.u32 %v3839_v18, 16  ;;  %v3909_v45 = vshrl.u32 %v3881_v50, 16 }
  0x49   : > { %v677_v6 = vsel %vm513_vm0, %v672_v63, %v676_v4  ;;  %v669_v58 = vsel %vm513_vm0, %v664_v3, %v668_v62  ;;  %6720 = vst [vmem:[#allocation36_spill] sm:$0xff] %v3888_v30  ;;  %v3897_v63 = vld [vmem:[%s3602_s25 + $0xd8] sm:$0xff]  ;;  %v3900_v62 = vshll.u32 %v3881_v50, 16  ;;  %v3903_v3 = vshll.u32 %v3884_v33, 16 }
  0x4a   : > { %6719 = vst [vmem:[#allocation35_spill] sm:$0xff] %v3876_v32  ;;  %v696_v4 = vor.u32 %v3876_v32, %v692_v59  ;;  %v3912_v32 = vld [vmem:[%s3602_s25 + $0xe8] sm:$0xff]  ;;  %v3919_v16 = vshll.u32 %v3897_v63, 16 }
  0x4b   : > { %6721 = vst [vmem:[#allocation37_spill] sm:$0xff] %v3900_v62  ;;  %v724_v55 = vrot.slane %v3900_v62, 1  ;;  %v716_v61 = vrot.slane %v3903_v3, 1  ;;  %v3935_v62 = vshll.u32 %v3912_v32, 16 }
  0x4c   : > { %6722 = vst [vmem:[#allocation38_spill] sm:$0xff] %v3903_v3  ;;  %v701_v34 = vsel %vm513_vm0, %v696_v4, %v700_v54  ;;  %v3927_v54 = vshrl.u32 %v3854_v28, 16  ;;  %v3932_v4 = vld [vmem:[%s3602_s25 + $0xf0] sm:$0xff] }
  0x4d   : > { %6723 = vst [vmem:[#allocation39_spill] sm:$0xff] %v3909_v45  ;;  %v748_v41 = vrot.slane %v3935_v62, 1  ;;  %v3950_v23 = vshll.u32 %v3932_v4, 16 }
  0x4e   : > { %6724 = vst [vmem:[#allocation40_spill] sm:$0xff] %v3919_v16 }
  0x4f   : > { %830 = vrot.lane.b32.xlu2 %v685_v17, %s3535_s26  ;;  %828 = vrot.lane.b32.xlu1 %v677_v6, %s3535_s26  ;;  %v688_v17 = vor.u32 %v3888_v30, %v684_v56  ;;  %v709_v6 = vsel %vm513_vm0, %v704_v47, %v708_v12  ;;  %v3923_v56 = vshrl.u32 %v3884_v33, 16  ;;  %6726 = vst [vmem:[#allocation42_spill] sm:$0xff] %v3927_v54  ;;  %v3946_v30 = vshrl.u32 %v3912_v32, 16 }
  0x50   : > { %826 = vrot.lane.b32.xlu0 %v669_v58, %s3535_s26  ;;  %v3915_v58 = vld [vmem:[%s3602_s25 + $0xe0] sm:$0xff]  ;;  %6727 = vst [vmem:[#allocation43_spill] sm:$0xff] %v3935_v62 }
  0x51   : > { %6725 = vst [vmem:[#allocation41_spill] sm:$0xff] %v3923_v56  ;;  %v693_v47 = vsel %vm513_vm0, %v688_v17, %v692_v59  ;;  %v3938_v3 = vshll.u32 %v3915_v58, 16  ;;  %v728_v59 = vor.u32 %v3909_v45, %v724_v55  ;;  %v732_v17 = vrot.slane %v3919_v16, 1 }
  0x52   : > { %6729 = vst [vmem:[#allocation45_spill] sm:$0xff] %v3946_v30 }
  0x53   : > { %6728 = vst [vmem:[#allocation44_spill] sm:$0xff] %v3938_v3  ;;  %v740_v29 = vrot.slane %v3938_v3, 1  ;;  %v733_v16 = vsel %vm513_vm0, %v728_v59, %v732_v17  ;;  %v752_v3 = vor.u32 %v3946_v30, %v748_v41  ;;  %v756_v59 = vrot.slane %v3950_v23, 1 }
  0x54   : > { %6730 = vst [vmem:[#allocation46_spill] sm:$0xff] %v3950_v23 }
  0x57   : > { %836 = vrot.lane.b32.xlu2 %v709_v6, %s3535_s26  ;;  %834 = vrot.lane.b32.xlu1 %v701_v34, %s3535_s26  ;;  %v720_v6 = vor.u32 %v3923_v56, %v716_v61  ;;  %v712_v34 = vor.u32 %v3927_v54, %v708_v12  ;;  %v3959_v12 = vld [vmem:[%s3602_s25 + $0x100] sm:$0xff]  ;;  %v3962_v54 = vld [vmem:[%s3602_s25 + $0xf8] sm:$0xff]  ;;  %v3966_v56 = vshrl.u32 %v3897_v63, 16 }
  0x58   : > { %832 = vrot.lane.b32.xlu0 %v693_v47, %s3535_s26  ;;  %v3954_v47 = vshrl.u32 %v3915_v58, 16  ;;  %v3988_v23 = vshrl.u32 %v3959_v12, 16  ;;  %v3996_v46 = vshrl.u32 %v3962_v54, 16 }
  0x59   : > { %v725_v45 = vsel %vm513_vm0, %v720_v6, %v724_v55  ;;  %v717_v62 = vsel %vm513_vm0, %v712_v34, %v716_v61  ;;  %6732 = vst [vmem:[#allocation48_spill] sm:$0xff] %v3966_v56  ;;  %v3975_v55 = vld [vmem:[%s3602_s25 + $0x108] sm:$0xff]  ;;  %v3978_v6 = vshll.u32 %v3959_v12, 16  ;;  %v3981_v61 = vshll.u32 %v3962_v54, 16  ;;  %v322_v34 = vld [vmem:[%s3602_s25 + $0x110] sm:$0x1] }
  0x5a   : > { %6731 = vst [vmem:[#allocation47_spill] sm:$0xff] %v3954_v47  ;;  %v744_v24 = vor.u32 %v3954_v47, %v740_v29  ;;  %v3992_v47 = vshll.u32 %v3975_v55, 16 }
  0x5b   : > { %6733 = vst [vmem:[#allocation49_spill] sm:$0xff] %v3978_v6  ;;  %v764_v35 = vrot.slane %v3981_v61, 1 }
  0x5c   : > { %6734 = vst [vmem:[#allocation50_spill] sm:$0xff] %v3981_v61  ;;  %v749_v30 = vsel %vm513_vm0, %v744_v24, %v748_v41  ;;  %v511_v24 = vunpack.c.l.b16 %v322_v34 }
  0x5d   : > { %6735 = vst [vmem:[#allocation51_spill] sm:$0xff] %v3992_v47  ;;  %v768_v61 = vor.u32 %v3996_v46, %v764_v35 }
  0x5f   : > { %842 = vrot.lane.b32.xlu2 %v733_v16, %s3535_s26  ;;  %840 = vrot.lane.b32.xlu1 %v725_v45, %s3535_s26  ;;  %v736_v16 = vor.u32 %v3966_v56, %v732_v17  ;;  %v757_v45 = vsel %vm513_vm0, %v752_v3, %v756_v59  ;;  %v4000_v3 = vshrl.u32 %v3932_v4, 16 }
  0x60   : > { %838 = vrot.lane.b32.xlu0 %v717_v62, %s3535_s26  ;;  %v772_v62 = vrot.slane %v3978_v6, 1  ;;  %v780_v6 = vrot.slane %v3992_v47, 1 }
  0x61   : > { %v741_v17 = vsel %vm513_vm0, %v736_v16, %v740_v29  ;;  %v760_v56 = vor.u32 %v4000_v3, %v756_v59  ;;  %v3367_v29 = vld [vmem:[%s3602_s25] sm:$0xe]  ;;  %v4011_v16 = vpack.c.b16 %v511_v24, %v511_v24  ;;  %v863_v59 = vrot.slane %v3625_v10, 1 }
  0x62   : > { %v776_v41 = vor.u32 %v3988_v23, %v772_v62  ;;  %v3368_v53 = vor.u32 %v3367_v29, %v3366_v15  ;;  %v865_v24 = vrot.slane %v3611_v2, 1  ;;  %v869_v10 = vrot.slane %v3605_v0, 1 }
  0x63   : > { %v786_v47 = vshll.u32 %v4011_v16, 16 }
  0x64   : > { %v781_v34 = vsel %vm513_vm0, %v776_v41, %v780_v6  ;;  %v862_v41 = vrot.slane %v3368_v53, 1  ;;  %v871_v53 = vrot.slane %v3608_v1, 1  ;;  %v875_v1 = vrot.slane %v3650_v27, 1 }
  0x65   : > { %v879_v27 = vrot.slane %v3664_v37, 1  ;;  %v887_v37 = vrot.slane %v3728_v11, 1  ;;  %v891_v11 = vrot.slane %v3739_v20, 1  ;;  %v899_v20 = vrot.slane %v3806_v19, 1 }
  0x66   : > { %v4040_v29 = vsel %vm861_vm1, %v869_v10, %v871_v53  ;;  %v903_v19 = vrot.slane %v3817_v40, 1  ;;  %v913_v40 = vrot.slane %v3881_v50, 1  ;;  %v919_v50 = vrot.slane %v3912_v32, 1 }
  0x67   : > { %848 = vrot.lane.b32.xlu2 %v757_v45, %s3535_s26  ;;  %846 = vrot.lane.b32.xlu1 %v749_v30, %s3535_s26  ;;  %v773_v45 = vsel %vm513_vm0, %v768_v61, %v772_v62  ;;  %v765_v30 = vsel %vm513_vm0, %v760_v56, %v764_v35  ;;  %v788_v35 = vrot.slane %v786_v47, 1  ;;  %v866_v56 = vsel %vm861_vm1, %v863_v59, %v865_v24 }
  0x68   : > { %844 = vrot.lane.b32.xlu0 %v741_v17, %s3535_s26  ;;  %v4017_v17 = vshrl.u32 %v3975_v55, 16  ;;  %v864_v61 = vsel %vm861_vm1, %v862_v41, %v863_v59  ;;  %v873_v59 = vrot.slane %v3628_v13, 1  ;;  %v881_v13 = vrot.slane %v3689_v49, 1 }
  0x69   : > { %v885_v49 = vrot.slane %v3698_v52, 1  ;;  %v893_v52 = vrot.slane %v3767_v36, 1  ;;  %v897_v36 = vrot.slane %v3776_v42, 1  ;;  %v905_v42 = vrot.slane %v3839_v18, 1 }
  0x6a   : > { %6736 = vst [vmem:[#allocation52_spill] sm:$0xff] %v4017_v17  ;;  %v784_v15 = vor.u32 %v4017_v17, %v780_v6  ;;  %v4035_v6 = vrot.slane %v3616_v5, 1  ;;  %v911_v18 = vrot.slane %v3884_v33, 1  ;;  %v915_v33 = vrot.slane %v3897_v63, 1 }
  0x6b   : > { %v923_v32 = vrot.slane %v3962_v54, 1  ;;  %v925_v63 = vrot.slane %v3959_v12, 1 }
  0x6c   : > { %v789_v62 = vsel %vm513_vm0, %v784_v15, %v788_v35  ;;  %v4065_v35 = vsel %vm861_vm1, %v871_v53, %v873_v59  ;;  %vm2907_vm0 = vcmask 519168  }
  0x6f   : > { %854 = vrot.lane.b32.xlu2 %v781_v34, %s3535_s26  ;;  %852 = vrot.lane.b32.xlu1 %v773_v45, %s3535_s26  ;;  %v4044_v34 = vsel %vm861_vm1, %v4035_v6, %v869_v10  ;;  %v868_v45 = vsel %vm861_vm1, %v865_v24, %v4035_v6  ;;  %v4062_v24 = vsel %vm861_vm1, %v873_v59, %v875_v1 }
  0x70   : > { %850 = vrot.lane.b32.xlu0 %v765_v30, %s3535_s26  ;;  %v877_v30 = vrot.slane %v3647_v26, 1  ;;  %v883_v26 = vrot.slane %v3678_v44, 1  ;;  %v889_v44 = vrot.slane %v3725_v8, 1  ;;  %v4106_v59 = vsel %vm861_vm1, %v885_v49, %v887_v37 }
  0x71   : > { %v895_v8 = vrot.slane %v3758_v31, 1  ;;  %v901_v31 = vrot.slane %v3803_v21, 1  ;;  %v907_v21 = vrot.slane %v3836_v25, 1  ;;  %v909_v25 = vrot.slane %v3854_v28, 1 }
  0x72   : > { %v4059_v15 = vsel %vm861_vm1, %v875_v1, %v877_v30  ;;  %v4085_v10 = vsel %vm861_vm1, %v877_v30, %v879_v27  ;;  %v4103_v30 = vsel %vm861_vm1, %v887_v37, %v889_v44  ;;  %v917_v28 = vrot.slane %v3915_v58, 1  ;;  %v324_v58 = vld [vmem:[%s3602_s25 + $0x10] sm:$0xe] }
  0x77   : > { %933 = vrot.lane.b32.xlu2 %v866_v56, %s3536_s27  ;;  %931 = vrot.lane.b32.xlu1 %v864_v61, %s3536_s27  ;;  %v4079_v61 = vsel %vm861_vm1, %v881_v13, %v883_v26 }
  0x78   : > { %856 = vrot.lane.b32.xlu0 %v789_v62, %s3535_s26  ;;  %v4082_v62 = vsel %vm861_vm1, %v879_v27, %v881_v13  ;;  %v4109_v13 = vsel %vm861_vm1, %v883_v26, %v885_v49  ;;  %v4127_v49 = vsel %vm861_vm1, %v893_v52, %v895_v8  ;;  %s3387_s26 = smul.u32 136, %s7194_s13 }
  0x79   : > { %v4037_v47 = vpop.permute.xlu2 %798 }
  0x7a   : > { %6737 = vst [vmem:[#allocation53_spill] sm:$0xff] %v4037_v47  ;;  %v4133_v47 = vsel %vm861_vm1, %v889_v44, %v891_v11 }
  0x7f   : > { %939 = vrot.lane.b32.xlu2 %v4040_v29, %s3536_s27  ;;  %937 = vrot.lane.b32.xlu1 %v4044_v34, %s3536_s27 }
  0x80   : > { %935 = vrot.lane.b32.xlu0 %v868_v45, %s3536_s27 }
  0x81   : > { %v4056_v41 = vpop.permute.xlu2 %800 }
  0x82   : > { %6738 = vst [vmem:[#allocation54_spill] sm:$0xff] %v4056_v41  ;;  %v4130_v41 = vsel %vm861_vm1, %v891_v11, %v893_v52  ;;  %v4151_v11 = vsel %vm861_vm1, %v899_v20, %v901_v31 }
  0x87   : > { %945 = vrot.lane.b32.xlu2 %v4059_v15, %s3536_s27  ;;  %943 = vrot.lane.b32.xlu1 %v4062_v24, %s3536_s27 }
  0x88   : > { %941 = vrot.lane.b32.xlu0 %v4065_v35, %s3536_s27 }
  0x89   : > { %v4076_v56 = vpop.permute.xlu2 %806 }
  0x8a   : > { %6739 = vst [vmem:[#allocation55_spill] sm:$0xff] %v4076_v56 }
  0x8f   : > { %951 = vrot.lane.b32.xlu2 %v4079_v61, %s3536_s27  ;;  %949 = vrot.lane.b32.xlu1 %v4082_v62, %s3536_s27 }
  0x90   : > { %947 = vrot.lane.b32.xlu0 %v4085_v10, %s3536_s27 }
  0x91   : > { %v4096_v53 = vpop.permute.xlu2 %812  ;;  %v4098_v45 = vpop.permute.xlu1 %794 }
  0x92   : > { %6740 = vst [vmem:[#allocation56_spill] sm:$0xff] %v4096_v53  ;;  %v4100_v1 = vpop.permute.xlu0 %790  ;;  %v4181_v53 = vsel %vm861_vm1, %v901_v31, %v903_v19 }
  0x93   : > { %6741 = vst [vmem:[#allocation57_spill] sm:$0xff] %v4098_v45  ;;  %v4157_v45 = vsel %vm861_vm1, %v895_v8, %v897_v36 }
  0x94   : > { %6742 = vst [vmem:[#allocation58_spill] sm:$0xff] %v4100_v1  ;;  %v4229_v1 = vsel %vm861_vm1, %v913_v40, %v915_v33 }
  0x97   : > { %957 = vrot.lane.b32.xlu2 %v4103_v30, %s3536_s27  ;;  %955 = vrot.lane.b32.xlu1 %v4106_v59, %s3536_s27 }
  0x98   : > { %953 = vrot.lane.b32.xlu0 %v4109_v13, %s3536_s27 }
  0x99   : > { %v4120_v27 = vpop.permute.xlu2 %818  ;;  %v4122_v37 = vpop.permute.xlu1 %796 }
  0x9a   : > { %6743 = vst [vmem:[#allocation59_spill] sm:$0xff] %v4120_v27  ;;  %v4124_v26 = vpop.permute.xlu0 %792 }
  0x9b   : > { %6744 = vst [vmem:[#allocation60_spill] sm:$0xff] %v4122_v37  ;;  %v4154_v37 = vsel %vm861_vm1, %v897_v36, %v899_v20  ;;  %v4175_v36 = vsel %vm861_vm1, %v905_v42, %v907_v21 }
  0x9c   : > { %6745 = vst [vmem:[#allocation61_spill] sm:$0xff] %v4124_v26  ;;  %v4202_v26 = vsel %vm861_vm1, %v909_v25, %v911_v18 }
  0x9f   : > { %963 = vrot.lane.b32.xlu2 %v4127_v49, %s3536_s27  ;;  %961 = vrot.lane.b32.xlu1 %v4130_v41, %s3536_s27 }
  0xa0   : > { %959 = vrot.lane.b32.xlu0 %v4133_v47, %s3536_s27 }
  0xa1   : > { %v4144_v52 = vpop.permute.xlu2 %824  ;;  %v4146_v27 = vpop.permute.xlu1 %804 }
  0xa2   : > { %6746 = vst [vmem:[#allocation62_spill] sm:$0xff] %v4144_v52  ;;  %v4148_v44 = vpop.permute.xlu0 %802  ;;  %v6850_v52 = vld [vmem:[#allocation38_spill] sm:$0xff] }
  0xa3   : > { %6747 = vst [vmem:[#allocation63_spill] sm:$0xff] %v4146_v27 }
  0xa4   : > { %6748 = vst [vmem:[#allocation64_spill] sm:$0xff] %v4148_v44  ;;  %v4178_v44 = vsel %vm861_vm1, %v903_v19, %v905_v42  ;;  %v4199_v19 = vsel %vm861_vm1, %v911_v18, %v913_v40  ;;  %v1005_v40 = vunpack.c.l.b16 %v324_v58 }
  0xa7   : > { %969 = vrot.lane.b32.xlu2 %v4151_v11, %s3536_s27  ;;  %967 = vrot.lane.b32.xlu1 %v4154_v37, %s3536_s27 }
  0xa8   : > { %965 = vrot.lane.b32.xlu0 %v4157_v45, %s3536_s27 }
  0xa9   : > { %v4168_v20 = vpop.permute.xlu2 %830  ;;  %v4170_v27 = vpop.permute.xlu1 %810 }
  0xaa   : > { %6749 = vst [vmem:[#allocation65_spill] sm:$0xff] %v4168_v20  ;;  %v4172_v8 = vpop.permute.xlu0 %808 }
  0xab   : > { %6750 = vst [vmem:[#allocation66_spill] sm:$0xff] %v4170_v27  ;;  %v4205_v27 = vsel %vm861_vm1, %v907_v21, %v909_v25  ;;  %v4223_v25 = vsel %vm861_vm1, %v917_v28, %v919_v50 }
  0xac   : > { %6751 = vst [vmem:[#allocation67_spill] sm:$0xff] %v4172_v8 }
  0xaf   : > { %975 = vrot.lane.b32.xlu2 %v4175_v36, %s3536_s27  ;;  %973 = vrot.lane.b32.xlu1 %v4178_v44, %s3536_s27 }
  0xb0   : > { %971 = vrot.lane.b32.xlu0 %v4181_v53, %s3536_s27 }
  0xb1   : > { %v4192_v42 = vpop.permute.xlu2 %836  ;;  %v4194_v20 = vpop.permute.xlu1 %816 }
  0xb2   : > { %6752 = vst [vmem:[#allocation68_spill] sm:$0xff] %v4192_v42  ;;  %v4196_v31 = vpop.permute.xlu0 %814 }
  0xb3   : > { %6753 = vst [vmem:[#allocation69_spill] sm:$0xff] %v4194_v20 }
  0xb4   : > { %6754 = vst [vmem:[#allocation70_spill] sm:$0xff] %v4196_v31  ;;  %v4226_v31 = vsel %vm861_vm1, %v915_v33, %v917_v28  ;;  %v921_v28 = vrot.slane %v3932_v4, 1 }
  0xb6   : > { %v4252_v54 = vsel %vm861_vm1, %v921_v28, %v923_v32  ;;  %v4259_v4 = vsel %vm861_vm1, %v919_v50, %v921_v28 }
  0xb7   : > { %981 = vrot.lane.b32.xlu2 %v4199_v19, %s3536_s27  ;;  %979 = vrot.lane.b32.xlu1 %v4202_v26, %s3536_s27 }
  0xb8   : > { %977 = vrot.lane.b32.xlu0 %v4205_v27, %s3536_s27 }
  0xb9   : > { %v4216_v18 = vpop.permute.xlu2 %842  ;;  %v4218_v20 = vpop.permute.xlu1 %822 }
  0xba   : > { %6755 = vst [vmem:[#allocation71_spill] sm:$0xff] %v4216_v18  ;;  %v4220_v21 = vpop.permute.xlu0 %820  ;;  %v4249_v18 = vsel %vm861_vm1, %v923_v32, %v925_v63  ;;  %v4269_v32 = vrot.slane %v3975_v55, 1 }
  0xbb   : > { %6756 = vst [vmem:[#allocation72_spill] sm:$0xff] %v4218_v20  ;;  %v6614_v20 = vunpack.c.h.b16 %v3611_v2 }
  0xbc   : > { %6757 = vst [vmem:[#allocation73_spill] sm:$0xff] %v4220_v21  ;;  %v4284_v56 = vsel %vm861_vm1, %v925_v63, %v4269_v32 }
  0xbd   : > { %v4256_v12 = vpack.c.b16 %v6614_v20, %v1005_v40  ;;  %v929_v40 = vrot.slane %v4011_v16, 1 }
  0xbf   : > { %987 = vrot.lane.b32.xlu2 %v4223_v25, %s3536_s27  ;;  %985 = vrot.lane.b32.xlu1 %v4226_v31, %s3536_s27  ;;  %v1015_v58 = vrot.slane %v4256_v12, 1 }
  0xc0   : > { %983 = vrot.lane.b32.xlu0 %v4229_v1, %s3536_s27 }
  0xc1   : > { %v4242_v33 = vpop.permute.xlu2 %848  ;;  %v4244_v21 = vpop.permute.xlu1 %828 }
  0xc2   : > { %6758 = vst [vmem:[#allocation74_spill] sm:$0xff] %v4242_v33  ;;  %v4246_v8 = vpop.permute.xlu0 %826 }
  0xc3   : > { %6759 = vst [vmem:[#allocation75_spill] sm:$0xff] %v4244_v21  ;;  %v1016_v21 = vsel %vm861_vm1, %v1015_v58, %v4035_v6  ;;  %v329_v58 = vld [vmem:[%s3602_s25 + $0x120] sm:$0x1] }
  0xc4   : > { %6760 = vst [vmem:[#allocation76_spill] sm:$0xff] %v4246_v8  ;;  %v930_v8 = vsel %vm861_vm1, %v4269_v32, %v929_v40 }
  0xc7   : > { %993 = vrot.lane.b32.xlu2 %v4249_v18, %s3536_s27  ;;  %991 = vrot.lane.b32.xlu1 %v4252_v54, %s3536_s27 }
  0xc8   : > { %989 = vrot.lane.b32.xlu0 %v4259_v4, %s3536_s27 }
  0xc9   : > { %v4272_v20 = vpop.permute.xlu2 %854  ;;  %v4274_v50 = vpop.permute.xlu1 %834 }
  0xca   : > { %6761 = vst [vmem:[#allocation77_spill] sm:$0xff] %v4272_v20  ;;  %v4276_v28 = vpop.permute.xlu0 %832 }
  0xcb   : > { %6762 = vst [vmem:[#allocation78_spill] sm:$0xff] %v4274_v50 }
  0xcc   : > { %6763 = vst [vmem:[#allocation79_spill] sm:$0xff] %v4276_v28 }
  0xcf   : > { %1023 = vrot.lane.b32.xlu2 %v1016_v21, %s3537_s28  ;;  %997 = vrot.lane.b32.xlu1 %v930_v8, %s3536_s27 }
  0xd0   : > { %995 = vrot.lane.b32.xlu0 %v4284_v56, %s3536_s27  ;;  %s250_s27 = sadd.s32 %s3387_s26, %s3386_s24 }
  0xd1   : > { %v4290_v55 = vpop.permute.xlu1 %840  ;;  %v4292_v16 = vpop.permute.xlu2 %933 }
  0xd2   : > { %6764 = vst [vmem:[#allocation80_spill] sm:$0xff] %v4292_v16  ;;  %v4294_v6 = vpop.permute.xlu0 %838 }
  0xd3   : > { %6765 = vst [vmem:[#allocation81_spill] sm:$0xff] %v4294_v6 }
  0xd7   : > { %1029 = vrot.lane.b32.xlu2 %v4065_v35, %s3537_s28  ;;  %1027 = vrot.lane.b32.xlu1 %v4040_v29, %s3537_s28 }
  0xd8   : > { %1025 = vrot.lane.b32.xlu0 %v4044_v34, %s3537_s28 }
  0xd9   : > { %v4302_v21 = vpop.permute.xlu1 %846  ;;  %v4304_v8 = vpop.permute.xlu2 %939 }
  0xda   : > { %6766 = vst [vmem:[#allocation82_spill] sm:$0xff] %v4302_v21  ;;  %v4306_v63 = vpop.permute.xlu0 %844 }
  0xdb   : > { %6767 = vst [vmem:[#allocation83_spill] sm:$0xff] %v4304_v8  ;;  %v6799_v8 = vshrl.u32 %v3616_v5, 16 }
  0xdc   : > { %6768 = vst [vmem:[#allocation84_spill] sm:$0xff] %v4306_v63 }
  0xdf   : > { %1035 = vrot.lane.b32.xlu2 %v4085_v10, %s3537_s28  ;;  %1033 = vrot.lane.b32.xlu1 %v4059_v15, %s3537_s28 }
  0xe0   : > { %1031 = vrot.lane.b32.xlu0 %v4062_v24, %s3537_s28 }
  0xe1   : > { %v4314_v35 = vpop.permute.xlu1 %852  ;;  %v4316_v29 = vpop.permute.xlu2 %945 }
  0xe2   : > { %6769 = vst [vmem:[#allocation85_spill] sm:$0xff] %v4314_v35  ;;  %v4318_v34 = vpop.permute.xlu0 %850  ;;  %v1112_v35 = vrot.slane %v3622_v9, 2 }
  0xe3   : > { %6770 = vst [vmem:[#allocation86_spill] sm:$0xff] %v4316_v29  ;;  %v4406_v29 = vld [vmem:[%s3602_s25 + $0x118] sm:$0xff] }
  0xe4   : > { %6771 = vst [vmem:[#allocation87_spill] sm:$0xff] %v4318_v34 }
  0xe5   : > { %6792 = vst [vmem:[#allocation108_spill] sm:$0xff] %v4406_v29 }
  0xe7   : > { %1041 = vrot.lane.b32.xlu2 %v4109_v13, %s3537_s28  ;;  %1039 = vrot.lane.b32.xlu1 %v4079_v61, %s3537_s28 }
  0xe8   : > { %1037 = vrot.lane.b32.xlu0 %v4082_v62, %s3537_s28 }
  0xe9   : > { %v4326_v10 = vpop.permute.xlu2 %951  ;;  %v4328_v15 = vpop.permute.xlu1 %931 }
  0xea   : > { %6772 = vst [vmem:[#allocation88_spill] sm:$0xff] %v4326_v10  ;;  %v4330_v24 = vpop.permute.xlu0 %856 }
  0xeb   : > { %6773 = vst [vmem:[#allocation89_spill] sm:$0xff] %v4328_v15 }
  0xec   : > { %6774 = vst [vmem:[#allocation90_spill] sm:$0xff] %v4330_v24  ;;  %v4409_v24 = vld [vmem:[%s3602_s25 + $0x110] sm:$0xff] }
  0xed   : > { %6793 = vst [vmem:[#allocation109_spill] sm:$0xff] %v4409_v24  ;;  %v6620_v63 = vshll.u32 %v4409_v24, 16 }
  0xef   : > { %1047 = vrot.lane.b32.xlu2 %v4133_v47, %s3537_s28  ;;  %1045 = vrot.lane.b32.xlu1 %v4103_v30, %s3537_s28 }
  0xf0   : > { %1043 = vrot.lane.b32.xlu0 %v4106_v59, %s3537_s28 }
  0xf1   : > { %v4338_v13 = vpop.permute.xlu2 %957  ;;  %v4340_v61 = vpop.permute.xlu1 %937 }
  0xf2   : > { %6775 = vst [vmem:[#allocation91_spill] sm:$0xff] %v4338_v13  ;;  %v4342_v62 = vpop.permute.xlu0 %935  ;;  %v1103_v13 = vrot.slane %v6799_v8, 1 }
  0xf3   : > { %6776 = vst [vmem:[#allocation92_spill] sm:$0xff] %v4340_v61 }
  0xf4   : > { %6777 = vst [vmem:[#allocation93_spill] sm:$0xff] %v4342_v62 }
  0xf7   : > { %1053 = vrot.lane.b32.xlu2 %v4157_v45, %s3537_s28  ;;  %1051 = vrot.lane.b32.xlu1 %v4127_v49, %s3537_s28 }
  0xf8   : > { %1049 = vrot.lane.b32.xlu0 %v4130_v41, %s3537_s28 }
  0xf9   : > { %v4350_v47 = vpop.permute.xlu2 %963  ;;  %v4352_v30 = vpop.permute.xlu1 %943 }
  0xfa   : > { %6778 = vst [vmem:[#allocation94_spill] sm:$0xff] %v4350_v47  ;;  %v4354_v59 = vpop.permute.xlu0 %941 }
  0xfb   : > { %6779 = vst [vmem:[#allocation95_spill] sm:$0xff] %v4352_v30  ;;  %v1099_v30 = vshll.u32 %v4256_v12, 16 }
  0xfc   : > { %6780 = vst [vmem:[#allocation96_spill] sm:$0xff] %v4354_v59  ;;  %v6798_v59 = vshll.u32 %v3605_v0, 16 }
  0xfd   : > { %v1101_v50 = vrot.slane %v1099_v30, 2  ;;  %v1120_v30 = vrot.slane %v3670_v39, 2 }
  0xff   : > { %1059 = vrot.lane.b32.xlu2 %v4181_v53, %s3537_s28  ;;  %1057 = vrot.lane.b32.xlu1 %v4151_v11, %s3537_s28 }
 0x100   : > { %1055 = vrot.lane.b32.xlu0 %v4154_v37, %s3537_s28 }
 0x101   : > { %v4362_v45 = vpop.permute.xlu2 %969  ;;  %v4364_v49 = vpop.permute.xlu1 %949 }
 0x102   : > { %6781 = vst [vmem:[#allocation97_spill] sm:$0xff] %v4362_v45  ;;  %v4366_v41 = vpop.permute.xlu0 %947 }
 0x103   : > { %6782 = vst [vmem:[#allocation98_spill] sm:$0xff] %v4364_v49 }
 0x104   : > { %6783 = vst [vmem:[#allocation99_spill] sm:$0xff] %v4366_v41  ;;  %v6832_v41 = vld [vmem:[#allocation26_spill] sm:$0xff] }
 0x107   : > { %1065 = vrot.lane.b32.xlu2 %v4205_v27, %s3537_s28  ;;  %1063 = vrot.lane.b32.xlu1 %v4175_v36, %s3537_s28 }
 0x108   : > { %1061 = vrot.lane.b32.xlu0 %v4178_v44, %s3537_s28 }
 0x109   : > { %v4374_v53 = vpop.permute.xlu2 %975  ;;  %v4376_v11 = vpop.permute.xlu1 %955 }
 0x10a   : > { %6784 = vst [vmem:[#allocation100_spill] sm:$0xff] %v4374_v53  ;;  %v4378_v37 = vpop.permute.xlu0 %953 }
 0x10b   : > { %6785 = vst [vmem:[#allocation101_spill] sm:$0xff] %v4376_v11 }
 0x10c   : > { %6786 = vst [vmem:[#allocation102_spill] sm:$0xff] %v4378_v37  ;;  %v6814_v37 = vld [vmem:[#allocation14_spill] sm:$0xff] }
 0x10f   : > { %1071 = vrot.lane.b32.xlu2 %v4229_v1, %s3537_s28  ;;  %1069 = vrot.lane.b32.xlu1 %v4199_v19, %s3537_s28  ;;  %v1010_v1 = vunpack.c.l.b16 %v329_v58 }
 0x110   : > { %1067 = vrot.lane.b32.xlu0 %v4202_v26, %s3537_s28 }
 0x111   : > { %v4386_v27 = vpop.permute.xlu2 %981  ;;  %v4388_v44 = vpop.permute.xlu1 %961  ;;  %v1014_v47 = vpack.c.b16 %v1010_v1, %v1010_v1  ;;  %v1096_v1 = vshrl.u32 %v4256_v12, 16  ;;  %v6800_v12 = vshll.u32 %v3616_v5, 16 }
 0x112   : > { %6787 = vst [vmem:[#allocation103_spill] sm:$0xff] %v4388_v44  ;;  %v4390_v36 = vpop.permute.xlu0 %959 }
 0x113   : > { %6788 = vst [vmem:[#allocation104_spill] sm:$0xff] %v4390_v36  ;;  %v1104_v53 = vrot.slane %v6800_v12, 2 }
 0x117   : > { %1077 = vrot.lane.b32.xlu2 %v4259_v4, %s3537_s28  ;;  %1075 = vrot.lane.b32.xlu1 %v4223_v25, %s3537_s28  ;;  %v1019_v25 = vrot.slane %v4406_v29, 1  ;;  %v1017_v4 = vrot.slane %v4409_v24, 1 }
 0x118   : > { %1073 = vrot.lane.b32.xlu0 %v4226_v31, %s3537_s28  ;;  %v1021_v31 = vrot.slane %v1014_v47, 1  ;;  %v6797_v47 = vshrl.u32 %v3605_v0, 16 }
 0x119   : > { %v4399_v19 = vpop.permute.xlu2 %987  ;;  %v4401_v26 = vpop.permute.xlu1 %967  ;;  %v1020_v20 = vsel %vm861_vm1, %v1017_v4, %v1019_v25 }
 0x11a   : > { %6789 = vst [vmem:[#allocation105_spill] sm:$0xff] %v4399_v19  ;;  %v4403_v40 = vpop.permute.xlu0 %965  ;;  %v1107_v36 = vrot.slane %v6797_v47, 1  ;;  %v1105_v47 = vor.u32 %v1104_v53, %v1103_v13 }
 0x11b   : > { %6790 = vst [vmem:[#allocation106_spill] sm:$0xff] %v4401_v26  ;;  %v6831_v26 = vld [vmem:[#allocation29_spill] sm:$0xff] }
 0x11c   : > { %6791 = vst [vmem:[#allocation107_spill] sm:$0xff] %v4403_v40 }
 0x11f   : > { %1083 = vrot.lane.b32.xlu2 %v4284_v56, %s3537_s28  ;;  %1081 = vrot.lane.b32.xlu1 %v4249_v18, %s3537_s28  ;;  %v1022_v18 = vsel %vm861_vm1, %v1019_v25, %v1021_v31  ;;  %v1018_v31 = vsel %vm861_vm1, %v4269_v32, %v1017_v4  ;;  %v1098_v25 = vrot.slane %v1096_v1, 1  ;;  %v1119_v32 = vrot.slane %v3686_v48, 1 }
 0x120   : > { %1079 = vrot.lane.b32.xlu0 %v4252_v54, %s3537_s28  ;;  %v1108_v54 = vrot.slane %v6798_v59, 2  ;;  %v1123_v4 = vrot.slane %v3675_v43, 1 }
 0x121   : > { %v4419_v58 = vpop.permute.xlu2 %993  ;;  %v4421_v44 = vpop.permute.xlu1 %973  ;;  %v1102_v5 = vor.u32 %v1101_v50, %v1098_v25 }
 0x122   : > { %6794 = vst [vmem:[#allocation110_spill] sm:$0xff] %v4419_v58  ;;  %v4425_v56 = vpop.permute.xlu0 %971  ;;  %v1111_v58 = vrot.slane %v3631_v14, 1  ;;  %v1109_v0 = vor.u32 %v1108_v54, %v1107_v36  ;;  %v1115_v36 = vrot.slane %v3693_v51, 1 }
 0x123   : > { %6795 = vst [vmem:[#allocation111_spill] sm:$0xff] %v4421_v44  ;;  %v1106_v50 = vsel %vm1094_vm2, %v1102_v5, %v1105_v47  ;;  %v1131_v5 = vrot.slane %v3722_v7, 1 }
 0x124   : > { %6796 = vst [vmem:[#allocation112_spill] sm:$0xff] %v4425_v56  ;;  %v1113_v59 = vor.u32 %v1112_v35, %v1111_v58  ;;  %v1116_v35 = vrot.slane %v3640_v22, 2  ;;  %v1110_v53 = vsel %vm1094_vm2, %v1105_v47, %v1109_v0  ;;  %v1121_v58 = vor.u32 %v1120_v30, %v1119_v32  ;;  %v6807_v30 = vld [vmem:[#allocation7_spill] sm:$0xff] }
 0x125   : > { %v1135_v32 = vrot.slane %v3713_v60, 1  ;;  %v6813_v60 = vld [vmem:[#allocation17_spill] sm:$0xff]  ;;  %v1144_v56 = vrot.slane %v6814_v37, 2 }
 0x126   : > { %v1114_v13 = vsel %vm1094_vm2, %v1109_v0, %v1113_v59  ;;  %v1143_v62 = vrot.slane %v6813_v60, 1 }
 0x127   : > { %1089 = vrot.lane.b32.xlu2 %v1022_v18, %s3537_s28  ;;  %1087 = vrot.lane.b32.xlu1 %v1020_v20, %s3537_s28  ;;  %v1124_v20 = vrot.slane %v3667_v38, 2  ;;  %v1117_v18 = vor.u32 %v1116_v35, %v1115_v36  ;;  %v6809_v35 = vld [vmem:[#allocation5_spill] sm:$0xff]  ;;  %v1168_v38 = vrot.slane %v6832_v41, 2 }
 0x128   : > { %1085 = vrot.lane.b32.xlu0 %v1018_v31, %s3537_s28  ;;  %s3120_s28 = sshll.u32 %s250_s27, 2 }
 0x129   : > { %v4444_v61 = vpop.permute.xlu2 %1023  ;;  %v4446_v8 = vpop.permute.xlu1 %979  ;;  %v1125_v1 = vor.u32 %v1124_v20, %v1123_v4  ;;  %v1122_v47 = vsel %vm1094_vm2, %v1117_v18, %v1121_v58  ;;  %v1136_v4 = vrot.slane %v6807_v30, 2  ;;  %v6808_v20 = vld [vmem:[#allocation12_spill] sm:$0xff]  ;;  %s6060_s7 = scalar_lea.vmem %s6523_s3, %s3120_s28 }
 0x12a   : > { %6801 = vst [vmem:[#allocation113_spill] sm:$0xff] %v4444_v61  ;;  %v4448_v12 = vpop.permute.xlu0 %977  ;;  %v1127_v36 = vrot.slane %v6808_v20, 1 }
 0x12b   : > { %6802 = vst [vmem:[#allocation114_spill] sm:$0xff] %v4446_v8  ;;  %v1126_v0 = vsel %vm1094_vm2, %v1121_v58, %v1125_v1 }
 0x12c   : > { %6803 = vst [vmem:[#allocation115_spill] sm:$0xff] %v4448_v12 }
 0x12f   : > { %1258 = vrot.lane.b32.xlu2 %v1114_v13, %s3538_s29  ;;  %1256 = vrot.lane.b32.xlu1 %v1110_v53, %s3538_s29  ;;  %v1132_v13 = vrot.slane %v3708_v57, 2  ;;  %v1128_v53 = vrot.slane %v6809_v35, 2 }
 0x130   : > { %1254 = vrot.lane.b32.xlu0 %v1106_v50, %s3538_s29  ;;  %v1118_v50 = vsel %vm1094_vm2, %v1113_v59, %v1117_v18  ;;  %v6815_v59 = vld [vmem:[#allocation15_spill] sm:$0xff] }
 0x131   : > { %v4462_v54 = vpop.permute.xlu2 %1029  ;;  %v4464_v31 = vpop.permute.xlu1 %985  ;;  %v1133_v58 = vor.u32 %v1132_v13, %v1131_v5  ;;  %v1129_v11 = vor.u32 %v1128_v53, %v1127_v36  ;;  %v1147_v18 = vrot.slane %v6815_v59, 1  ;;  %v1145_v36 = vor.u32 %v1144_v56, %v1143_v62  ;;  %v6826_v56 = vld [vmem:[#allocation24_spill] sm:$0xff] }
 0x132   : > { %6804 = vst [vmem:[#allocation116_spill] sm:$0xff] %v4462_v54  ;;  %v4466_v25 = vpop.permute.xlu0 %983  ;;  %v1137_v54 = vor.u32 %v1136_v4, %v1135_v32 }
 0x133   : > { %6805 = vst [vmem:[#allocation117_spill] sm:$0xff] %v4464_v31  ;;  %v1134_v32 = vsel %vm1094_vm2, %v1129_v11, %v1133_v58  ;;  %v1130_v4 = vsel %vm1094_vm2, %v1125_v1, %v1129_v11  ;;  %v6822_v11 = vld [vmem:[#allocation23_spill] sm:$0xff]  ;;  %v6622_v31 = vshrl.u32 %v4409_v24, 16 }
 0x134   : > { %6806 = vst [vmem:[#allocation118_spill] sm:$0xff] %v4466_v25  ;;  %v1138_v13 = vsel %vm1094_vm2, %v1133_v58, %v1137_v54  ;;  %v1155_v1 = vrot.slane %v6822_v11, 1  ;;  %v1167_v25 = vrot.slane %v6831_v26, 1 }
 0x137   : > { %1264 = vrot.lane.b32.xlu2 %v1126_v0, %s3538_s29  ;;  %1262 = vrot.lane.b32.xlu1 %v1122_v47, %s3538_s29  ;;  %v6816_v0 = vld [vmem:[#allocation13_spill] sm:$0xff]  ;;  %v6817_v47 = vld [vmem:[#allocation18_spill] sm:$0xff] }
 0x138   : > { %1260 = vrot.lane.b32.xlu0 %v1118_v50, %s3538_s29  ;;  %v1148_v16 = vrot.slane %v6816_v0, 2  ;;  %v1139_v57 = vrot.slane %v6817_v47, 1  ;;  %v6818_v50 = vld [vmem:[#allocation10_spill] sm:$0xff] }
 0x139   : > { %v4480_v44 = vpop.permute.xlu2 %1035  ;;  %v4482_v28 = vpop.permute.xlu1 %991  ;;  %v1140_v5 = vrot.slane %v6818_v50, 2 }
 0x13a   : > { %6810 = vst [vmem:[#allocation119_spill] sm:$0xff] %v4480_v44  ;;  %v4484_v30 = vpop.permute.xlu0 %989  ;;  %v1149_v53 = vor.u32 %v1148_v16, %v1147_v18  ;;  %v6825_v16 = vld [vmem:[#allocation19_spill] sm:$0xff]  ;;  %v1151_v18 = vrot.slane %v6826_v56, 1 }
 0x13b   : > { %6811 = vst [vmem:[#allocation120_spill] sm:$0xff] %v4482_v28  ;;  %v1141_v44 = vor.u32 %v1140_v5, %v1139_v57  ;;  %v1160_v57 = vrot.slane %v6825_v16, 2  ;;  %v6827_v5 = vld [vmem:[#allocation16_spill] sm:$0xff] }
 0x13c   : > { %6812 = vst [vmem:[#allocation121_spill] sm:$0xff] %v4484_v30  ;;  %v1150_v61 = vsel %vm1094_vm2, %v1145_v36, %v1149_v53  ;;  %v1192_v30 = vrot.slane %v6850_v52, 2 }
 0x13d   : > { %v1146_v58 = vsel %vm1094_vm2, %v1141_v44, %v1145_v36 }
 0x13f   : > { %1270 = vrot.lane.b32.xlu2 %v1138_v13, %s3538_s29  ;;  %1268 = vrot.lane.b32.xlu1 %v1134_v32, %s3538_s29  ;;  %v6823_v13 = vld [vmem:[#allocation20_spill] sm:$0xff]  ;;  %v6824_v32 = vld [vmem:[#allocation21_spill] sm:$0xff] }
 0x140   : > { %1266 = vrot.lane.b32.xlu0 %v1130_v4, %s3538_s29  ;;  %v1156_v15 = vrot.slane %v6823_v13, 2  ;;  %v1159_v62 = vrot.slane %v6824_v32, 1  ;;  %v1152_v4 = vrot.slane %v6827_v5, 2  ;;  %v6849_v32 = vld [vmem:[#allocation41_spill] sm:$0xff] }
 0x141   : > { %v4498_v7 = vpop.permute.xlu2 %1041  ;;  %v4500_v10 = vpop.permute.xlu1 %997  ;;  %v1191_v40 = vrot.slane %v6849_v32, 1 }
 0x142   : > { %6819 = vst [vmem:[#allocation17_spill] sm:$0xff] %v4498_v7  ;;  %v4502_v45 = vpop.permute.xlu0 %995  ;;  %v1157_v36 = vor.u32 %v1156_v15, %v1155_v1  ;;  %v1153_v35 = vor.u32 %v1152_v4, %v1151_v18  ;;  %v1169_v18 = vor.u32 %v1168_v38, %v1167_v25 }
 0x143   : > { %6820 = vst [vmem:[#allocation14_spill] sm:$0xff] %v4500_v10  ;;  %v1142_v10 = vsel %vm1094_vm2, %v1137_v54, %v1141_v44  ;;  %v6833_v44 = vld [vmem:[#allocation27_spill] sm:$0xff] }
 0x144   : > { %6821 = vst [vmem:[#allocation15_spill] sm:$0xff] %v4502_v45  ;;  %v1161_v45 = vor.u32 %v1160_v57, %v1159_v62  ;;  %v1171_v54 = vrot.slane %v6833_v44, 1  ;;  %v1158_v62 = vsel %vm1094_vm2, %v1153_v35, %v1157_v36  ;;  %v1154_v57 = vsel %vm1094_vm2, %v1149_v53, %v1153_v35  ;;  %v6840_v35 = vld [vmem:[#allocation35_spill] sm:$0xff] }
 0x145   : > { %v1179_v53 = vrot.slane %v6840_v35, 1 }
 0x146   : > { %v1162_v1 = vsel %vm1094_vm2, %v1157_v36, %v1161_v45 }
 0x147   : > { %1276 = vrot.lane.b32.xlu2 %v1150_v61, %s3538_s29  ;;  %1274 = vrot.lane.b32.xlu1 %v1146_v58, %s3538_s29  ;;  %v6834_v61 = vld [vmem:[#allocation25_spill] sm:$0xff]  ;;  %v6835_v58 = vld [vmem:[#allocation30_spill] sm:$0xff] }
 0x148   : > { %1272 = vrot.lane.b32.xlu0 %v1142_v10, %s3538_s29  ;;  %v1172_v43 = vrot.slane %v6834_v61, 2  ;;  %v1163_v16 = vrot.slane %v6835_v58, 1  ;;  %v6836_v10 = vld [vmem:[#allocation22_spill] sm:$0xff] }
 0x149   : > { %v4516_v20 = vpop.permute.xlu2 %1047  ;;  %v4518_v7 = vpop.permute.xlu1 %1027  ;;  %v1164_v15 = vrot.slane %v6836_v10, 2 }
 0x14a   : > { %6828 = vst [vmem:[#allocation13_spill] sm:$0xff] %v4516_v20  ;;  %v4520_v49 = vpop.permute.xlu0 %1025  ;;  %v1173_v4 = vor.u32 %v1172_v43, %v1171_v54  ;;  %v6843_v43 = vld [vmem:[#allocation31_spill] sm:$0xff] }
 0x14b   : > { %6829 = vst [vmem:[#allocation18_spill] sm:$0xff] %v4518_v7  ;;  %v1165_v20 = vor.u32 %v1164_v15, %v1163_v16  ;;  %v1184_v25 = vrot.slane %v6843_v43, 2  ;;  %v6844_v16 = vld [vmem:[#allocation36_spill] sm:$0xff] }
 0x14c   : > { %6830 = vst [vmem:[#allocation10_spill] sm:$0xff] %v4520_v49  ;;  %v1174_v41 = vsel %vm1094_vm2, %v1169_v18, %v1173_v4  ;;  %v1175_v54 = vrot.slane %v6844_v16, 1  ;;  %v6845_v15 = vld [vmem:[#allocation28_spill] sm:$0xff] }
 0x14d   : > { %v1170_v36 = vsel %vm1094_vm2, %v1165_v20, %v1169_v18 }
 0x14f   : > { %1282 = vrot.lane.b32.xlu2 %v1162_v1, %s3538_s29  ;;  %1280 = vrot.lane.b32.xlu1 %v1158_v62, %s3538_s29  ;;  %v6841_v1 = vld [vmem:[#allocation32_spill] sm:$0xff]  ;;  %v6842_v62 = vld [vmem:[#allocation33_spill] sm:$0xff] }
 0x150   : > { %1278 = vrot.lane.b32.xlu0 %v1154_v57, %s3538_s29  ;;  %v1180_v26 = vrot.slane %v6841_v1, 2  ;;  %v1183_v38 = vrot.slane %v6842_v62, 1  ;;  %v1176_v57 = vrot.slane %v6845_v15, 2 }
 0x151   : > { %v4534_v61 = vpop.permute.xlu2 %1053  ;;  %v4536_v44 = vpop.permute.xlu1 %1033 }
 0x152   : > { %6837 = vst [vmem:[#allocation24_spill] sm:$0xff] %v4534_v61  ;;  %v4538_v7 = vpop.permute.xlu0 %1031  ;;  %v1166_v61 = vsel %vm1094_vm2, %v1161_v45, %v1165_v20  ;;  %v1181_v18 = vor.u32 %v1180_v26, %v1179_v53  ;;  %v6851_v45 = vld [vmem:[#allocation39_spill] sm:$0xff] }
 0x153   : > { %6838 = vst [vmem:[#allocation16_spill] sm:$0xff] %v4536_v44  ;;  %v1185_v44 = vor.u32 %v1184_v25, %v1183_v38  ;;  %v1195_v20 = vrot.slane %v6851_v45, 1 }
 0x154   : > { %6839 = vst [vmem:[#allocation122_spill] sm:$0xff] %v4538_v7  ;;  %v1177_v7 = vor.u32 %v1176_v57, %v1175_v54  ;;  %v1193_v54 = vor.u32 %v1192_v30, %v1191_v40  ;;  %v6862_v30 = vld [vmem:[#allocation48_spill] sm:$0xff] }
 0x155   : > { %v1186_v53 = vsel %vm1094_vm2, %v1181_v18, %v1185_v44 }
 0x156   : > { %v1182_v38 = vsel %vm1094_vm2, %v1177_v7, %v1181_v18  ;;  %v1178_v25 = vsel %vm1094_vm2, %v1173_v4, %v1177_v7  ;;  %v6858_v7 = vld [vmem:[#allocation47_spill] sm:$0xff] }
 0x157   : > { %1288 = vrot.lane.b32.xlu2 %v1174_v41, %s3538_s29  ;;  %1286 = vrot.lane.b32.xlu1 %v1170_v36, %s3538_s29  ;;  %v6852_v41 = vld [vmem:[#allocation37_spill] sm:$0xff]  ;;  %v6853_v36 = vld [vmem:[#allocation42_spill] sm:$0xff]  ;;  %v1203_v4 = vrot.slane %v6858_v7, 1  ;;  %v1215_v7 = vrot.slane %v3996_v46, 1 }
 0x158   : > { %1284 = vrot.lane.b32.xlu0 %v1166_v61, %s3538_s29  ;;  %v1196_v28 = vrot.slane %v6852_v41, 2  ;;  %v1187_v33 = vrot.slane %v6853_v36, 1  ;;  %v6854_v61 = vld [vmem:[#allocation34_spill] sm:$0xff] }
 0x159   : > { %v4552_v49 = vpop.permute.xlu2 %1059  ;;  %v4554_v10 = vpop.permute.xlu1 %1039  ;;  %v1188_v26 = vrot.slane %v6854_v61, 2 }
 0x15a   : > { %6846 = vst [vmem:[#allocation35_spill] sm:$0xff] %v4552_v49  ;;  %v4556_v58 = vpop.permute.xlu0 %1037  ;;  %v1197_v57 = vor.u32 %v1196_v28, %v1195_v20  ;;  %v6861_v28 = vld [vmem:[#allocation43_spill] sm:$0xff]  ;;  %v1199_v20 = vrot.slane %v6862_v30, 1 }
 0x15b   : > { %6847 = vst [vmem:[#allocation32_spill] sm:$0xff] %v4554_v10 }
 0x15c   : > { %6848 = vst [vmem:[#allocation33_spill] sm:$0xff] %v4556_v58  ;;  %v1189_v58 = vor.u32 %v1188_v26, %v1187_v33  ;;  %v1198_v41 = vsel %vm1094_vm2, %v1193_v54, %v1197_v57  ;;  %v1208_v33 = vrot.slane %v6861_v28, 2  ;;  %v6863_v26 = vld [vmem:[#allocation40_spill] sm:$0xff] }
 0x15e   : > { %v1194_v18 = vsel %vm1094_vm2, %v1189_v58, %v1193_v54 }
 0x15f   : > { %1294 = vrot.lane.b32.xlu2 %v1186_v53, %s3538_s29  ;;  %1292 = vrot.lane.b32.xlu1 %v1182_v38, %s3538_s29  ;;  %v6859_v53 = vld [vmem:[#allocation44_spill] sm:$0xff]  ;;  %v6860_v38 = vld [vmem:[#allocation45_spill] sm:$0xff] }
 0x160   : > { %1290 = vrot.lane.b32.xlu0 %v1178_v25, %s3538_s29  ;;  %v1204_v45 = vrot.slane %v6859_v53, 2  ;;  %v1207_v40 = vrot.slane %v6860_v38, 1  ;;  %v1200_v25 = vrot.slane %v6863_v26, 2  ;;  %v6867_v26 = vld [vmem:[#allocation50_spill] sm:$0xff] }
 0x161   : > { %v4570_v49 = vpop.permute.xlu2 %1065  ;;  %v4572_v10 = vpop.permute.xlu1 %1045 }
 0x162   : > { %6855 = vst [vmem:[#allocation31_spill] sm:$0xff] %v4570_v49  ;;  %v4574_v34 = vpop.permute.xlu0 %1043  ;;  %v1190_v49 = vsel %vm1094_vm2, %v1185_v44, %v1189_v58  ;;  %v1205_v54 = vor.u32 %v1204_v45, %v1203_v4  ;;  %v1216_v44 = vrot.slane %v6867_v26, 2  ;;  %v1219_v58 = vrot.slane %v3988_v23, 1  ;;  %v6869_v45 = vld [vmem:[#allocation46_spill] sm:$0xff] }
 0x163   : > { %6856 = vst [vmem:[#allocation36_spill] sm:$0xff] %v4572_v10  ;;  %v1209_v10 = vor.u32 %v1208_v33, %v1207_v40  ;;  %v1212_v4 = vrot.slane %v6869_v45, 2 }
 0x164   : > { %6857 = vst [vmem:[#allocation28_spill] sm:$0xff] %v4574_v34  ;;  %v1201_v34 = vor.u32 %v1200_v25, %v1199_v20  ;;  %v1217_v25 = vor.u32 %v1216_v44, %v1215_v7 }
 0x165   : > { %v1210_v40 = vsel %vm1094_vm2, %v1205_v54, %v1209_v10 }
 0x166   : > { %v1206_v33 = vsel %vm1094_vm2, %v1201_v34, %v1205_v54  ;;  %v1202_v20 = vsel %vm1094_vm2, %v1197_v57, %v1201_v34  ;;  %v6623_v54 = vshll.u32 %v4406_v29, 16 }
 0x167   : > { %1300 = vrot.lane.b32.xlu2 %v1198_v41, %s3538_s29  ;;  %1298 = vrot.lane.b32.xlu1 %v1194_v18, %s3538_s29  ;;  %v6868_v41 = vld [vmem:[#allocation49_spill] sm:$0xff] }
 0x168   : > { %1296 = vrot.lane.b32.xlu0 %v1190_v49, %s3538_s29  ;;  %v1220_v18 = vrot.slane %v6868_v41, 2  ;;  %v1211_v49 = vrot.slane %v4000_v3, 1 }
 0x169   : > { %v4588_v53 = vpop.permute.xlu2 %1071  ;;  %v4590_v38 = vpop.permute.xlu1 %1051 }
 0x16a   : > { %6864 = vst [vmem:[#allocation42_spill] sm:$0xff] %v4588_v53  ;;  %v4592_v28 = vpop.permute.xlu0 %1049  ;;  %v1213_v30 = vor.u32 %v1212_v4, %v1211_v49  ;;  %v6621_v53 = vshrl.u32 %v4406_v29, 16  ;;  %v1230_v49 = vrot.slane %v6622_v31, 1  ;;  %v1233_v4 = vrot.slane %v6620_v63, 2 }
 0x16b   : > { %6865 = vst [vmem:[#allocation34_spill] sm:$0xff] %v4590_v38  ;;  %v330_v38 = vld [vmem:[%s3602_s25 + $0x120] sm:$0x3] }
 0x16c   : > { %6866 = vst [vmem:[#allocation123_spill] sm:$0xff] %v4592_v28  ;;  %v1221_v28 = vor.u32 %v1220_v18, %v1219_v58  ;;  %v1092_v7 = vunpack.c.l.b16 %v330_v38  ;;  %v1218_v18 = vsel %vm1094_vm2, %v1213_v30, %v1217_v25  ;;  %v1223_v38 = vrot.slane %v4017_v17, 1 }
 0x16d   : > { %v1234_v63 = vor.u32 %v1233_v4, %v1230_v49  ;;  %v1632_v17 = vrot.slane %v6845_v15, 3 }
 0x16e   : > { %v1222_v58 = vsel %vm1094_vm2, %v1217_v25, %v1221_v28  ;;  %v4631_v25 = vpack.c.b16 %v1092_v7, %v1092_v7 }
 0x16f   : > { %1306 = vrot.lane.b32.xlu2 %v1210_v40, %s3538_s29  ;;  %1304 = vrot.lane.b32.xlu1 %v1206_v33, %s3538_s29  ;;  %v1239_v40 = vrot.slane %v6621_v53, 1  ;;  %v1242_v33 = vrot.slane %v6623_v54, 2 }
 0x170   : > { %1302 = vrot.lane.b32.xlu0 %v1202_v20, %s3538_s29  ;;  %v6873_v20 = vld [vmem:[#allocation51_spill] sm:$0xff]  ;;  %6874 = vst [vmem:[#allocation124_spill] sm:$0xff] %v4631_v25 }
 0x171   : > { %v4611_v34 = vpop.permute.xlu2 %1077  ;;  %v4613_v57 = vpop.permute.xlu1 %1057  ;;  %v1243_v53 = vor.u32 %v1242_v33, %v1239_v40  ;;  %v3437_v40 = vld [vmem:[%s3602_s25 + $0x18] sm:$0xff] }
 0x172   : > { %6870 = vst [vmem:[#allocation50_spill] sm:$0xff] %v4611_v34  ;;  %v4615_v44 = vpop.permute.xlu0 %1055  ;;  %v331_v34 = vld [vmem:[%s3602_s25 + $0x10] sm:$0xc]  ;;  %v1327_v33 = vrot.slane %v3437_v40, 2 }
 0x173   : > { %6871 = vst [vmem:[#allocation49_spill] sm:$0xff] %v4613_v57  ;;  %v1214_v57 = vsel %vm1094_vm2, %v1209_v10, %v1213_v30  ;;  %v1323_v54 = vunpack.c.l.b16 %v331_v34  ;;  %v1246_v10 = vshrl.u32 %v4631_v25, 16  ;;  %v1249_v30 = vshll.u32 %v4631_v25, 16  ;;  %v4709_v25 = vld [vmem:[%s3602_s25 + $0x40] sm:$0xff] }
 0x174   : > { %6872 = vst [vmem:[#allocation46_spill] sm:$0xff] %v4615_v44  ;;  %v1224_v44 = vrot.slane %v6873_v20, 2  ;;  %v1631_v20 = vrot.slane %v6844_v16, 2 }
 0x175   : > { %v1248_v49 = vrot.slane %v1246_v10, 1  ;;  %v1251_v4 = vrot.slane %v1249_v30, 2  ;;  %6888 = vst [vmem:[#allocation137_spill] sm:$0xff] %v4709_v25 }
 0x176   : > { %v1225_v31 = vor.u32 %v1224_v44, %v1223_v38  ;;  %v4654_v38 = vld [vmem:[%s3602_s25 + $0x20] sm:$0xff]  }
 0x177   : > { %1312 = vrot.lane.b32.xlu2 %v1222_v58, %s3538_s29  ;;  %1310 = vrot.lane.b32.xlu1 %v1218_v18, %s3538_s29  ;;  %v1244_v58 = vsel %vm1094_vm2, %v1234_v63, %v1243_v53  ;;  %v6878_v18 = vunpack.c.h.b16 %v3611_v2 }
 0x178   : > { %1308 = vrot.lane.b32.xlu0 %v1214_v57, %s3538_s29  ;;  %v1235_v57 = vsel %vm1094_vm2, %v1225_v31, %v1234_v63  ;;  %v1226_v34 = vsel %vm1094_vm2, %v1221_v28, %v1225_v31  ;;  %v1329_v63 = vrot.slane %v4654_v38, 2  ;;  %v1252_v28 = vor.u32 %v1251_v4, %v1248_v49  ;;  %v4678_v4 = vld [vmem:[%s3602_s25 + $0x28] sm:$0xff] }
 0x179   : > { %v4636_v29 = vpop.permute.xlu2 %1083  ;;  %v4638_v24 = vpop.permute.xlu1 %1063  ;;  %v1324_v44 = vpack.c.b16 %v6878_v18, %v1323_v54  ;;  %v4670_v18 = vld [vmem:[%s3602_s25 + $0x30] sm:$0xff] }
 0x17a   : > { %6875 = vst [vmem:[#allocation125_spill] sm:$0xff] %v4636_v29  ;;  %v4642_v7 = vpop.permute.xlu0 %1061  ;;  %v1330_v30 = vsel %vm1325_vm3, %v1327_v33, %v1329_v63 }
 0x17b   : > { %6876 = vst [vmem:[#allocation126_spill] sm:$0xff] %v4638_v24  ;;  %v1326_v2 = vrot.slane %v1324_v44, 2  ;;  %v1333_v44 = vrot.slane %v4670_v18, 2 }
 0x17c   : > { %6877 = vst [vmem:[#allocation127_spill] sm:$0xff] %v4642_v7 }
 0x17d   : > { %6882 = vst [vmem:[#allocation131_spill] sm:$0xff] %v4670_v18  ;;  %v1635_v18 = vrot.slane %v6840_v35, 2  ;;  %v4992_v35 = vor.u32 %v1632_v17, %v1631_v20  ;;  %v1595_v17 = vrot.slane %v6817_v47, 2  ;;  %v1599_v20 = vrot.slane %v6813_v60, 2 }
 0x17f   : > { %1318 = vrot.lane.b32.xlu2 %v1244_v58, %s3538_s29  ;;  %1316 = vrot.lane.b32.xlu1 %v1235_v57, %s3538_s29  ;;  %v1328_v58 = vsel %vm1325_vm3, %v1326_v2, %v1327_v33  ;;  %v1253_v57 = vsel %vm1094_vm2, %v1243_v53, %v1252_v28  ;;  %v4681_v53 = vrot.slane %v4678_v4, 2 }
 0x180   : > { %1314 = vrot.lane.b32.xlu0 %v1226_v34, %s3538_s29  ;;  %v4674_v34 = vld [vmem:[%s3602_s25 + $0x38] sm:$0xff] }
 0x181   : > { %v4657_v54 = vpop.permute.xlu2 %1089  ;;  %v4659_v31 = vpop.permute.xlu1 %1069  ;;  %6883 = vst [vmem:[#allocation132_spill] sm:$0xff] %v4674_v34  ;;  %v1335_v49 = vrot.slane %v4674_v34, 2 }
 0x182   : > { %6879 = vst [vmem:[#allocation128_spill] sm:$0xff] %v4657_v54  ;;  %v4661_v10 = vpop.permute.xlu0 %1067 }
 0x183   : > { %6880 = vst [vmem:[#allocation129_spill] sm:$0xff] %v4659_v31  ;;  %v4690_v28 = vsel %vm1325_vm3, %v1333_v44, %v1335_v49 }
 0x184   : > { %6881 = vst [vmem:[#allocation130_spill] sm:$0xff] %v4661_v10  ;;  %v3443_v10 = vld [vmem:[%s3602_s25 + $0x50] sm:$0xff] }
 0x185   : > { %6886 = vst [vmem:[#allocation135_spill] sm:$0xff] %v4690_v28 }
 0x187   : > { %1397 = vrot.lane.b32.xlu2 %v1330_v30, %s3539_s30  ;;  %1395 = vrot.lane.b32.xlu1 %v1328_v58, %s3539_s30  ;;  %v4694_v30 = vsel %vm1325_vm3, %v4681_v53, %v1333_v44  ;;  %v1332_v58 = vsel %vm1325_vm3, %v1329_v63, %v4681_v53  ;;  %v1341_v44 = vrot.slane %v3443_v10, 2  ;;  %v1337_v63 = vrot.slane %v4709_v25, 2  ;;  %v4734_v10 = vld [vmem:[%s3602_s25 + $0x60] sm:$0xff] }
 0x188   : > { %1320 = vrot.lane.b32.xlu0 %v1253_v57, %s3538_s29  ;;  %v4704_v57 = vld [vmem:[%s3602_s25 + $0x48] sm:$0xff]  ;;  %6895 = vst [vmem:[#allocation144_spill] sm:$0xff] %v4734_v10 }
 0x189   : > { %v4683_v40 = vpop.permute.xlu2 %1258  ;;  %v4685_v33 = vpop.permute.xlu1 %1075  ;;  %6887 = vst [vmem:[#allocation136_spill] sm:$0xff] %v4704_v57  ;;  %v1339_v54 = vrot.slane %v4704_v57, 2  ;;  %v4725_v57 = vsel %vm1325_vm3, %v1335_v49, %v1337_v63 }
 0x18a   : > { %6884 = vst [vmem:[#allocation133_spill] sm:$0xff] %v4683_v40  ;;  %v4687_v2 = vpop.permute.xlu0 %1073 }
 0x18b   : > { %6885 = vst [vmem:[#allocation134_spill] sm:$0xff] %v4685_v33  ;;  %v4722_v33 = vsel %vm1325_vm3, %v1337_v63, %v1339_v54  ;;  %v3447_v63 = vld [vmem:[%s3602_s25 + $0x58] sm:$0xff] }
 0x18c   : > { %6893 = vst [vmem:[#allocation142_spill] sm:$0xff] %v4722_v33  ;;  %v1343_v25 = vrot.slane %v3447_v63, 2  ;;  %v4764_v63 = vld [vmem:[%s3602_s25 + $0x78] sm:$0xff] }
 0x18d   : > { %6894 = vst [vmem:[#allocation143_spill] sm:$0xff] %v4725_v57 }
 0x18e   : > { %v4755_v34 = vsel %vm1325_vm3, %v1341_v44, %v1343_v25 }
 0x18f   : > { %1403 = vrot.lane.b32.xlu2 %v4690_v28, %s3539_s30  ;;  %1401 = vrot.lane.b32.xlu1 %v4694_v30, %s3539_s30  ;;  %6900 = vst [vmem:[#allocation149_spill] sm:$0xff] %v4755_v34 }
 0x190   : > { %1399 = vrot.lane.b32.xlu0 %v1332_v58, %s3539_s30  ;;  %v4719_v58 = vsel %vm1325_vm3, %v1339_v54, %v1341_v44  ;;  %v4738_v54 = vld [vmem:[%s3602_s25 + $0x68] sm:$0xff]  ;;  %v4772_v44 = vld [vmem:[%s3602_s25 + $0x70] sm:$0xff] }
 0x191   : > { %v4712_v40 = vpop.permute.xlu2 %1264  ;;  %v4714_v24 = vpop.permute.xlu1 %1081  ;;  %6892 = vst [vmem:[#allocation141_spill] sm:$0xff] %v4719_v58  ;;  %v1347_v49 = vrot.slane %v4738_v54, 2 }
 0x192   : > { %6889 = vst [vmem:[#allocation138_spill] sm:$0xff] %v4712_v40  ;;  %v4716_v7 = vpop.permute.xlu0 %1079  ;;  %v1345_v40 = vrot.slane %v4734_v10, 2 }
 0x193   : > { %6890 = vst [vmem:[#allocation139_spill] sm:$0xff] %v4714_v24 }
 0x194   : > { %6891 = vst [vmem:[#allocation140_spill] sm:$0xff] %v4716_v7  ;;  %v4752_v29 = vsel %vm1325_vm3, %v1343_v25, %v1345_v40 }
 0x195   : > { %6899 = vst [vmem:[#allocation148_spill] sm:$0xff] %v4752_v29 }
 0x197   : > { %1409 = vrot.lane.b32.xlu2 %v4719_v58, %s3539_s30  ;;  %1407 = vrot.lane.b32.xlu1 %v4722_v33, %s3539_s30 }
 0x198   : > { %1405 = vrot.lane.b32.xlu0 %v4725_v57, %s3539_s30  ;;  %v4749_v57 = vsel %vm1325_vm3, %v1345_v40, %v1347_v49  ;;  %v4768_v40 = vld [vmem:[%s3602_s25 + $0x80] sm:$0xff] }
 0x199   : > { %v4742_v58 = vpop.permute.xlu2 %1270  ;;  %v4744_v24 = vpop.permute.xlu1 %1087  ;;  %6901 = vst [vmem:[#allocation150_spill] sm:$0xff] %v4768_v40  ;;  %v1353_v25 = vrot.slane %v4768_v40, 2 }
 0x19a   : > { %6896 = vst [vmem:[#allocation145_spill] sm:$0xff] %v4742_v58  ;;  %v4746_v33 = vpop.permute.xlu0 %1085 }
 0x19b   : > { %6897 = vst [vmem:[#allocation146_spill] sm:$0xff] %v4744_v24  ;;  %v1351_v24 = vrot.slane %v4764_v63, 2 }
 0x19c   : > { %6898 = vst [vmem:[#allocation147_spill] sm:$0xff] %v4746_v33  ;;  %v1349_v33 = vrot.slane %v4772_v44, 2 }
 0x19d   : > { %v4782_v31 = vsel %vm1325_vm3, %v1351_v24, %v1353_v25 }
 0x19e   : > { %6905 = vst [vmem:[#allocation154_spill] sm:$0xff] %v4782_v31  ;;  %v4785_v12 = vsel %vm1325_vm3, %v1349_v33, %v1351_v24  ;;  %v4788_v28 = vsel %vm1325_vm3, %v1347_v49, %v1349_v33  ;;  %v4801_v24 = vld [vmem:[%s3602_s25 + $0x98] sm:$0xff]  ;;  %v4805_v49 = vld [vmem:[%s3602_s25 + $0x88] sm:$0xff] }
 0x19f   : > { %1415 = vrot.lane.b32.xlu2 %v4749_v57, %s3539_s30  ;;  %1413 = vrot.lane.b32.xlu1 %v4752_v29, %s3539_s30  ;;  %6906 = vst [vmem:[#allocation155_spill] sm:$0xff] %v4785_v12  ;;  %v1359_v33 = vrot.slane %v4801_v24, 2 }
 0x1a0   : > { %1411 = vrot.lane.b32.xlu0 %v4755_v34, %s3539_s30  ;;  %6908 = vst [vmem:[#allocation157_spill] sm:$0xff] %v4801_v24 }
 0x1a1   : > { %v4775_v58 = vpop.permute.xlu2 %1276  ;;  %v4777_v29 = vpop.permute.xlu1 %1256  ;;  %6909 = vst [vmem:[#allocation158_spill] sm:$0xff] %v4805_v49 }
 0x1a2   : > { %6902 = vst [vmem:[#allocation151_spill] sm:$0xff] %v4775_v58  ;;  %v4779_v34 = vpop.permute.xlu0 %1254  ;;  %v4797_v58 = vld [vmem:[%s3602_s25 + $0x90] sm:$0xff] }
 0x1a3   : > { %6903 = vst [vmem:[#allocation152_spill] sm:$0xff] %v4777_v29  ;;  %v1357_v29 = vrot.slane %v4797_v58, 2 }
 0x1a4   : > { %6904 = vst [vmem:[#allocation153_spill] sm:$0xff] %v4779_v34  ;;  %v1355_v34 = vrot.slane %v4805_v49, 2 }
 0x1a5   : > { %6907 = vst [vmem:[#allocation156_spill] sm:$0xff] %v4797_v58  ;;  %v4815_v42 = vsel %vm1325_vm3, %v1357_v29, %v1359_v33 }
 0x1a6   : > { %6913 = vst [vmem:[#allocation162_spill] sm:$0xff] %v4815_v42  ;;  %v4818_v58 = vsel %vm1325_vm3, %v1355_v34, %v1357_v29  ;;  %v4821_v6 = vsel %vm1325_vm3, %v1353_v25, %v1355_v34  ;;  %v4834_v29 = vld [vmem:[%s3602_s25 + $0xb0] sm:$0xff]  ;;  %v3456_v25 = vld [vmem:[%s3602_s25 + $0xa0] sm:$0xff] }
 0x1a7   : > { %1421 = vrot.lane.b32.xlu2 %v4782_v31, %s3539_s30  ;;  %1419 = vrot.lane.b32.xlu1 %v4785_v12, %s3539_s30  ;;  %6914 = vst [vmem:[#allocation163_spill] sm:$0xff] %v4818_v58  ;;  %v1365_v34 = vrot.slane %v4834_v29, 2  ;;  %v1636_v12 = vrot.slane %v6841_v1, 3  ;;  %v6674_v15 = vrot.slane %v4834_v29, 3 }
 0x1a8   : > { %1417 = vrot.lane.b32.xlu0 %v4788_v28, %s3539_s30  ;;  %6915 = vst [vmem:[#allocation164_spill] sm:$0xff] %v4821_v6 }
 0x1a9   : > { %v4808_v31 = vpop.permute.xlu2 %1282  ;;  %v4810_v40 = vpop.permute.xlu1 %1262  ;;  %v1637_v1 = vor.u32 %v1636_v12, %v1635_v18  ;;  %v1596_v12 = vrot.slane %v6818_v50, 3  ;;  %v1600_v18 = vrot.slane %v6814_v37, 3 }
 0x1aa   : > { %6910 = vst [vmem:[#allocation159_spill] sm:$0xff] %v4808_v31  ;;  %v4812_v8 = vpop.permute.xlu0 %1260  ;;  %v4830_v31 = vld [vmem:[%s3602_s25 + $0xa8] sm:$0xff] }
 0x1ab   : > { %6911 = vst [vmem:[#allocation160_spill] sm:$0xff] %v4810_v40  ;;  %v1363_v40 = vrot.slane %v4830_v31, 2  ;;  %v6673_v16 = vrot.slane %v4830_v31, 3  ;;  %v5021_v60 = vor.u32 %v1596_v12, %v1595_v17  ;;  %v1601_v37 = vor.u32 %v1600_v18, %v1599_v20  ;;  %v332_v20 = vld [vmem:[%s3602_s25 + $0x20] sm:$0xc] }
 0x1ac   : > { %6912 = vst [vmem:[#allocation161_spill] sm:$0xff] %v4812_v8  ;;  %v1361_v8 = vrot.slane %v3456_v25, 2  ;;  %v4860_v25 = vld [vmem:[%s3602_s25 + $0xc0] sm:$0xff]  ;;  %v1639_v17 = vrot.slane %v6842_v62, 2  ;;  %v1640_v12 = vrot.slane %v6843_v43, 3 }
 0x1ad   : > { %6916 = vst [vmem:[#allocation165_spill] sm:$0xff] %v4830_v31  ;;  %v1668_v31 = vrot.slane %v6869_v45, 3  ;;  %v1602_v18 = vsel %vm1558_vm5, %v5021_v60, %v1601_v37  ;;  %v1469_v45 = vunpack.c.l.b16 %v332_v20 }
 0x1ae   : > { %v4848_v49 = vsel %vm1325_vm3, %v1361_v8, %v1363_v40  ;;  %v4851_v39 = vsel %vm1325_vm3, %v1359_v33, %v1361_v8  ;;  %v4868_v33 = vld [vmem:[%s3602_s25 + $0xb8] sm:$0xff]  ;;  %v5048_v62 = vor.u32 %v1640_v12, %v1639_v17 }
 0x1af   : > { %1427 = vrot.lane.b32.xlu2 %v4815_v42, %s3539_s30  ;;  %1425 = vrot.lane.b32.xlu1 %v4818_v58, %s3539_s30  ;;  %6920 = vst [vmem:[#allocation169_spill] sm:$0xff] %v4848_v49 }
 0x1b0   : > { %1423 = vrot.lane.b32.xlu0 %v4821_v6, %s3539_s30  ;;  %v4845_v6 = vsel %vm1325_vm3, %v1363_v40, %v1365_v34  ;;  %6921 = vst [vmem:[#allocation170_spill] sm:$0xff] %v4851_v39  ;;  %v4864_v40 = vld [vmem:[%s3602_s25 + $0xc8] sm:$0xff] }
 0x1b1   : > { %v4838_v42 = vpop.permute.xlu2 %1288  ;;  %v4840_v24 = vpop.permute.xlu1 %1268  ;;  %v1371_v8 = vrot.slane %v4864_v40, 2 }
 0x1b2   : > { %6917 = vst [vmem:[#allocation166_spill] sm:$0xff] %v4838_v42  ;;  %v4842_v58 = vpop.permute.xlu0 %1266 }
 0x1b3   : > { %6918 = vst [vmem:[#allocation167_spill] sm:$0xff] %v4840_v24  ;;  %v1369_v24 = vrot.slane %v4860_v25, 2 }
 0x1b4   : > { %6919 = vst [vmem:[#allocation168_spill] sm:$0xff] %v4842_v58  ;;  %v1367_v58 = vrot.slane %v4868_v33, 2 }
 0x1b5   : > { %v4878_v48 = vsel %vm1325_vm3, %v1369_v24, %v1371_v8 }
 0x1b6   : > { %6925 = vst [vmem:[#allocation174_spill] sm:$0xff] %v4878_v48  ;;  %v4881_v13 = vsel %vm1325_vm3, %v1367_v58, %v1369_v24  ;;  %v4884_v11 = vsel %vm1325_vm3, %v1365_v34, %v1367_v58  ;;  %v4897_v24 = vld [vmem:[%s3602_s25 + $0xe0] sm:$0xff]  ;;  %v4901_v34 = vld [vmem:[%s3602_s25 + $0xd0] sm:$0xff] }
 0x1b7   : > { %1433 = vrot.lane.b32.xlu2 %v4845_v6, %s3539_s30  ;;  %1431 = vrot.lane.b32.xlu1 %v4848_v49, %s3539_s30  ;;  %6927 = vst [vmem:[#allocation176_spill] sm:$0xff] %v4897_v24  ;;  %v1377_v58 = vrot.slane %v4897_v24, 2 }
 0x1b8   : > { %1429 = vrot.lane.b32.xlu0 %v4851_v39, %s3539_s30  ;;  %6928 = vst [vmem:[#allocation177_spill] sm:$0xff] %v4901_v34 }
 0x1b9   : > { %v4871_v42 = vpop.permute.xlu2 %1294  ;;  %v4873_v49 = vpop.permute.xlu1 %1274 }
 0x1ba   : > { %6922 = vst [vmem:[#allocation171_spill] sm:$0xff] %v4871_v42  ;;  %v4875_v39 = vpop.permute.xlu0 %1272  ;;  %v4893_v42 = vld [vmem:[%s3602_s25 + $0xd8] sm:$0xff] }
 0x1bb   : > { %6923 = vst [vmem:[#allocation172_spill] sm:$0xff] %v4873_v49  ;;  %v1375_v49 = vrot.slane %v4893_v42, 2 }
 0x1bc   : > { %6924 = vst [vmem:[#allocation173_spill] sm:$0xff] %v4875_v39  ;;  %v1373_v39 = vrot.slane %v4901_v34, 2 }
 0x1bd   : > { %6926 = vst [vmem:[#allocation175_spill] sm:$0xff] %v4893_v42  ;;  %v4911_v21 = vsel %vm1325_vm3, %v1375_v49, %v1377_v58 }
 0x1be   : > { %6932 = vst [vmem:[#allocation181_spill] sm:$0xff] %v4911_v21  ;;  %v4914_v42 = vsel %vm1325_vm3, %v1373_v39, %v1375_v49  ;;  %v4917_v52 = vsel %vm1325_vm3, %v1371_v8, %v1373_v39  ;;  %v4930_v49 = vld [vmem:[%s3602_s25 + $0xf8] sm:$0xff]  ;;  %v4934_v8 = vld [vmem:[%s3602_s25 + $0xe8] sm:$0xff] }
 0x1bf   : > { %1439 = vrot.lane.b32.xlu2 %v4878_v48, %s3539_s30  ;;  %1437 = vrot.lane.b32.xlu1 %v4881_v13, %s3539_s30  ;;  %6933 = vst [vmem:[#allocation182_spill] sm:$0xff] %v4914_v42  ;;  %v1383_v39 = vrot.slane %v4930_v49, 2 }
 0x1c0   : > { %1435 = vrot.lane.b32.xlu0 %v4884_v11, %s3539_s30  ;;  %6934 = vst [vmem:[#allocation183_spill] sm:$0xff] %v4917_v52 }
 0x1c1   : > { %v4904_v7 = vpop.permute.xlu2 %1300  ;;  %v4906_v48 = vpop.permute.xlu1 %1280  ;;  %6935 = vst [vmem:[#allocation184_spill] sm:$0xff] %v4934_v8 }
 0x1c2   : > { %6929 = vst [vmem:[#allocation178_spill] sm:$0xff] %v4904_v7  ;;  %v4908_v19 = vpop.permute.xlu0 %1278 }
 0x1c3   : > { %6930 = vst [vmem:[#allocation179_spill] sm:$0xff] %v4906_v48  ;;  %v4926_v48 = vld [vmem:[%s3602_s25 + $0xf0] sm:$0xff] }
 0x1c4   : > { %6931 = vst [vmem:[#allocation180_spill] sm:$0xff] %v4908_v19  ;;  %v1381_v19 = vrot.slane %v4926_v48, 2 }
 0x1c7   : > { %1445 = vrot.lane.b32.xlu2 %v4911_v21, %s3539_s30  ;;  %1443 = vrot.lane.b32.xlu1 %v4914_v42, %s3539_s30  ;;  %v1379_v21 = vrot.slane %v4934_v8, 2 }
 0x1c8   : > { %1441 = vrot.lane.b32.xlu0 %v4917_v52, %s3539_s30  ;;  %v4944_v52 = vsel %vm1325_vm3, %v1381_v19, %v1383_v39 }
 0x1c9   : > { %v4937_v34 = vpop.permute.xlu2 %1306  ;;  %v4939_v42 = vpop.permute.xlu1 %1286  ;;  %v4947_v24 = vsel %vm1325_vm3, %v1379_v21, %v1381_v19  ;;  %v4950_v32 = vsel %vm1325_vm3, %v1377_v58, %v1379_v21 }
 0x1ca   : > { %6936 = vst [vmem:[#allocation185_spill] sm:$0xff] %v4937_v34  ;;  %v4941_v7 = vpop.permute.xlu0 %1284  ;;  %v4957_v34 = vld [vmem:[%s3602_s25 + $0x100] sm:$0xff] }
 0x1cb   : > { %6937 = vst [vmem:[#allocation186_spill] sm:$0xff] %v4939_v42  ;;  %v1385_v42 = vrot.slane %v4957_v34, 2 }
 0x1cc   : > { %6938 = vst [vmem:[#allocation187_spill] sm:$0xff] %v4941_v7  ;;  %v4961_v7 = vld [vmem:[%s3602_s25 + $0x108] sm:$0xff] }
 0x1cd   : > { %6939 = vst [vmem:[#allocation188_spill] sm:$0xff] %v4947_v24  ;;  %v6672_v8 = vrot.slane %v4961_v7, 2 }
 0x1ce   : > { %6940 = vst [vmem:[#allocation189_spill] sm:$0xff] %v4950_v32 }
 0x1cf   : > { %1451 = vrot.lane.b32.xlu2 %v4944_v52, %s3539_s30  ;;  %1449 = vrot.lane.b32.xlu1 %v4947_v24, %s3539_s30  ;;  %v4975_v24 = vsel %vm1325_vm3, %v1385_v42, %v6672_v8 }
 0x1d0   : > { %1447 = vrot.lane.b32.xlu0 %v4950_v32, %s3539_s30  ;;  %v4982_v32 = vsel %vm1325_vm3, %v1383_v39, %v1385_v42  ;;  %v1826_v39 = vsel %vm1789_vm4, %v6673_v16, %v6674_v15  ;;  %v6677_v16 = vrot.slane %v4738_v54, 3 }
 0x1d1   : > { %v4966_v19 = vpop.permute.xlu2 %1312  ;;  %v4968_v21 = vpop.permute.xlu1 %1292 }
 0x1d2   : > { %6941 = vst [vmem:[#allocation190_spill] sm:$0xff] %v4968_v21  ;;  %v4970_v58 = vpop.permute.xlu0 %1290  ;;  %v1638_v21 = vsel %vm1558_vm5, %v4992_v35, %v1637_v1 }
 0x1d7   : > { %1521 = vrot.lane.b32.xlu2 %v4845_v6, %s3540_s4  ;;  %1455 = vrot.lane.b32.xlu1 %v4975_v24, %s3539_s30 }
 0x1d8   : > { %1453 = vrot.lane.b32.xlu0 %v4982_v32, %s3539_s30 }
 0x1d9   : > { %v4994_v8 = vpop.permute.xlu2 %1318  ;;  %v4996_v42 = vpop.permute.xlu1 %1298 }
 0x1da   : > { %6942 = vst [vmem:[#allocation191_spill] sm:$0xff] %v4994_v8  ;;  %v4998_v6 = vpop.permute.xlu0 %1296  ;;  %v6676_v8 = vrot.slane %v4734_v10, 3  ;;  %v339_v10 = vld [vmem:[%s3602_s25 + $0x20] sm:$0x8] }
 0x1db   : > { %6943 = vst [vmem:[#allocation192_spill] sm:$0xff] %v4996_v42  ;;  %v1672_v42 = vrot.slane %v6867_v26, 3 }
 0x1df   : > { %1503 = vrot.lane.b32.xlu2 %v4749_v57, %s3540_s4  ;;  %1893 = vrot.lane.b32.xlu1 %v1826_v39, %s3541_s5  ;;  %v1808_v57 = vsel %vm1789_vm4, %v6676_v8, %v6677_v16  ;;  %v1667_v39 = vrot.slane %v4000_v3, 2  ;;  %v3363_v3 = vunpack.c.h.b16 %v4654_v38 }
 0x1e0   : > { %1752 = vrot.lane.b32.xlu0 %v1638_v21, %s3542_s6  ;;  %v1671_v21 = vrot.slane %v3996_v46, 2 }
 0x1e1   : > { %v5017_v47 = vpop.permute.xlu2 %1397  ;;  %v5019_v50 = vpop.permute.xlu1 %1304  ;;  %v5044_v46 = vor.u32 %v1668_v31, %v1667_v39  ;;  %v1843_v39 = vrot.slane %v4930_v49, 3 }
 0x1e2   : > { %v5023_v15 = vpop.permute.xlu0 %1302  ;;  %v5046_v26 = vor.u32 %v1672_v42, %v1671_v21  ;;  %v6679_v42 = vrot.slane %v4926_v48, 3 }
 0x1e4   : > { %v1674_v38 = vsel %vm1558_vm5, %v5044_v46, %v5046_v26 }
 0x1e7   : > { %1523 = vrot.lane.b32.xlu2 %v4884_v11, %s3540_s4  ;;  %1875 = vrot.lane.b32.xlu1 %v1808_v57, %s3541_s5  ;;  %v1475_v11 = vpack.c.b16 %v3363_v3, %v1469_v45  ;;  %v1642_v57 = vsel %vm1558_vm5, %v1637_v1, %v5048_v62  ;;  %v1568_v1 = vrot.slane %v3622_v9, 3  ;;  %v1787_v9 = vunpack.c.l.b16 %v339_v10 }
 0x1e8   : > { %1734 = vrot.lane.b32.xlu0 %v1602_v18, %s3542_s6 }
 0x1e9   : > { %v5050_v43 = vpop.permute.xlu2 %1403  ;;  %v5052_v8 = vpop.permute.xlu1 %1310  ;;  %v1479_v31 = vrot.slane %v1475_v11, 2  ;;  %v1560_v21 = vshrl.u32 %v1475_v11, 16  ;;  %v1563_v17 = vshll.u32 %v1475_v11, 16  ;;  %v1604_v11 = vrot.slane %v6816_v0, 3 }
 0x1ea   : > { %6944 = vst [vmem:[#allocation193_spill] sm:$0xff] %v5050_v43  ;;  %v5054_v16 = vpop.permute.xlu0 %1308  ;;  %v6947_v43 = vrot.slane %v4868_v33, 3 }
 0x1eb   : > { %v1480_v45 = vsel %vm1325_vm3, %v1479_v31, %v4681_v53  ;;  %v6948_v53 = vrot.slane %v4834_v29, 3 }
 0x1ed   : > { %v1828_v31 = vsel %vm1789_vm4, %v6948_v53, %v6947_v43  ;;  %v1788_v53 = vpack.c.b16 %v3363_v3, %v1787_v9  ;;  %v6950_v3 = vrot.slane %v4738_v54, 3  ;;  %v1845_v9 = vrot.slane %v4957_v34, 3 }
 0x1ef   : > { %1770 = vrot.lane.b32.xlu2 %v1674_v38, %s3542_s6  ;;  %1754 = vrot.lane.b32.xlu1 %v1642_v57, %s3542_s6  ;;  %v1603_v38 = vrot.slane %v6815_v59, 2  ;;  %v1562_v57 = vrot.slane %v1560_v21, 2  ;;  %v1790_v10 = vrot.slane %v1788_v53, 3  ;;  %v1829_v53 = vrot.slane %v4860_v25, 3 }
 0x1f0   : > { %1539 = vrot.lane.b32.xlu0 %v4944_v52, %s3540_s4  ;;  %v1844_v52 = vsel %vm1789_vm4, %v6679_v42, %v1843_v39 }
 0x1f1   : > { %v5067_v12 = vpop.permute.xlu2 %1409  ;;  %v5069_v20 = vpop.permute.xlu1 %1316  ;;  %v1605_v59 = vor.u32 %v1604_v11, %v1603_v38  ;;  %v1675_v38 = vrot.slane %v3988_v23, 2  ;;  %v1676_v11 = vrot.slane %v6868_v41, 3 }
 0x1f2   : > { %6945 = vst [vmem:[#allocation194_spill] sm:$0xff] %v5067_v12  ;;  %v5072_v18 = vpop.permute.xlu0 %1314  ;;  %v1565_v12 = vrot.slane %v1563_v17, 3 }
 0x1f3   : > { %6946 = vst [vmem:[#allocation195_spill] sm:$0xff] %v5069_v20  ;;  %v1567_v20 = vrot.slane %v3631_v14, 2  ;;  %v1606_v29 = vsel %vm1558_vm5, %v1601_v37, %v1605_v59  ;;  %v5130_v54 = vor.u32 %v1676_v11, %v1675_v38  ;;  %v6954_v38 = vrot.slane %v4868_v33, 3 }
 0x1f4   : > { %v1566_v0 = vor.u32 %v1565_v12, %v1562_v57  ;;  %v1644_v57 = vrot.slane %v6854_v61, 3 }
 0x1f5   : > { %v1569_v21 = vor.u32 %v1568_v1, %v1567_v20  ;;  %v1791_v1 = vrot.slane %v4678_v4, 3  ;;  %v1830_v11 = vsel %vm1789_vm4, %v6954_v38, %v1829_v53 }
 0x1f7   : > { %1487 = vrot.lane.b32.xlu2 %v1480_v45, %s3540_s4  ;;  %1911 = vrot.lane.b32.xlu1 %v1844_v52, %s3541_s5  ;;  %v1570_v43 = vsel %vm1558_vm5, %v1566_v0, %v1569_v21  ;;  %v1809_v45 = vrot.slane %v4772_v44, 3  ;;  %v1678_v0 = vsel %vm1558_vm5, %v5046_v26, %v5130_v54 }
 0x1f8   : > { %1895 = vrot.lane.b32.xlu0 %v1828_v31, %s3541_s5  ;;  %v1792_v31 = vsel %vm1789_vm4, %v1790_v10, %v1791_v1  ;;  %v1607_v10 = vrot.slane %v6826_v56, 2 }
 0x1f9   : > { %v5094_v17 = vpop.permute.xlu2 %1415  ;;  %v5096_v14 = vpop.permute.xlu1 %1395  ;;  %v1810_v52 = vsel %vm1789_vm4, %v6950_v3, %v1809_v45  ;;  %v1608_v3 = vrot.slane %v6827_v5, 3 }
 0x1fa   : > { %v5098_v42 = vpop.permute.xlu0 %1320 }
 0x1fb   : > { %6949 = vst [vmem:[#allocation196_spill] sm:$0xff] %v5098_v42  ;;  %v5176_v56 = vor.u32 %v1608_v3, %v1607_v10  ;;  %v6957_v3 = vld [vmem:[#allocation131_spill] sm:$0xff] }
 0x1ff   : > { %1736 = vrot.lane.b32.xlu2 %v1606_v29, %s3542_s6  ;;  %1718 = vrot.lane.b32.xlu1 %v1570_v43, %s3542_s6 }
 0x200   : > { %1505 = vrot.lane.b32.xlu0 %v4788_v28, %s3540_s4  ;;  %v1643_v28 = vrot.slane %v6853_v36, 2 }
 0x201   : > { %v5107_v12 = vpop.permute.xlu2 %1421  ;;  %v5109_v20 = vpop.permute.xlu1 %1401 }
 0x202   : > { %v5112_v37 = vpop.permute.xlu0 %1399  ;;  %v5132_v23 = vor.u32 %v1644_v57, %v1643_v28  ;;  %v2487_v28 = vld [vmem:[%s6521_s1 + $0x20] sm:$0xf] }
 0x203   : > { %v2509_v57 = vunpack.c.l.b16 %v2487_v28  ;;  %v6961_v28 = vld [vmem:[#allocation51_spill] sm:$0xff] }
 0x207   : > { %1525 = vrot.lane.b32.xlu2 %v4881_v13, %s3540_s4  ;;  %1877 = vrot.lane.b32.xlu1 %v1810_v52, %s3541_s5  ;;  %v1646_v13 = vsel %vm1558_vm5, %v5048_v62, %v5132_v23  ;;  %v1846_v62 = vsel %vm1789_vm4, %v1843_v39, %v1845_v9  ;;  %v1572_v52 = vrot.slane %v3640_v22, 3  ;;  %v1610_v39 = vsel %vm1558_vm5, %v1605_v59, %v5176_v56 }
 0x208   : > { %1859 = vrot.lane.b32.xlu0 %v1792_v31, %s3541_s5  ;;  %v1979_v31 = vsel %vm1927_vm6, %v4864_v40, %v4290_v55  ;;  %v1811_v59 = vrot.slane %v4764_v63, 3  ;;  %v6997_v63 = vld [vmem:[#allocation87_spill] sm:$0xff] }
 0x209   : > { %v5134_v41 = vpop.permute.xlu2 %1427  ;;  %v5136_v36 = vpop.permute.xlu1 %1407 }
 0x20a   : > { %6951 = vst [vmem:[#allocation197_spill] sm:$0xff] %v5134_v41  ;;  %v5138_v61 = vpop.permute.xlu0 %1405 }
 0x20b   : > { %6952 = vst [vmem:[#allocation198_spill] sm:$0xff] %v5136_v36 }
 0x20c   : > { %6953 = vst [vmem:[#allocation199_spill] sm:$0xff] %v5138_v61 }
 0x20f   : > { %1772 = vrot.lane.b32.xlu2 %v1678_v0, %s3542_s6  ;;  %1756 = vrot.lane.b32.xlu1 %v1646_v13, %s3542_s6  ;;  %v2048_v0 = vsel %vm1996_vm7, %v1979_v31, %v4386_v27  ;;  %v6962_v31 = vld [vmem:[#allocation41_spill] sm:$0xff] }
 0x210   : > { %1541 = vrot.lane.b32.xlu0 %v4982_v32, %s3540_s4  ;;  %v1571_v32 = vrot.slane %v3693_v51, 2  ;;  %v2117_v13 = vsel %vm2065_vm8, %v2048_v0, %v4687_v2  ;;  %v1812_v2 = vsel %vm1789_vm4, %v1809_v45, %v1811_v59  ;;  %v1647_v0 = vrot.slane %v6962_v31, 2  ;;  %v6964_v45 = vld [vmem:[#allocation82_spill] sm:$0xff] }
 0x211   : > { %v5151_v29 = vpop.permute.xlu2 %1433  ;;  %v5153_v43 = vpop.permute.xlu1 %1413  ;;  %v2186_v55 = vsel %vm2134_vm9, %v2117_v13, %v5019_v50  ;;  %v3351_v50 = vld [vmem:[%s6521_s1 + $0x18] sm:$0xff] }
 0x212   : > { %v5156_v26 = vpop.permute.xlu0 %1411  ;;  %v5178_v5 = vor.u32 %v1572_v52, %v1571_v32  ;;  %v6680_v32 = vrot.slane %v6957_v3, 3 }
 0x214   : > { %v1794_v44 = vsel %vm1789_vm4, %v1791_v1, %v6680_v32  ;;  %v6973_v32 = vld [vmem:[#allocation81_spill] sm:$0xff] }
 0x215   : > { %v1977_v34 = vsel %vm1927_vm6, %v4860_v25, %v6973_v32 }
 0x217   : > { %1489 = vrot.lane.b32.xlu2 %v4694_v30, %s3540_s4  ;;  %1913 = vrot.lane.b32.xlu1 %v1846_v62, %s3541_s5  ;;  %v1574_v30 = vsel %vm1558_vm5, %v1569_v21, %v5178_v5  ;;  %v2514_v21 = vpack.c.b16 %v2509_v57, %v2509_v57  ;;  %v6955_v62 = vld [vmem:[#allocation155_spill] sm:$0xff]  ;;  %v1680_v57 = vrot.slane %v6961_v28, 3  ;;  %v6968_v28 = vld [vmem:[#allocation140_spill] sm:$0xff] }
 0x218   : > { %1897 = vrot.lane.b32.xlu0 %v1830_v11, %s3541_s5 }
 0x219   : > { %v5180_v51 = vpop.permute.xlu2 %1439  ;;  %v5182_v22 = vpop.permute.xlu1 %1419  ;;  %v2590_v52 = vsel %vm2588_vm10, %v2514_v21, 0  ;;  %v6963_v21 = vld [vmem:[#allocation38_spill] sm:$0xff] }
 0x21a   : > { %v5184_v49 = vpop.permute.xlu0 %1417  ;;  %3370 = vmatpush.bf16.msra.mxu2 %v2590_v52  ;;  %3369 = vmatpush.bf16.msra.mxu1 %v2590_v52  ;;  %v1648_v13 = vrot.slane %v6963_v21, 3  ;;  %v3350_v21 = vld [vmem:[%s6521_s1 + $0x10] sm:$0xff] }
 0x21b   : > { %3371 = vmatpush.bf16.msra.mxu3 %v2590_v52  ;;  %2595 = vmatpush.bf16.msra.mxu0 %v2590_v52 }
 0x21c   : > { %v5245_v1 = vor.u32 %v1648_v13, %v1647_v0  ;;  %v6682_v13 = vrot.slane %v4864_v40, 3 }
 0x21e   : > { %3373 = vmatpush.bf16.msra.mxu2 %v3351_v50  ;;  %3372 = vmatpush.bf16.msra.mxu1 %v3351_v50 }
 0x21f   : > { %1738 = vrot.lane.b32.xlu2 %v1610_v39, %s3542_s6  ;;  %1720 = vrot.lane.b32.xlu1 %v1574_v30, %s3542_s6  ;;  %v6960_v39 = vld [vmem:[#allocation52_spill] sm:$0xff] }
 0x220   : > { %1507 = vrot.lane.b32.xlu0 %v6955_v62, %s3540_s4  ;;  %v1679_v30 = vrot.slane %v6960_v39, 2  ;;  %v6965_v62 = vld [vmem:[#allocation176_spill] sm:$0xff]  ;;  %v6967_v39 = vld [vmem:[#allocation174_spill] sm:$0xff]  ;;  %3374 = vmatpush.bf16.msra.mxu3 %v3351_v50 }
 0x221   : > { %v1446_v27 = vpop.permute.xlu2 %1445  ;;  %v5207_v10 = vpop.permute.xlu1 %1425  ;;  %2596 = vmatpush.bf16.msra.mxu0 %v3351_v50  ;;  %v6681_v50 = vrot.slane %v4961_v7, 3 }
 0x222   : > { %6956 = vst [vmem:[#allocation155_spill] sm:$0xff] %v5207_v10  ;;  %v5211_v38 = vsel %vm2203_vm11, %v2186_v55, %v1446_v27  ;;  %v5213_v11 = vpop.permute.xlu0 %1423  ;;  %v1985_v55 = vsel %vm1927_vm6, %v6965_v62, %v6964_v45  ;;  %v6966_v27 = vld [vmem:[#allocation105_spill] sm:$0xff]  ;;  %v5243_v4 = vor.u32 %v1680_v57, %v1679_v30  ;;  %3376 = vmatpush.bf16.msra.mxu2 %v3350_v21  ;;  %v3349_v30 = vld [vmem:[%s6521_s1 + $0x8] sm:$0xff] }
 0x223   : > { %6958 = vst [vmem:[#allocation131_spill] sm:$0xff] %v5211_v38  ;;  %v2054_v52 = vsel %vm1996_vm7, %v1985_v55, %v6966_v27  ;;  %3375 = vmatpush.bf16.msra.mxu1 %v3350_v21 }
 0x224   : > { %6959 = vst [vmem:[#allocation200_spill] sm:$0xff] %v5213_v11  ;;  %v2123_v31 = vsel %vm2065_vm8, %v2054_v52, %v6968_v28  ;;  %v1682_v57 = vsel %vm1558_vm5, %v5130_v54, %v5243_v4  ;;  %3377 = vmatpush.bf16.msra.mxu3 %v3350_v21  ;;  %v3348_v54 = vld [vmem:[%s6521_s1] sm:$0xff]  ;;  %v7018_v11 = vld [vmem:[#allocation137_spill] sm:$0xff] }
 0x225   : > { %v2192_v45 = vsel %vm2134_vm9, %v2123_v31, %v5052_v8  ;;  %v1650_v8 = vsel %vm1558_vm5, %v5132_v23, %v5245_v1  ;;  %2597 = vmatpush.bf16.msra.mxu0 %v3350_v21  ;;  %v6970_v31 = vld [vmem:[#allocation20_spill] sm:$0xff] }
 0x226   : > { %3379 = vmatpush.bf16.msra.mxu2 %v3349_v30  ;;  %v1612_v21 = vrot.slane %v6970_v31, 3  ;;  %v6975_v31 = vld [vmem:[#allocation114_spill] sm:$0xff] }
 0x227   : > { %1527 = vrot.lane.b32.xlu2 %v6967_v39, %s3540_s4  ;;  %1879 = vrot.lane.b32.xlu1 %v1812_v2, %s3541_s5  ;;  %v6969_v39 = vld [vmem:[#allocation23_spill] sm:$0xff] }
 0x228   : > { %1861 = vrot.lane.b32.xlu0 %v1794_v44, %s3541_s5  ;;  %3378 = vmatpush.bf16.msra.mxu1 %v3349_v30  ;;  %v1611_v28 = vrot.slane %v6969_v39, 2 }
 0x229   : > { %v1452_v55 = vpop.permute.xlu2 %1451  ;;  %v5252_v27 = vpop.permute.xlu1 %1431  ;;  %3380 = vmatpush.bf16.msra.mxu3 %v3349_v30  ;;  %2598 = vmatpush.bf16.msra.mxu0 %v3349_v30  ;;  %v1832_v30 = vsel %vm1789_vm4, %v1829_v53, %v6682_v13 }
 0x22a   : > { %v5255_v2 = vsel %vm2203_vm11, %v2192_v45, %v1452_v55  ;;  %v5257_v44 = vpop.permute.xlu0 %1429  ;;  %3382 = vmatpush.bf16.msra.mxu2 %v3348_v54  ;;  %v6971_v45 = vld [vmem:[#allocation6_spill] sm:$0xff]  ;;  %v5313_v25 = vor.u32 %v1612_v21, %v1611_v28 }
 0x22b   : > { %v1575_v55 = vrot.slane %v6971_v45, 2  ;;  %v2046_v45 = vsel %vm1996_vm7, %v1977_v34, %v6975_v31 }
 0x22c   : > { %3381 = vmatpush.bf16.msra.mxu1 %v3348_v54  ;;  %v1614_v21 = vsel %vm1558_vm5, %v5176_v56, %v5313_v25 }
 0x22d   : > { %3383 = vmatpush.bf16.msra.mxu3 %v3348_v54  ;;  %2599 = vmatpush.bf16.msra.mxu0 %v3348_v54  ;;  %v6978_v54 = vld [vmem:[#allocation42_spill] sm:$0xff] }
 0x22e   : > { %v2115_v13 = vsel %vm2065_vm8, %v2046_v45, %v6978_v54  ;;  %v6985_v45 = vld [vmem:[#allocation117_spill] sm:$0xff]  ;;  %v6986_v54 = vld [vmem:[#allocation150_spill] sm:$0xff] }
 0x22f   : > { %1774 = vrot.lane.b32.xlu2 %v1682_v57, %s3542_s6  ;;  %1758 = vrot.lane.b32.xlu1 %v1650_v8, %s3542_s6  ;;  %v6972_v57 = vld [vmem:[#allocation3_spill] sm:$0xff] }
 0x230   : > { %1543 = vrot.lane.b32.xlu0 %v4975_v24, %s3540_s4  ;;  %v1848_v24 = vsel %vm1789_vm4, %v1845_v9, %v6681_v50  ;;  %v1576_v8 = vrot.slane %v6972_v57, 3  ;;  %v6974_v9 = vld [vmem:[#allocation68_spill] sm:$0xff]  ;;  %v6976_v57 = vld [vmem:[#allocation135_spill] sm:$0xff] }
 0x231   : > { %v5276_v0 = vpop.permute.xlu2 %1521  ;;  %v5278_v23 = vpop.permute.xlu1 %1437  ;;  %v1975_v39 = vsel %vm1927_vm6, %v4868_v33, %v6974_v9  ;;  %v6977_v50 = vld [vmem:[#allocation115_spill] sm:$0xff]  ;;  %v6979_v33 = vld [vmem:[#allocation129_spill] sm:$0xff]  ;;  %v2184_v9 = vsel %vm2134_vm9, %v2115_v13, %v5023_v15  ;;  %v6983_v13 = vld [vmem:[#allocation84_spill] sm:$0xff] }
 0x232   : > { %v5281_v52 = vpop.permute.xlu0 %1435  ;;  %v2044_v53 = vsel %vm1996_vm7, %v1975_v39, %v6977_v50  ;;  %v5315_v32 = vor.u32 %v1576_v8, %v1575_v55  ;;  %v6984_v55 = vld [vmem:[#allocation175_spill] sm:$0xff] }
 0x233   : > { %v2113_v34 = vsel %vm2065_vm8, %v2044_v53, %v6979_v33  ;;  %v1983_v8 = vsel %vm1927_vm6, %v6984_v55, %v6983_v13  ;;  %v6683_v33 = vrot.slane %v6986_v54, 3 }
 0x234   : > { %v1578_v15 = vsel %vm1558_vm5, %v5178_v5, %v5315_v32  ;;  %v2052_v53 = vsel %vm1996_vm7, %v1983_v8, %v6985_v45  ;;  %v6990_v8 = vld [vmem:[#allocation109_spill] sm:$0xff] }
 0x235   : > { %v1814_v13 = vsel %vm1789_vm4, %v1811_v59, %v6683_v33  ;;  %v6991_v45 = vshrl.u32 %v6990_v8, 16  ;;  %v1989_v59 = vsel %vm1927_vm6, %v4926_v48, %v6997_v63  ;;  %v6998_v33 = vld [vmem:[#allocation74_spill] sm:$0xff] }
 0x237   : > { %1491 = vrot.lane.b32.xlu2 %v6976_v57, %s3540_s4  ;;  %1915 = vrot.lane.b32.xlu1 %v1848_v24, %s3541_s5  ;;  %v6980_v57 = vld [vmem:[#allocation178_spill] sm:$0xff] }
 0x238   : > { %1899 = vrot.lane.b32.xlu0 %v1832_v30, %s3541_s5  ;;  %v2182_v50 = vsel %vm2134_vm9, %v2113_v34, %v6980_v57  ;;  %v6987_v34 = vld [vmem:[#allocation50_spill] sm:$0xff] }
 0x239   : > { %v5321_v31 = vpop.permute.xlu2 %1503  ;;  %v1444_v24 = vpop.permute.xlu1 %1443  ;;  %v2121_v56 = vsel %vm2065_vm8, %v2052_v53, %v6987_v34  ;;  %v1683_v53 = vrot.slane %v6991_v45, 2  ;;  %v6999_v45 = vld [vmem:[#allocation184_spill] sm:$0xff] }
 0x23a   : > { %v5326_v39 = vsel %vm2203_vm11, %v2184_v9, %v1444_v24  ;;  %v1442_v30 = vpop.permute.xlu0 %1441  ;;  %v6988_v9 = vld [vmem:[#allocation154_spill] sm:$0xff]  ;;  %v2190_v5 = vsel %vm2134_vm9, %v2121_v56, %v5054_v16  ;;  %v6992_v16 = vshll.u32 %v6990_v8, 16  ;;  %v6993_v56 = vld [vmem:[#allocation39_spill] sm:$0xff]  ;;  %v1987_v8 = vsel %vm1927_vm6, %v6999_v45, %v6998_v33 }
 0x23b   : > { %6981 = vst [vmem:[#allocation52_spill] sm:$0xff] %v5326_v39  ;;  %v5329_v28 = vsel %vm2203_vm11, %v2182_v50, %v1442_v30  ;;  %v6989_v50 = vld [vmem:[#allocation132_spill] sm:$0xff]  ;;  %v6994_v30 = vld [vmem:[#allocation37_spill] sm:$0xff]  ;;  %v7004_v33 = vld [vmem:[#allocation139_spill] sm:$0xff] }
 0x23c   : > { %6982 = vst [vmem:[#allocation51_spill] sm:$0xff] %v5329_v28  ;;  %v1684_v34 = vrot.slane %v6992_v16, 3  ;;  %v1652_v41 = vrot.slane %v6994_v30, 3  ;;  %v7000_v16 = vld [vmem:[#allocation120_spill] sm:$0xff]  ;;  %v7001_v30 = vld [vmem:[#allocation183_spill] sm:$0xff]  ;;  %v7016_v39 = vld [vmem:[#allocation2_spill] sm:$0xff] }
 0x23e   : > { %v5391_v63 = vor.u32 %v1684_v34, %v1683_v53 }
 0x23f   : > { %1740 = vrot.lane.b32.xlu2 %v1614_v21, %s3542_s6  ;;  %1722 = vrot.lane.b32.xlu1 %v1578_v15, %s3542_s6 }
 0x240   : > { %1509 = vrot.lane.b32.xlu0 %v6988_v9, %s3540_s4  ;;  %v1651_v9 = vrot.slane %v6993_v56, 2  ;;  %v2058_v56 = vsel %vm1996_vm7, %v1989_v59, %v7000_v16 }
 0x241   : > { %v5351_v24 = vpop.permute.xlu2 %1523  ;;  %v1450_v57 = vpop.permute.xlu1 %1449 }
 0x242   : > { %v5355_v21 = vsel %vm2203_vm11, %v2190_v5, %v1450_v57  ;;  %v5357_v15 = vpop.permute.xlu0 %1447  ;;  %v6995_v5 = vrot.slane %v6989_v50, 3  ;;  %v6996_v57 = vrot.slane %v6957_v3, 3  ;;  %v7002_v3 = vld [vmem:[#allocation121_spill] sm:$0xff]  ;;  %v5393_v10 = vor.u32 %v1652_v41, %v1651_v9  ;;  %v7005_v9 = vld [vmem:[#allocation62_spill] sm:$0xff] }
 0x243   : > { %v2056_v42 = vsel %vm1996_vm7, %v1987_v8, %v7002_v3 }
 0x244   : > { %v1796_v38 = vsel %vm1789_vm4, %v6996_v57, %v6995_v5  ;;  %v7003_v5 = vld [vmem:[#allocation125_spill] sm:$0xff]  ;;  %v2125_v59 = vsel %vm2065_vm8, %v2056_v42, %v7004_v33  ;;  %v1686_v42 = vsel %vm1558_vm5, %v5243_v4, %v5391_v63 }
 0x245   : > { %v2127_v57 = vsel %vm2065_vm8, %v2058_v56, %v7003_v5  ;;  %v7006_v56 = vld [vmem:[#allocation158_spill] sm:$0xff] }
 0x246   : > { %v2196_v45 = vsel %vm2134_vm9, %v2127_v57, %v5072_v18  ;;  %v1654_v18 = vsel %vm1558_vm5, %v5245_v1, %v5393_v10  ;;  %v1963_v3 = vsel %vm1927_vm6, %v7006_v56, %v7005_v9  ;;  %v7008_v57 = vld [vmem:[#allocation107_spill] sm:$0xff] }
 0x247   : > { %1529 = vrot.lane.b32.xlu2 %v7001_v30, %s3540_s4  ;;  %1881 = vrot.lane.b32.xlu1 %v1814_v13, %s3541_s5  ;;  %v5402_v30 = vld [vmem:[%s3602_s25 + $0x110] sm:$0xff]  ;;  %v2032_v33 = vsel %vm1996_vm7, %v1963_v3, %v7008_v57  ;;  %v7011_v3 = vld [vmem:[#allocation177_spill] sm:$0xff] }
 0x248   : > { %1863 = vrot.lane.b32.xlu0 %v1796_v38, %s3541_s5  ;;  %v6684_v8 = vrot.slane %v5402_v30, 2  ;;  %v2194_v38 = vsel %vm2134_vm9, %v2125_v59, %v4966_v19  ;;  %v7007_v19 = vrot.slane %v4961_v7, 2  ;;  %v7009_v59 = vld [vmem:[#allocation49_spill] sm:$0xff]  ;;  %v6685_v1 = vrot.slane %v5402_v30, 3 }
 0x249   : > { %v5399_v16 = vpop.permute.xlu2 %1770  ;;  %v1456_v13 = vpop.permute.xlu1 %1455  ;;  %v2101_v4 = vsel %vm2065_vm8, %v2032_v33, %v7009_v59  ;;  %v7012_v33 = vrot.slane %v4961_v7, 3  ;;  %v7019_v7 = vrot.slane %v7011_v3, 3 }
 0x24a   : > { %v5408_v53 = vsel %vm2203_vm11, %v2196_v45, %v1456_v13  ;;  %v1454_v41 = vpop.permute.xlu0 %1453  ;;  %v5427_v5 = vsel %vm1325_vm3, %v7007_v19, %v6684_v8  ;;  %v7010_v45 = vld [vmem:[#allocation166_spill] sm:$0xff] }
 0x24b   : > { %v5411_v34 = vsel %vm2203_vm11, %v2194_v38, %v1454_v41  ;;  %v2170_v13 = vsel %vm2134_vm9, %v2101_v4, %v7010_v45  ;;  %v1850_v59 = vsel %vm1789_vm4, %v7012_v33, %v6685_v1 }
 0x24c   : > { %v2239_v38 = vsel %vm2203_vm11, %v2170_v13, %v5257_v44  ;;  %v7013_v44 = vld [vmem:[#allocation21_spill] sm:$0xff]  ;;  %v7014_v13 = vld [vmem:[#allocation19_spill] sm:$0xff] }
 0x24d   : > { %v1615_v4 = vrot.slane %v7013_v44, 2  ;;  %v1616_v8 = vrot.slane %v7014_v13, 3  ;;  %v7021_v44 = vld [vmem:[#allocation99_spill] sm:$0xff]  ;;  %v7024_v13 = vld [vmem:[#allocation145_spill] sm:$0xff] }
 0x24f   : > { %1776 = vrot.lane.b32.xlu2 %v1686_v42, %s3542_s6  ;;  %1760 = vrot.lane.b32.xlu1 %v1654_v18, %s3542_s6  ;;  %v2308_v18 = vsel %vm2272_vm12, %v2239_v38, %v5276_v0  ;;  %v7015_v42 = vld [vmem:[#allocation4_spill] sm:$0xff]  ;;  %v1580_v0 = vrot.slane %v7016_v39, 3  ;;  %v7017_v38 = vld [vmem:[#allocation55_spill] sm:$0xff] }
 0x250   : > { %1545 = vrot.lane.b32.xlu0 %v5427_v5, %s3540_s4  ;;  %v1579_v36 = vrot.slane %v7015_v42, 2  ;;  %v7023_v39 = vld [vmem:[#allocation143_spill] sm:$0xff] }
 0x251   : > { %v5442_v41 = vpop.permute.xlu2 %1487  ;;  %v1894_v9 = vpop.permute.xlu1 %1893 }
 0x252   : > { %v1753_v19 = vpop.permute.xlu0 %1752 }
 0x253   : > { %v2377_v57 = vsel %vm2341_vm13, %v2308_v18, %v1753_v19  ;;  %v1945_v18 = vsel %vm1927_vm6, %v7018_v11, %v7017_v38  ;;  %v7020_v19 = vrot.slane %v4864_v40, 3  ;;  %v5477_v38 = vor.u32 %v1616_v8, %v1615_v4 }
 0x254   : > { %v2446_v45 = vsel %vm2410_vm14, %v2377_v57, %v1894_v9  ;;  %v2014_v9 = vsel %vm1996_vm7, %v1945_v18, %v7021_v44  ;;  %v7022_v57 = vld [vmem:[#allocation32_spill] sm:$0xff]  ;;  %v5479_v40 = vor.u32 %v1580_v0, %v1579_v36 }
 0x255   : > { %3294 = vmatmul.msk.bf16.vlgmr.msra.gmra.mxu2 %vm2519_vm15, %v2446_v45  ;;  %v1834_v33 = vsel %vm1789_vm4, %v7020_v19, %v7019_v7  ;;  %v2083_v42 = vsel %vm2065_vm8, %v2014_v9, %v7022_v57  ;;  %v1618_v8 = vsel %vm1558_vm5, %v5313_v25, %v5477_v38  ;;  %v7026_v0 = vld [vmem:[#allocation164_spill] sm:$0xff]  ;;  %v7027_v25 = vld [vmem:[#allocation118_spill] sm:$0xff] }
 0x256   : > { %v2152_v45 = vsel %vm2134_vm9, %v2083_v42, %v7024_v13  ;;  %v1582_v36 = vsel %vm1558_vm5, %v5315_v32, %v5479_v40  ;;  %v7028_v13 = vld [vmem:[#allocation134_spill] sm:$0xff] }
 0x257   : > { %1493 = vrot.lane.b32.xlu2 %v7023_v39, %s3540_s4  ;;  %1917 = vrot.lane.b32.xlu1 %v1850_v59, %s3541_s5  ;;  %v2221_v18 = vsel %vm2203_vm11, %v2152_v45, %v5156_v26  ;;  %v1815_v26 = vrot.slane %v7006_v56, 3  ;;  %v7037_v39 = vld [vmem:[#allocation40_spill] sm:$0xff] }
 0x258   : > { %1901 = vrot.lane.b32.xlu0 %v1834_v33, %s3541_s5  ;;  %v2290_v44 = vsel %vm2272_vm12, %v2221_v18, %v5321_v31  ;;  %v7025_v31 = vld [vmem:[#allocation71_spill] sm:$0xff]  ;;  %v1656_v61 = vrot.slane %v7037_v39, 3 }
 0x259   : > { %v5483_v7 = vpop.permute.xlu2 %1736  ;;  %v1876_v19 = vpop.permute.xlu1 %1875  ;;  %v1981_v4 = vsel %vm1927_vm6, %v7011_v3, %v7025_v31  ;;  %v7033_v31 = vld [vmem:[#allocation108_spill] sm:$0xff] }
 0x25a   : > { %v1735_v9 = vpop.permute.xlu0 %1734  ;;  %v2050_v33 = vsel %vm1996_vm7, %v1981_v4, %v7027_v25  ;;  %v7034_v4 = vshrl.u32 %v7033_v31, 16  ;;  %v7035_v25 = vshll.u32 %v7033_v31, 16 }
 0x25b   : > { %v2359_v59 = vsel %vm2341_vm13, %v2290_v44, %v1735_v9  ;;  %v2119_v45 = vsel %vm2065_vm8, %v2050_v33, %v7028_v13  ;;  %v7030_v44 = vld [vmem:[#allocation156_spill] sm:$0xff] }
 0x25c   : > { %v2428_v57 = vsel %vm2410_vm14, %v2359_v59, %v1876_v19  ;;  %v7029_v19 = vld [vmem:[#allocation76_spill] sm:$0xff]  ;;  %v7031_v59 = vld [vmem:[#allocation185_spill] sm:$0xff]  ;;  %v1688_v33 = vrot.slane %v7035_v25, 3 }
 0x25d   : > { %3285 = vmatmul.msk.bf16.vlgmr.msra.gmra.mxu1 %vm2519_vm15, %v2428_v57  ;;  %v1965_v9 = vsel %vm1927_vm6, %v7030_v44, %v7029_v19  ;;  %v2188_v57 = vsel %vm2134_vm9, %v2119_v45, %v7031_v59  ;;  %v7036_v13 = vld [vmem:[#allocation48_spill] sm:$0xff]  ;;  %v7038_v19 = vld [vmem:[#allocation106_spill] sm:$0xff]  ;;  %v7040_v59 = vrot.slane %v6989_v50, 3 }
 0x25e   : > { %v1655_v1 = vrot.slane %v7036_v13, 2  ;;  %v2034_v28 = vsel %vm1996_vm7, %v1965_v9, %v7038_v19  ;;  %v2257_v45 = vsel %vm2203_vm11, %v2188_v57, %v5357_v15  ;;  %v7042_v9 = vld [vmem:[#allocation182_spill] sm:$0xff]  ;;  %v5558_v19 = vld [vmem:[%s3602_s25 + $0x118] sm:$0xff] }
 0x25f   : > { %1742 = vrot.lane.b32.xlu2 %v1618_v8, %s3542_s6  ;;  %1724 = vrot.lane.b32.xlu1 %v1582_v36, %s3542_s6  ;;  %v7032_v8 = vrot.slane %v6986_v54, 3  ;;  %v7039_v54 = vrot.slane %v7018_v11, 3 }
 0x260   : > { %1511 = vrot.lane.b32.xlu0 %v7026_v0, %s3540_s4  ;;  %v1687_v0 = vrot.slane %v7034_v4, 2  ;;  %v7041_v4 = vld [vmem:[#allocation35_spill] sm:$0xff]  ;;  %v5549_v57 = vor.u32 %v1656_v61, %v1655_v1 }
 0x261   : > { %v5506_v42 = vpop.permute.xlu2 %1525  ;;  %v1755_v32 = vpop.permute.xlu1 %1754  ;;  %v1816_v36 = vsel %vm1789_vm4, %v7032_v8, %v1815_v26  ;;  %v1798_v8 = vsel %vm1789_vm4, %v7040_v59, %v7039_v54  ;;  %v2103_v31 = vsel %vm2065_vm8, %v2034_v28, %v7041_v4  ;;  %v7044_v54 = vld [vmem:[#allocation67_spill] sm:$0xff]  ;;  %v7045_v59 = vld [vmem:[#allocation136_spill] sm:$0xff] }
 0x262   : > { %v1540_v18 = vpop.permute.xlu0 %1539  ;;  %v2172_v39 = vsel %vm2134_vm9, %v2103_v31, %v4970_v58  ;;  %v5547_v50 = vor.u32 %v1688_v33, %v1687_v0 }
 0x263   : > { %v2326_v25 = vsel %vm2272_vm12, %v2257_v45, %v1540_v18  ;;  %v2241_v15 = vsel %vm2203_vm11, %v2172_v39, %v5252_v27  ;;  %v1851_v45 = vrot.slane %v5558_v19, 3  ;;  %v7047_v39 = vld [vmem:[#allocation17_spill] sm:$0xff] }
 0x264   : > { %v2310_v28 = vsel %vm2272_vm12, %v2241_v15, %v5351_v24  ;;  %v2395_v13 = vsel %vm2341_vm13, %v2326_v25, %v5399_v16  ;;  %v1690_v24 = vsel %vm1558_vm5, %v5391_v63, %v5547_v50  ;;  %v1658_v16 = vsel %vm1558_vm5, %v5393_v10, %v5549_v57  ;;  %v7046_v10 = vld [vmem:[#allocation98_spill] sm:$0xff] }
 0x265   : > { %v2379_v27 = vsel %vm2341_vm13, %v2310_v28, %v1755_v32  ;;  %v7043_v32 = vrot.slane %v5402_v30, 2  ;;  %v1947_v63 = vsel %vm1927_vm6, %v7045_v59, %v7044_v54  ;;  %v1835_v25 = vrot.slane %v6984_v55, 3  ;;  %v3470_v28 = vld [vmem:[%s3602_s25] sm:$0xff]   ;;  %v7053_v59 = vld [vmem:[#allocation12_spill] sm:$0xff] }
 0x267   : > { %1531 = vrot.lane.b32.xlu2 %v7042_v9, %s3540_s4  ;;  %1883 = vrot.lane.b32.xlu1 %v1816_v36, %s3541_s5  ;;  %v5561_v36 = vrot.slane %v5558_v19, 2 }
 0x268   : > { %1865 = vrot.lane.b32.xlu0 %v1798_v8, %s3541_s5  ;;  %v2016_v8 = vsel %vm1996_vm7, %v1947_v63, %v7046_v10  ;;  %v1583_v63 = vrot.slane %v7053_v59, 2  ;;  %v7054_v10 = vld [vmem:[#allocation5_spill] sm:$0xff] }
 0x269   : > { %v5553_v18 = vpop.permute.xlu2 %1772  ;;  %v1912_v58 = vpop.permute.xlu1 %1911  ;;  %v5578_v33 = vsel %vm1325_vm3, %v7043_v32, %v5561_v36  ;;  %v2085_v9 = vsel %vm2065_vm8, %v2016_v8, %v7047_v39  ;;  %v7052_v32 = vld [vmem:[#allocation22_spill] sm:$0xff]  ;;  %v1584_v8 = vrot.slane %v7054_v10, 3  ;;  %v7055_v39 = vld [vmem:[#allocation89_spill] sm:$0xff] }
 0x26a   : > { %v1896_v0 = vpop.permute.xlu0 %1895  ;;  %v2464_v61 = vsel %vm2410_vm14, %v2395_v13, %v1912_v58  ;;  %v7048_v58 = vld [vmem:[#allocation58_spill] sm:$0xff]  ;;  %v1620_v54 = vrot.slane %v7052_v32, 3  ;;  %v7058_v32 = vld [vmem:[#allocation153_spill] sm:$0xff] }
 0x26b   : > { %v2448_v1 = vsel %vm2410_vm14, %v2379_v27, %v1896_v0  ;;  %3303 = vmatmul.msk.bf16.vlgmr.msra.gmra.mxu3 %vm2519_vm15, %v2464_v61  ;;  %v1929_v13 = vsel %vm1927_vm6, %v3470_v28, %v7048_v58  ;;  %v7049_v27 = vld [vmem:[#allocation173_spill] sm:$0xff]  ;;  %v7050_v61 = vrot.slane %v5402_v30, 3  ;;  %v7056_v30 = vrot.slane %v7011_v3, 3  ;;  %v7059_v10 = vld [vmem:[#allocation142_spill] sm:$0xff] }
 0x26c   : > { %3295 = vmatmul.msk.bf16.gmra.mxu2 %vm2519_vm15, %v2448_v1  ;;  %v2154_v0 = vsel %vm2134_vm9, %v2085_v9, %v7049_v27  ;;  %v1998_v28 = vsel %vm1996_vm7, %v1929_v13, %v7055_v39  ;;  %v7057_v27 = vld [vmem:[#allocation113_spill] sm:$0xff]  ;;  %v5631_v13 = vor.u32 %v1584_v8, %v1583_v63 }
 0x26d   : > { %v1852_v1 = vsel %vm1789_vm4, %v7050_v61, %v1851_v45  ;;  %v2223_v9 = vsel %vm2203_vm11, %v2154_v0, %v5153_v43  ;;  %v1836_v58 = vsel %vm1789_vm4, %v7056_v30, %v1835_v25  ;;  %v2067_v61 = vsel %vm2065_vm8, %v1998_v28, %v7057_v27  ;;  %v5658_v30 = vld [vmem:[%s3602_s25 + $0x48] sm:$0xff] }
 0x26e   : > { %v2136_v59 = vsel %vm2134_vm9, %v2067_v61, %v7058_v32  ;;  %v7061_v27 = vld [vmem:[#allocation75_spill] sm:$0xff]  ;;  %v7062_v61 = vld [vmem:[#allocation157_spill] sm:$0xff] }
 0x26f   : > { %1778 = vrot.lane.b32.xlu2 %v1690_v24, %s3542_s6  ;;  %1762 = vrot.lane.b32.xlu1 %v1658_v16, %s3542_s6  ;;  %v7051_v24 = vld [vmem:[#allocation30_spill] sm:$0xff]  ;;  %v2205_v43 = vsel %vm2203_vm11, %v2136_v59, %v5096_v14  ;;  %v7063_v32 = vld [vmem:[#allocation47_spill] sm:$0xff] }
 0x270   : > { %1547 = vrot.lane.b32.xlu0 %v5578_v33, %s3540_s4  ;;  %v1619_v16 = vrot.slane %v7051_v24, 2  ;;  %v1659_v59 = vrot.slane %v7063_v32, 2 }
 0x271   : > { %v5590_v4 = vpop.permute.xlu2 %1489  ;;  %v1719_v31 = vpop.permute.xlu1 %1718 }
 0x272   : > { %v1506_v15 = vpop.permute.xlu0 %1505  ;;  %v5629_v3 = vor.u32 %v1620_v54, %v1619_v16  ;;  %v1817_v54 = vrot.slane %v7030_v44, 3 }
 0x273   : > { %v2292_v24 = vsel %vm2272_vm12, %v2223_v9, %v1506_v15  ;;  %v2274_v15 = vsel %vm2272_vm12, %v2205_v43, %v5442_v41 }
 0x274   : > { %v2361_v28 = vsel %vm2341_vm13, %v2292_v24, %v5483_v7  ;;  %v1622_v41 = vsel %vm1558_vm5, %v5477_v38, %v5629_v3  ;;  %v1586_v7 = vsel %vm1558_vm5, %v5479_v40, %v5631_v13  ;;  %v1799_v38 = vrot.slane %v5658_v30, 3 }
 0x275   : > { %v1967_v40 = vsel %vm1927_vm6, %v7062_v61, %v7061_v27  ;;  %v1818_v24 = vsel %vm1789_vm4, %v1815_v26, %v1817_v54 }
 0x277   : > { %1495 = vrot.lane.b32.xlu2 %v7059_v10, %s3540_s4  ;;  %1919 = vrot.lane.b32.xlu1 %v1852_v1, %s3541_s5  ;;  %v2343_v1 = vsel %vm2341_vm13, %v2274_v15, %v1719_v31  ;;  %v7060_v31 = vld [vmem:[#allocation163_spill] sm:$0xff]  ;;  %v7064_v10 = vld [vmem:[#allocation44_spill] sm:$0xff]  ;;  %v5672_v15 = vld [vmem:[%s3602_s25 + $0x120] sm:$0xff] }
 0x278   : > { %1903 = vrot.lane.b32.xlu0 %v1836_v58, %s3541_s5  ;;  %v1660_v43 = vrot.slane %v7064_v10, 3  ;;  %v1692_v61 = vshrl.u32 %v5672_v15, 16 }
 0x279   : > { %v5635_v0 = vpop.permute.xlu2 %1738  ;;  %v1878_v39 = vpop.permute.xlu1 %1877 }
 0x27a   : > { %v1860_v9 = vpop.permute.xlu0 %1859  ;;  %v2430_v14 = vsel %vm2410_vm14, %v2361_v28, %v1878_v39  ;;  %v7065_v39 = vld [vmem:[#allocation97_spill] sm:$0xff] }
 0x27b   : > { %v2412_v16 = vsel %vm2410_vm14, %v2343_v1, %v1860_v9  ;;  %3286 = vmatmul.msk.bf16.gmra.mxu1 %vm2519_vm15, %v2430_v14  ;;  %v2036_v28 = vsel %vm1996_vm7, %v1967_v40, %v7065_v39  ;;  %v7066_v1 = vrot.slane %v7018_v11, 3  ;;  %v7067_v14 = vld [vmem:[#allocation127_spill] sm:$0xff]  ;;  %v5693_v11 = vor.u32 %v1660_v43, %v1659_v59  ;;  %v5719_v43 = vld [vmem:[%s3602_s25 + $0x50] sm:$0xff]  ;;  %v7069_v39 = vld [vmem:[#allocation66_spill] sm:$0xff] }
 0x27c   : > { %3277 = vmatmul.msk.bf16.vlgmr.msra.gmra.mxu0 %vm2519_vm15, %v2412_v16  ;;  %v2105_v56 = vsel %vm2065_vm8, %v2036_v28, %v7067_v14  ;;  %v7068_v16 = vld [vmem:[#allocation190_spill] sm:$0xff]  ;;  %v1949_v28 = vsel %vm1927_vm6, %v5719_v43, %v7069_v39  ;;  %v7071_v14 = vld [vmem:[#allocation88_spill] sm:$0xff] }
 0x27d   : > { %v1800_v9 = vsel %vm1789_vm4, %v7066_v1, %v1799_v38  ;;  %v1853_v1 = vrot.slane %v5672_v15, 3  ;;  %v7077_v39 = vld [vmem:[#allocation80_spill] sm:$0xff] }
 0x27f   : > { %1744 = vrot.lane.b32.xlu2 %v1622_v41, %s3542_s6  ;;  %1726 = vrot.lane.b32.xlu1 %v1586_v7, %s3542_s6  ;;  %v2174_v41 = vsel %vm2134_vm9, %v2105_v56, %v7068_v16  ;;  %v2018_v56 = vsel %vm1996_vm7, %v1949_v28, %v7071_v14 }
 0x280   : > { %1513 = vrot.lane.b32.xlu0 %v7060_v31, %s3540_s4  ;;  %v2243_v7 = vsel %vm2203_vm11, %v2174_v41, %v5151_v29  ;;  %v1481_v31 = vrot.slane %v5672_v15, 2  ;;  %v1695_v29 = vshll.u32 %v5672_v15, 16 }
 0x281   : > { %v5655_v63 = vpop.permute.xlu2 %1527  ;;  %v1757_v8 = vpop.permute.xlu1 %1756 }
 0x282   : > { %v1542_v58 = vpop.permute.xlu0 %1541  ;;  %v1697_v10 = vrot.slane %v1695_v29, 3 }
 0x283   : > { %v2328_v26 = vsel %vm2272_vm12, %v5355_v21, %v1542_v58  ;;  %v2312_v21 = vsel %vm2272_vm12, %v2243_v7, %v5506_v42  ;;  %v1662_v42 = vsel %vm1558_vm5, %v5549_v57, %v5693_v11  ;;  %v7070_v57 = vld [vmem:[#allocation181_spill] sm:$0xff]  ;;  %v7072_v7 = vld [vmem:[#allocation28_spill] sm:$0xff] }
 0x284   : > { %v2381_v40 = vsel %vm2341_vm13, %v2312_v21, %v1757_v8  ;;  %v1694_v8 = vrot.slane %v1692_v61, 2  ;;  %v2087_v21 = vsel %vm2065_vm8, %v2018_v56, %v7072_v7  ;;  %v7073_v61 = vld [vmem:[#allocation61_spill] sm:$0xff] }
 0x286   : > { %v5732_v41 = vor.u32 %v1697_v10, %v1694_v8  ;;  %v7076_v8 = vld [vmem:[#allocation8_spill] sm:$0xff] }
 0x287   : > { %1457 = vrot.lane.b32.xlu2 %v5427_v5, %s3539_s30  ;;  %1885 = vrot.lane.b32.xlu1 %v1818_v24, %s3541_s5  ;;  %v2397_v5 = vsel %vm2341_vm13, %v2328_v26, %v5553_v18  ;;  %v1482_v18 = vsel %vm1325_vm3, %v5561_v36, %v1481_v31  ;;  %v1588_v10 = vrot.slane %v7076_v8, 3 }
 0x288   : > { %1867 = vrot.lane.b32.xlu0 %v1800_v9, %s3541_s5  ;;  %v1837_v9 = vrot.slane %v6965_v62, 3  ;;  %v1699_v19 = vsel %vm1558_vm5, %v5547_v50, %v5732_v41 }
 0x289   : > { %v5698_v58 = vpop.permute.xlu2 %1774  ;;  %v1914_v27 = vpop.permute.xlu1 %1913 }
 0x28a   : > { %v1898_v24 = vpop.permute.xlu0 %1897  ;;  %v2466_v32 = vsel %vm2410_vm14, %v2397_v5, %v1914_v27  ;;  %v3473_v5 = vld [vmem:[%s3602_s25 + $0x8] sm:$0xff] }
 0x28b   : > { %v2450_v59 = vsel %vm2410_vm14, %v2381_v40, %v1898_v24  ;;  %3304 = vmatmul.msk.bf16.gmra.mxu3 %vm2519_vm15, %v2466_v32  ;;  %v1931_v29 = vsel %vm1927_vm6, %v3473_v5, %v7073_v61  ;;  %v7074_v40 = vld [vmem:[#allocation172_spill] sm:$0xff]  ;;  %v1854_v32 = vsel %vm1789_vm4, %v1851_v45, %v1853_v1  ;;  %v7078_v45 = vld [vmem:[#allocation10_spill] sm:$0xff] }
 0x28c   : > { %3296 = vmatmul.msk.bf16.gmra.mxu2 %vm2519_vm15, %v2450_v59  ;;  %v2156_v24 = vsel %vm2134_vm9, %v2087_v21, %v7074_v40  ;;  %v1838_v59 = vsel %vm1789_vm4, %v1835_v25, %v1837_v9  ;;  %v2000_v28 = vsel %vm1996_vm7, %v1931_v29, %v7077_v39  ;;  %v7079_v25 = vld [vmem:[#allocation152_spill] sm:$0xff] }
 0x28d   : > { %v2069_v14 = vsel %vm2065_vm8, %v2000_v28, %v7078_v45  ;;  %v7084_v45 = vld [vmem:[#allocation65_spill] sm:$0xff] }
 0x28e   : > { %v2138_v56 = vsel %vm2134_vm9, %v2069_v14, %v7079_v25 }
 0x28f   : > { %1764 = vrot.lane.b32.xlu2 %v1662_v42, %s3542_s6  ;;  %1549 = vrot.lane.b32.xlu1 %v1482_v18, %s3540_s4  ;;  %v7075_v42 = vld [vmem:[#allocation11_spill] sm:$0xff]  ;;  %v2207_v7 = vsel %vm2203_vm11, %v2138_v56, %v5017_v47 }
 0x290   : > { %1533 = vrot.lane.b32.xlu0 %v7070_v57, %s3540_s4  ;;  %v1587_v18 = vrot.slane %v7075_v42, 2  ;;  %v2225_v57 = vsel %vm2203_vm11, %v2156_v24, %v5094_v17  ;;  %v2276_v50 = vsel %vm2272_vm12, %v2207_v7, %v5590_v4  ;;  %v7080_v24 = vld [vmem:[#allocation29_spill] sm:$0xff]  ;;  %v5819_v56 = vld [vmem:[%s3602_s25 + $0x128] sm:$0xff]  ;;  %v7085_v7 = vld [vmem:[#allocation112_spill] sm:$0xff] }
 0x291   : > { %v5730_v26 = vpop.permute.xlu2 %1491  ;;  %v1721_v16 = vpop.permute.xlu1 %1720  ;;  %v7083_v42 = vld [vmem:[#allocation141_spill] sm:$0xff] }
 0x292   : > { %v1508_v27 = vpop.permute.xlu0 %1507  ;;  %v5770_v17 = vor.u32 %v1588_v10, %v1587_v18  ;;  %v2345_v61 = vsel %vm2341_vm13, %v2276_v50, %v1721_v16  ;;  %v7082_v16 = vld [vmem:[#allocation162_spill] sm:$0xff]  ;;  %v5794_v18 = vld [vmem:[%s3602_s25 + $0x98] sm:$0xff]  ;;  %v1801_v10 = vrot.slane %v5719_v43, 3 }
 0x293   : > { %v2294_v55 = vsel %vm2272_vm12, %v2225_v57, %v1508_v27  ;;  %v1819_v8 = vrot.slane %v5794_v18, 3  ;;  %v7111_v18 = vld [vmem:[#allocation101_spill] sm:$0xff] }
 0x294   : > { %v2363_v5 = vsel %vm2341_vm13, %v2294_v55, %v5635_v0  ;;  %v1590_v4 = vsel %vm1558_vm5, %v5631_v13, %v5770_v17  ;;  %v1802_v25 = vsel %vm1789_vm4, %v1799_v38, %v1801_v10 }
 0x295   : > { %v1820_v55 = vsel %vm1789_vm4, %v1817_v54, %v1819_v8 }
 0x297   : > { %1921 = vrot.lane.b32.xlu2 %v1854_v32, %s3541_s5  ;;  %1905 = vrot.lane.b32.xlu1 %v1838_v59, %s3541_s5  ;;  %v1623_v32 = vrot.slane %v7080_v24, 2  ;;  %v7081_v59 = vld [vmem:[#allocation26_spill] sm:$0xff] }
 0x298   : > { %1780 = vrot.lane.b32.xlu0 %v1699_v19, %s3542_s6  ;;  %v1624_v0 = vrot.slane %v7081_v59, 3  ;;  %v5803_v19 = vld [vmem:[%s3602_s25 + $0xa0] sm:$0xff] }
 0x299   : > { %v5774_v21 = vpop.permute.xlu2 %1740  ;;  %v1880_v27 = vpop.permute.xlu1 %1879  ;;  %v1969_v14 = vsel %vm1927_vm6, %v5803_v19, %v7084_v45 }
 0x29a   : > { %v1862_v29 = vpop.permute.xlu0 %1861  ;;  %v2432_v40 = vsel %vm2410_vm14, %v2363_v5, %v1880_v27  ;;  %v5800_v28 = vor.u32 %v1624_v0, %v1623_v32  ;;  %v2038_v50 = vsel %vm1996_vm7, %v1969_v14, %v7085_v7  ;;  %v7086_v5 = vld [vmem:[#allocation126_spill] sm:$0xff]  ;;  %v7090_v14 = vld [vmem:[#allocation189_spill] sm:$0xff] }
 0x29b   : > { %v2414_v47 = vsel %vm2410_vm14, %v2345_v61, %v1862_v29  ;;  %3287 = vmatmul.msk.bf16.gmra.mxu1 %vm2519_vm15, %v2432_v40  ;;  %v2107_v44 = vsel %vm2065_vm8, %v2038_v50, %v7086_v5  ;;  %v7087_v61 = vld [vmem:[#allocation171_spill] sm:$0xff]  ;;  %v1701_v29 = vshrl.u32 %v5819_v56, 16  ;;  %v1704_v40 = vshll.u32 %v5819_v56, 16  ;;  %v5870_v7 = vld [vmem:[%s3602_s25 + $0x58] sm:$0xff]  ;;  %v7091_v50 = vld [vmem:[#allocation56_spill] sm:$0xff] }
 0x29c   : > { %3278 = vmatmul.msk.bf16.gmra.mxu0 %vm2519_vm15, %v2414_v47  ;;  %v1626_v27 = vsel %vm1558_vm5, %v5629_v3, %v5800_v28  ;;  %v2176_v30 = vsel %vm2134_vm9, %v2107_v44, %v7087_v61  ;;  %v1483_v3 = vrot.slane %v5819_v56, 2  ;;  %v7092_v61 = vld [vmem:[#allocation102_spill] sm:$0xff] }
 0x29d   : > { %v2245_v38 = vsel %vm2203_vm11, %v2176_v30, %v5281_v52 }
 0x29f   : > { %1728 = vrot.lane.b32.xlu2 %v1590_v4, %s3542_s6  ;;  %1515 = vrot.lane.b32.xlu1 %v7082_v16, %s3540_s4  ;;  %v1703_v16 = vrot.slane %v1701_v29, 2 }
 0x2a0   : > { %1497 = vrot.lane.b32.xlu0 %v7083_v42, %s3540_s4  ;;  %v7088_v42 = vld [vmem:[#allocation45_spill] sm:$0xff] }
 0x2a1   : > { %v5798_v13 = vpop.permute.xlu2 %1529  ;;  %v1759_v39 = vpop.permute.xlu1 %1758 }
 0x2a2   : > { %v1544_v57 = vpop.permute.xlu0 %1543 }
 0x2a3   : > { %v2330_v54 = vsel %vm2272_vm12, %v5255_v2, %v1544_v57  ;;  %v2314_v2 = vsel %vm2272_vm12, %v2245_v38, %v5655_v63  ;;  %v1484_v63 = vsel %vm1325_vm3, %v1481_v31, %v1483_v3  ;;  %v7089_v57 = vld [vmem:[#allocation43_spill] sm:$0xff]  ;;  %v7093_v38 = vld [vmem:[#allocation36_spill] sm:$0xff] }
 0x2a4   : > { %v2399_v24 = vsel %vm2341_vm13, %v2330_v54, %v5698_v58  ;;  %v2383_v52 = vsel %vm2341_vm13, %v2314_v2, %v1759_v39  ;;  %v1706_v58 = vrot.slane %v1704_v40, 3  ;;  %v1663_v39 = vrot.slane %v7088_v42, 2  ;;  %v3478_v40 = vld [vmem:[%s3602_s25 + $0x10] sm:$0xff]   ;;  %v7094_v2 = vld [vmem:[#allocation57_spill] sm:$0xff]  ;;  %v7097_v42 = vld [vmem:[#allocation18_spill] sm:$0xff] }
 0x2a5   : > { %v1664_v45 = vrot.slane %v7089_v57, 3 }
 0x2a6   : > { %v5867_v31 = vor.u32 %v1706_v58, %v1703_v16 }
 0x2a7   : > { %1887 = vrot.lane.b32.xlu2 %v1820_v55, %s3541_s5  ;;  %1869 = vrot.lane.b32.xlu1 %v1802_v25, %s3541_s5  ;;  %v5864_v55 = vld [vmem:[%s3602_s25 + $0xe8] sm:$0xff]  ;;  %v5877_v54 = vor.u32 %v1664_v45, %v1663_v39 }
 0x2a8   : > { %1746 = vrot.lane.b32.xlu0 %v1626_v27, %s3542_s6  ;;  %v1839_v25 = vrot.slane %v5864_v55, 3  ;;  %v1951_v27 = vsel %vm1927_vm6, %v5870_v7, %v7091_v50  ;;  %v1855_v50 = vrot.slane %v5819_v56, 3 }
 0x2a9   : > { %v5842_v47 = vpop.permute.xlu2 %1776  ;;  %v1916_v4 = vpop.permute.xlu1 %1915  ;;  %v1666_v58 = vsel %vm1558_vm5, %v5693_v11, %v5877_v54 }
 0x2aa   : > { %v1900_v32 = vpop.permute.xlu0 %1899  ;;  %v2468_v59 = vsel %vm2410_vm14, %v2399_v24, %v1916_v4  ;;  %v1933_v4 = vsel %vm1927_vm6, %v3478_v40, %v7094_v2  ;;  %v7095_v24 = vld [vmem:[#allocation151_spill] sm:$0xff] }
 0x2ab   : > { %v2452_v0 = vsel %vm2410_vm14, %v2383_v52, %v1900_v32  ;;  %3305 = vmatmul.msk.bf16.gmra.mxu3 %vm2519_vm15, %v2468_v59  ;;  %v1840_v32 = vsel %vm1789_vm4, %v1837_v9, %v1839_v25  ;;  %v1708_v59 = vsel %vm1558_vm5, %v5732_v41, %v5867_v31  ;;  %v7098_v9 = vld [vmem:[#allocation133_spill] sm:$0xff]  ;;  %v7102_v2 = vld [vmem:[#allocation7_spill] sm:$0xff] }
 0x2ac   : > { %3297 = vmatmul.msk.bf16.gmra.mxu2 %vm2519_vm15, %v2452_v0  ;;  %v7096_v0 = vld [vmem:[#allocation93_spill] sm:$0xff] }
 0x2af   : > { %1551 = vrot.lane.b32.xlu2 %v1484_v63, %s3540_s4  ;;  %1535 = vrot.lane.b32.xlu1 %v7090_v14, %s3540_s4  ;;  %v2002_v63 = vsel %vm1996_vm7, %v1933_v4, %v7096_v0  ;;  %v1592_v4 = vrot.slane %v7102_v2, 3 }
 0x2b0   : > { %1459 = vrot.lane.b32.xlu0 %v5578_v33, %s3539_s30  ;;  %v2020_v33 = vsel %vm1996_vm7, %v1951_v27, %v7092_v61  ;;  %v2071_v39 = vsel %vm2065_vm8, %v2002_v63, %v7097_v42  ;;  %v3479_v42 = vld [vmem:[%s3602_s25 + $0xa8] sm:$0xff] }
 0x2b1   : > { %v5875_v5 = vpop.permute.xlu2 %1493  ;;  %v1723_v44 = vpop.permute.xlu1 %1722  ;;  %v2089_v29 = vsel %vm2065_vm8, %v2020_v33, %v7093_v38  ;;  %v2140_v57 = vsel %vm2134_vm9, %v2071_v39, %v7098_v9  ;;  %v7100_v38 = vld [vmem:[#allocation25_spill] sm:$0xff]  ;;  %v7105_v39 = vld [vmem:[#allocation79_spill] sm:$0xff] }
 0x2b2   : > { %v1510_v30 = vpop.permute.xlu0 %1509  ;;  %v2158_v52 = vsel %vm2134_vm9, %v2089_v29, %v7095_v24  ;;  %v2209_v41 = vsel %vm2203_vm11, %v2140_v57, %v5112_v37  ;;  %v1628_v29 = vrot.slane %v7100_v38, 3  ;;  %v338_v24 = vld [vmem:[%s3602_s25 + $0x130] sm:$0x7] }
 0x2b3   : > { %v2227_v16 = vsel %vm2203_vm11, %v2158_v52, %v5184_v49  ;;  %v2278_v49 = vsel %vm2272_vm12, %v2209_v41, %v5730_v26  ;;  %v7099_v26 = vld [vmem:[#allocation27_spill] sm:$0xff]  ;;  %v7103_v52 = vld [vmem:[#allocation170_spill] sm:$0xff]  ;;  %v1556_v15 = vunpack.c.l.b16 %v338_v24 }
 0x2b4   : > { %v2296_v62 = vsel %vm2272_vm12, %v2227_v16, %v1510_v30  ;;  %v2347_v27 = vsel %vm2341_vm13, %v2278_v49, %v1723_v44  ;;  %v1627_v30 = vrot.slane %v7099_v26, 2  ;;  %v7101_v44 = vld [vmem:[#allocation9_spill] sm:$0xff]  ;;  %v7106_v49 = vld [vmem:[#allocation111_spill] sm:$0xff] }
 0x2b5   : > { %v2365_v14 = vsel %vm2341_vm13, %v2296_v62, %v5774_v21  ;;  %v1856_v21 = vsel %vm1789_vm4, %v1853_v1, %v1855_v50  ;;  %v1591_v40 = vrot.slane %v7101_v44, 2  ;;  %v1971_v62 = vsel %vm1927_vm6, %v3479_v42, %v7105_v39 }
 0x2b6   : > { %v5941_v0 = vor.u32 %v1628_v29, %v1627_v30  ;;  %v5958_v41 = vpack.c.b16 %v1556_v15, %v1556_v15  ;;  %v1821_v29 = vrot.slane %v5803_v19, 3  ;;  %v7109_v15 = vld [vmem:[#allocation188_spill] sm:$0xff] }
 0x2b7   : > { %1907 = vrot.lane.b32.xlu2 %v1840_v32, %s3541_s5  ;;  %1782 = vrot.lane.b32.xlu1 %v1708_v59, %s3542_s6  ;;  %v7104_v32 = vld [vmem:[#allocation149_spill] sm:$0xff]  ;;  %v1803_v59 = vrot.slane %v5870_v7, 3  ;;  %v5945_v16 = vor.u32 %v1592_v4, %v1591_v40 }
 0x2b8   : > { %1766 = vrot.lane.b32.xlu0 %v1666_v58, %s3542_s6  ;;  %v1630_v57 = vsel %vm1558_vm5, %v5800_v28, %v5941_v0  ;;  %v1710_v26 = vshrl.u32 %v5958_v41, 16  ;;  %v1713_v30 = vshll.u32 %v5958_v41, 16 }
 0x2b9   : > { %v5915_v11 = vpop.permute.xlu2 %1742  ;;  %v1882_v45 = vpop.permute.xlu1 %1881  ;;  %v1804_v9 = vsel %vm1789_vm4, %v1801_v10, %v1803_v59  ;;  %v337_v10 = vld [vmem:[%s3602_s25 + $0x130] sm:$0x3] }
 0x2ba   : > { %v1864_v61 = vpop.permute.xlu0 %1863  ;;  %v2434_v33 = vsel %vm2410_vm14, %v2365_v14, %v1882_v45  ;;  %v2040_v45 = vsel %vm1996_vm7, %v1971_v62, %v7106_v49  ;;  %v1594_v14 = vsel %vm1558_vm5, %v5770_v17, %v5945_v16  ;;  %v7108_v17 = vld [vmem:[#allocation124_spill] sm:$0xff]  ;;  %v1715_v24 = vrot.slane %v1713_v30, 3 }
 0x2bb   : > { %v2416_v37 = vsel %vm2410_vm14, %v2347_v27, %v1864_v61  ;;  %3288 = vmatmul.msk.bf16.gmra.mxu1 %vm2519_vm15, %v2434_v33  ;;  %v7107_v27 = vld [vmem:[#allocation31_spill] sm:$0xff] }
 0x2bc   : > { %3279 = vmatmul.msk.bf16.gmra.mxu0 %vm2519_vm15, %v2416_v37  ;;  %v2109_v61 = vsel %vm2065_vm8, %v2040_v45, %v7107_v27  ;;  %v1393_v37 = vrot.slane %v7108_v17, 2  ;;  %v3481_v45 = vld [vmem:[%s3602_s25 + $0x18] sm:$0xff] }
 0x2bd   : > { %v2178_v33 = vsel %vm2134_vm9, %v2109_v61, %v4998_v6  ;;  %v7114_v61 = vld [vmem:[#allocation180_spill] sm:$0xff] }
 0x2be   : > { %v2247_v28 = vsel %vm2203_vm11, %v2178_v33, %v5278_v23  ;;  %v1670_v33 = vsel %vm1558_vm5, %v5877_v54, %v5044_v46 }
 0x2bf   : > { %1517 = vrot.lane.b32.xlu2 %v7103_v52, %s3540_s4  ;;  %1499 = vrot.lane.b32.xlu1 %v7104_v32, %s3540_s4  ;;  %v1822_v52 = vsel %vm1789_vm4, %v1819_v8, %v1821_v29 }
 0x2c0   : > { %1923 = vrot.lane.b32.xlu0 %v1856_v21, %s3541_s5  ;;  %v1474_v21 = vunpack.c.l.b16 %v337_v10 }
 0x2c1   : > { %v5943_v1 = vpop.permute.xlu2 %1531  ;;  %v1761_v63 = vpop.permute.xlu1 %1760 }
 0x2c2   : > { %v1546_v58 = vpop.permute.xlu0 %1545  ;;  %v1478_v32 = vpack.c.b16 %v1474_v21, %v1474_v21  ;;  %v1857_v21 = vrot.slane %v5958_v41, 3 }
 0x2c3   : > { %v2332_v43 = vsel %vm2272_vm12, %v5411_v34, %v1546_v58  ;;  %v2316_v34 = vsel %vm2272_vm12, %v2247_v28, %v5798_v13  ;;  %v1394_v13 = vsel %vm1325_vm3, %v5561_v36, %v1393_v37  ;;  %v3480_v36 = vld [vmem:[%s3602_s25 + $0x60] sm:$0xff]  ;;  %v7115_v28 = vld [vmem:[#allocation92_spill] sm:$0xff] }
 0x2c4   : > { %v2401_v6 = vsel %vm2341_vm13, %v2332_v43, %v5842_v47  ;;  %v2385_v23 = vsel %vm2341_vm13, %v2316_v34, %v1761_v63  ;;  %v1712_v47 = vrot.slane %v1710_v26, 2  ;;  %v7110_v58 = vld [vmem:[#allocation70_spill] sm:$0xff]  ;;  %v1485_v62 = vrot.slane %v1478_v32, 2  ;;  %v7116_v34 = vld [vmem:[#allocation116_spill] sm:$0xff] }
 0x2c5   : > { %v1953_v42 = vsel %vm1927_vm6, %v3480_v36, %v7110_v58 }
 0x2c6   : > { %v1716_v63 = vor.u32 %v1715_v24, %v1712_v47  ;;  %v1486_v30 = vsel %vm1325_vm3, %v1483_v3, %v1485_v62 }
 0x2c7   : > { %1871 = vrot.lane.b32.xlu2 %v1804_v9, %s3541_s5  ;;  %1748 = vrot.lane.b32.xlu1 %v1630_v57, %s3542_s6  ;;  %v2022_v9 = vsel %vm1996_vm7, %v1953_v42, %v7111_v18  ;;  %v7112_v57 = vld [vmem:[#allocation13_spill] sm:$0xff] }
 0x2c8   : > { %1730 = vrot.lane.b32.xlu0 %v1594_v14, %s3542_s6  ;;  %v2091_v49 = vsel %vm2065_vm8, %v2022_v9, %v7112_v57  ;;  %v7113_v14 = vld [vmem:[#allocation60_spill] sm:$0xff]  ;;  %v1717_v10 = vsel %vm1558_vm5, %v5867_v31, %v1716_v63  ;;  %v6034_v31 = vld [vmem:[%s6522_s2] ss:$0 sm:$0xff]  ;;  %v7118_v63 = vrot.slane %v4926_v48, 3 }
 0x2c9   : > { %v1918_v38 = vpop.permute.xlu1 %1917  ;;  %v5987_v2 = vpop.permute.xlu2 %1778  ;;  %v1935_v27 = vsel %vm1927_vm6, %v3481_v45, %v7113_v14  ;;  %v2160_v43 = vsel %vm2134_vm9, %v2091_v49, %v7114_v61  ;;  %v3482_v9 = vld [vmem:[%s3602_s25 + $0xb0] sm:$0xff]  ;;  %v1598_v49 = vsel %vm1558_vm5, %v5945_v16, %v5021_v60  ;;  %v1634_v45 = vsel %vm1558_vm5, %v5941_v0, %v4992_v35  ;;  %v7124_v0 = vld [vmem:[#allocation169_spill] sm:$0xff] }
 0x2ca   : > { %v1902_v44 = vpop.permute.xlu0 %1901  ;;  %v2470_v40 = vsel %vm2410_vm14, %v2401_v6, %v1918_v38  ;;  %v2004_v17 = vsel %vm1996_vm7, %v1935_v27, %v7115_v28  ;;  %v2229_v37 = vsel %vm2203_vm11, %v2160_v43, %v5182_v22  ;;  %v7117_v38 = vld [vmem:[#allocation161_spill] sm:$0xff]  ;;  %v1842_v36 = vsel %vm1789_vm4, %v1839_v25, %v7118_v63  ;;  %v7121_v14 = vld [vmem:[#allocation100_spill] sm:$0xff]  ;;  %v7132_v63 = vld [vmem:[#allocation123_spill] sm:$0xff] }
 0x2cb   : > { %v2454_v4 = vsel %vm2410_vm14, %v2385_v23, %v1902_v44  ;;  %3306 = vmatmul.msk.bf16.gmra.mxu3 %vm2519_vm15, %v2470_v40  ;;  %v2073_v46 = vsel %vm2065_vm8, %v2004_v17, %v7116_v34  ;;  %v7123_v17 = vld [vmem:[#allocation192_spill] sm:$0xff] }
 0x2cc   : > { %3298 = vmatmul.msk.bf16.gmra.mxu2 %vm2519_vm15, %v2454_v4  ;;  %v2142_v22 = vsel %vm2134_vm9, %v2073_v46, %v7117_v38 }
 0x2cd   : > { %v2211_v3 = vsel %vm2203_vm11, %v2142_v22, %v5109_v20 }
 0x2ce   : > { %v2280_v23 = vsel %vm2272_vm12, %v2211_v3, %v5875_v5  ;;  %v1858_v5 = vsel %vm1789_vm4, %v1855_v50, %v1857_v21 }
 0x2cf   : > { %1537 = vrot.lane.b32.xlu2 %v7109_v15, %s3540_s4  ;;  %1461 = vrot.lane.b32.xlu1 %v1394_v13, %s3539_s30 }
 0x2d0   : > { %1889 = vrot.lane.b32.xlu0 %v1822_v52, %s3541_s5 }
 0x2d1   : > { %v1725_v39 = vpop.permute.xlu1 %1724  ;;  %v6026_v26 = vpop.permute.xlu2 %1495 }
 0x2d2   : > { %v1512_v8 = vpop.permute.xlu0 %1511  ;;  %v2349_v13 = vsel %vm2341_vm13, %v2280_v23, %v1725_v39  ;;  %v7119_v39 = vld [vmem:[#allocation148_spill] sm:$0xff] }
 0x2d3   : > { %v2298_v54 = vsel %vm2272_vm12, %v2229_v37, %v1512_v8  ;;  %v7120_v8 = vld [vmem:[#allocation78_spill] sm:$0xff] }
 0x2d4   : > { %v2367_v4 = vsel %vm2341_vm13, %v2298_v54, %v5915_v11  ;;  %v1973_v57 = vsel %vm1927_vm6, %v3482_v9, %v7120_v8  ;;  %v7136_v9 = vld [vmem:[#allocation160_spill] sm:$0xff] }
 0x2d5   : > { %v2042_v27 = vsel %vm1996_vm7, %v1973_v57, %v7121_v14  ;;  %v7137_v14 = vld [vmem:[#allocation193_spill] sm:$0xff] }
 0x2d7   : > { %1784 = vrot.lane.b32.xlu2 %v1717_v10, %s3542_s6  ;;  %1768 = vrot.lane.b32.xlu1 %v1670_v33, %s3542_s6  ;;  %v7122_v10 = vld [vmem:[#allocation130_spill] sm:$0xff] }
 0x2d8   : > { %1553 = vrot.lane.b32.xlu0 %v1486_v30, %s3540_s4  ;;  %v2686_v6 = vpop.f32.mrf.mxu2  ;;  %v2111_v33 = vsel %vm2065_vm8, %v2042_v27, %v7122_v10 }
 0x2d9   : > { %v2687_v44 = vadd.f32 %v6034_v31, %v2686_v6  ;;  %v1884_v40 = vpop.permute.xlu1 %1883  ;;  %v6073_v58 = vpop.permute.xlu2 %1744  ;;  %v2180_v37 = vsel %vm2134_vm9, %v2111_v33, %v7123_v17  ;;  %v7127_v6 = vld [vmem:[#allocation144_spill] sm:$0xff] }
 0x2da   : > { %v2641_v47 = vpop.f32.mrf.mxu1  ;;  %v1866_v24 = vpop.permute.xlu0 %1865  ;;  %v2436_v20 = vsel %vm2410_vm14, %v2367_v4, %v1884_v40  ;;  %v2249_v35 = vsel %vm2203_vm11, %v2180_v37, %v5180_v51 }
 0x2db   : > { %v2805_v52 = vmax.f32 %v2687_v44, 0.0  ;;  %v2642_v32 = vadd.f32 %v6034_v31, %v2641_v47  ;;  %v2418_v41 = vsel %vm2410_vm14, %v2349_v13, %v1866_v24  ;;  %3289 = vmatmul.msk.bf16.gmra.mxu1 %vm2519_vm15, %v2436_v20  ;;  %v2318_v16 = vsel %vm2272_vm12, %v2249_v35, %v5943_v1  ;;  %v7125_v1 = vld [vmem:[#allocation165_spill] sm:$0xff]  ;;  %v3483_v13 = vld [vmem:[%s3602_s25 + $0x68] sm:$0xff] }
 0x2dc   : > { %3280 = vmatmul.msk.bf16.gmra.mxu0 %vm2519_vm15, %v2418_v41  ;;  %v7126_v22 = vrot.slane %v7125_v1, 3  ;;  %v7129_v47 = vld [vmem:[#allocation69_spill] sm:$0xff]  ;;  %v7130_v20 = vld [vmem:[#allocation91_spill] sm:$0xff] }
 0x2dd   : > { %v2873_v11 = vpack.c.bf16 %v2805_v52, %v2805_v52  ;;  %v2787_v15 = vmax.f32 %v2642_v32, 0.0  ;;  %v1955_v7 = vsel %vm1927_vm6, %v3483_v13, %v7129_v47  ;;  %v7139_v47 = vld [vmem:[#allocation110_spill] sm:$0xff] }
 0x2de   : > { %v1824_v3 = vsel %vm1789_vm4, %v1821_v29, %v7126_v22  ;;  %v2024_v52 = vsel %vm1996_vm7, %v1955_v7, %v7130_v20 }
 0x2df   : > { %2942 = vst.msk [vmem:[%s6060_s7 + $0x88] sm:$0xf] %vm2907_vm0, %v2873_v11  ;;  %v2855_v42 = vpack.c.bf16 %v2787_v15, %v2787_v15  ;;  %1501 = vrot.lane.b32.xlu2 %v7119_v39, %s3540_s4  ;;  %1925 = vrot.lane.b32.xlu1 %v1858_v5, %s3541_s5  ;;  %v3484_v5 = vld [vmem:[%s3602_s25 + $0x20] sm:$0xff]   ;;  %v7131_v11 = vld [vmem:[#allocation53_spill] sm:$0xff]  ;;  %v7133_v39 = vld [vmem:[#allocation83_spill] sm:$0xff] }
 0x2e0   : > { %1909 = vrot.lane.b32.xlu0 %v1842_v36, %s3541_s5  ;;  %v2688_v56 = vpop.f32.mrf.mxu2  ;;  %v1937_v15 = vsel %vm1927_vm6, %v3484_v5, %v7131_v11  ;;  %v2093_v36 = vsel %vm2065_vm8, %v2024_v52, %v7132_v63  ;;  %v7142_v11 = vld [vmem:[#allocation195_spill] sm:$0xff] }
 0x2e1   : > { %2924 = vst.msk [vmem:[%s6060_s7 + $0x40] sm:$0xf] %vm2907_vm0, %v2855_v42  ;;  %v2689_v48 = vadd.f32 %v6034_v31, %v2688_v56  ;;  %v1763_v55 = vpop.permute.xlu1 %1762  ;;  %v2006_v56 = vsel %vm1996_vm7, %v1937_v15, %v7133_v39 }
 0x2e2   : > { %v2643_v25 = vpop.f32.mrf.mxu1  ;;  %v1548_v50 = vpop.permute.xlu0 %1547  ;;  %v2387_v46 = vsel %vm2341_vm13, %v2318_v16, %v1763_v55 }
 0x2e3   : > { %v2806_v62 = vmax.f32 %v2689_v48, 0.0  ;;  %v2644_v18 = vadd.f32 %v6034_v31, %v2643_v25  ;;  %v2334_v28 = vsel %vm2272_vm12, %v5408_v53, %v1548_v50  ;;  %v6110_v53 = vpop.permute.xlu2 %1457  ;;  %v7134_v48 = vld [vmem:[#allocation179_spill] sm:$0xff]  ;;  %v7135_v25 = vld [vmem:[#allocation122_spill] sm:$0xff] }
 0x2e4   : > { %v2403_v34 = vsel %vm2341_vm13, %v2334_v28, %v5987_v2  ;;  %v7128_v2 = vrot.slane %v7127_v6, 3  ;;  %v2162_v55 = vsel %vm2134_vm9, %v2093_v36, %v7134_v48  ;;  %v2075_v50 = vsel %vm2065_vm8, %v2006_v56, %v7135_v25 }
 0x2e5   : > { %v2874_v61 = vpack.c.bf16 %v2806_v62, %v2806_v62  ;;  %v2788_v43 = vmax.f32 %v2644_v18, 0.0  ;;  %v2231_v62 = vsel %vm2203_vm11, %v2162_v55, %v5107_v12  ;;  %v2144_v8 = vsel %vm2134_vm9, %v2075_v50, %v7136_v9 }
 0x2e6   : > { %v1806_v21 = vsel %vm1789_vm4, %v1803_v59, %v7128_v2  ;;  %v2213_v27 = vsel %vm2203_vm11, %v2144_v8, %v7137_v14  ;;  %v3486_v8 = vld [vmem:[%s3602_s25 + $0x28] sm:$0xff] }
 0x2e7   : > { %2943 = vst.msk [vmem:[%s6060_s7 + $0x8c] sm:$0xf] %vm2907_vm0, %v2874_v61  ;;  %v2856_v60 = vpack.c.bf16 %v2788_v43, %v2788_v43  ;;  %1732 = vrot.lane.b32.xlu1 %v1598_v49, %s3542_s6  ;;  %1750 = vrot.lane.b32.xlu2 %v1634_v45, %s3542_s6  ;;  %v2282_v12 = vsel %vm2272_vm12, %v2213_v27, %v6026_v26 }
 0x2e8   : > { %1519 = vrot.lane.b32.xlu0 %v7124_v0, %s3540_s4 }
 0x2e9   : > { %2925 = vst.msk [vmem:[%s6060_s7 + $0x44] sm:$0xf] %vm2907_vm0, %v2856_v60  ;;  %v1920_v30 = vpop.permute.xlu1 %1919 }
 0x2ea   : > { %v1904_v54 = vpop.permute.xlu0 %1903  ;;  %v2472_v51 = vsel %vm2410_vm14, %v2403_v34, %v1920_v30 }
 0x2eb   : > { %v2456_v38 = vsel %vm2410_vm14, %v2387_v46, %v1904_v54  ;;  %3307 = vmatmul.msk.bf16.gmra.mxu3 %vm2519_vm15, %v2472_v51  ;;  %v6140_v32 = vpop.permute.xlu2 %1764 }
 0x2ec   : > { %3299 = vmatmul.msk.bf16.gmra.mxu2 %vm2519_vm15, %v2456_v38 }
 0x2ee   : > { %v2731_v23 = vpop.f32.mrf.mxu3 }
 0x2ef   : > { %v2691_v44 = vpop.f32.mrf.mxu2  ;;  %v2732_v40 = vadd.f32 %v6034_v31, %v2731_v23  ;;  %1891 = vrot.lane.b32.xlu1 %v1824_v3, %s3541_s5 }
 0x2f0   : > { %v2692_v4 = vadd.f32 %v6034_v31, %v2691_v44  ;;  %1873 = vrot.lane.b32.xlu0 %v1806_v21, %s3541_s5 }
 0x2f1   : > { %v2823_v19 = vmax.f32 %v2732_v40, 0.0  ;;  %v1727_v29 = vpop.permute.xlu1 %1726 }
 0x2f2   : > { %v2807_v59 = vmax.f32 %v2692_v4, 0.0  ;;  %v1514_v24 = vpop.permute.xlu0 %1513  ;;  %v2351_v17 = vsel %vm2341_vm13, %v2282_v12, %v1727_v29  ;;  %v3485_v4 = vld [vmem:[%s3602_s25 + $0xf8] sm:$0xff] }
 0x2f3   : > { %v2891_v41 = vpack.c.bf16 %v2823_v19, %v2823_v19  ;;  %v2300_v57 = vsel %vm2272_vm12, %v2231_v62, %v1514_v24  ;;  %v1922_v38 = vpop.permute.xlu2 %1921  ;;  %v7138_v19 = vld [vmem:[#allocation85_spill] sm:$0xff]  ;;  %v7140_v24 = vld [vmem:[#allocation147_spill] sm:$0xff] }
 0x2f4   : > { %v2875_v42 = vpack.c.bf16 %v2807_v59, %v2807_v59  ;;  %v2369_v16 = vsel %vm2341_vm13, %v2300_v57, %v6073_v58  ;;  %v1991_v29 = vsel %vm1927_vm6, %v3485_v4, %v7138_v19  ;;  %v7143_v57 = vld [vmem:[#allocation54_spill] sm:$0xff] }
 0x2f5   : > { %2960 = vst.msk [vmem:[%s6060_s7 + $0xd0] sm:$0xf] %vm2907_vm0, %v2891_v41  ;;  %v2060_v7 = vsel %vm1996_vm7, %v1991_v29, %v7139_v47  ;;  %v7141_v41 = vld [vmem:[#allocation51_spill] sm:$0xff] }
 0x2f6   : > { %2944 = vst.msk [vmem:[%s6060_s7 + $0x90] sm:$0xf] %vm2907_vm0, %v2875_v42  ;;  %v2733_v18 = vpop.f32.mrf.mxu3  ;;  %v2129_v20 = vsel %vm2065_vm8, %v2060_v7, %v7140_v24 }
 0x2f7   : > { %v2693_v49 = vpop.f32.mrf.mxu2  ;;  %v2734_v45 = vadd.f32 %v6034_v31, %v2733_v18  ;;  %v2198_v15 = vsel %vm2134_vm9, %v2129_v20, %v7142_v11 }
 0x2f8   : > { %v2694_v61 = vadd.f32 %v6034_v31, %v2693_v49  ;;  %v2646_v43 = vpop.f32.mrf.mxu1  ;;  %v2267_v63 = vsel %vm2203_vm11, %v2198_v15, %v6110_v53  ;;  %v1939_v49 = vsel %vm1927_vm6, %v3486_v8, %v7143_v57  ;;  %v3488_v8 = vld [vmem:[%s3602_s25 + $0x100] sm:$0xff]  ;;  %v7153_v57 = vld [vmem:[#allocation77_spill] sm:$0xff] }
 0x2f9   : > { %v2824_v10 = vmax.f32 %v2734_v45, 0.0  ;;  %v2601_v33 = vpop.f32.mrf.mxu0  ;;  %v2647_v28 = vadd.f32 %v6034_v31, %v2646_v43  ;;  %v1886_v35 = vpop.permute.xlu1 %1885 }
 0x2fa   : > { %v2808_v37 = vmax.f32 %v2694_v61, 0.0  ;;  %v2602_v60 = vadd.f32 %v6034_v31, %v2601_v33  ;;  %v1868_v0 = vpop.permute.xlu0 %1867  ;;  %v2438_v46 = vsel %vm2410_vm14, %v2369_v16, %v1886_v35  ;;  %v7144_v61 = vld [vmem:[#allocation96_spill] sm:$0xff]  ;;  %v7147_v35 = vld [vmem:[#allocation138_spill] sm:$0xff] }
 0x2fb   : > { %v2892_v30 = vpack.c.bf16 %v2824_v10, %v2824_v10  ;;  %v2789_v26 = vmax.f32 %v2647_v28, 0.0  ;;  %v2420_v34 = vsel %vm2410_vm14, %v2351_v17, %v1868_v0  ;;  %3290 = vmatmul.msk.bf16.gmra.mxu1 %vm2519_vm15, %v2438_v46  ;;  %v1729_v52 = vpop.permute.xlu2 %1728  ;;  %v2008_v43 = vsel %vm1996_vm7, %v1939_v49, %v7144_v61  ;;  %v7145_v10 = vld [vmem:[#allocation16_spill] sm:$0xff] }
 0x2fc   : > { %v2876_v54 = vpack.c.bf16 %v2808_v37, %v2808_v37  ;;  %v2771_v51 = vmax.f32 %v2602_v60, 0.0  ;;  %3281 = vmatmul.msk.bf16.gmra.mxu0 %vm2519_vm15, %v2420_v34  ;;  %v2077_v33 = vsel %vm2065_vm8, %v2008_v43, %v7145_v10  ;;  %v3487_v17 = vld [vmem:[%s3602_s25 + $0x70] sm:$0xff]  ;;  %v7146_v37 = vld [vmem:[#allocation59_spill] sm:$0xff]  ;;  %v1993_v49 = vsel %vm1927_vm6, %v3488_v8, %v7153_v57 }
 0x2fd   : > { %2961 = vst.msk [vmem:[%s6060_s7 + $0xd4] sm:$0xf] %vm2907_vm0, %v2892_v30  ;;  %v2857_v1 = vpack.c.bf16 %v2789_v26, %v2789_v26  ;;  %v1957_v60 = vsel %vm1927_vm6, %v3487_v17, %v7146_v37  ;;  %v2146_v0 = vsel %vm2134_vm9, %v2077_v33, %v7147_v35  ;;  %v7148_v16 = vld [vmem:[#allocation104_spill] sm:$0xff]  ;;  %v7149_v26 = vld [vmem:[#allocation199_spill] sm:$0xff]  ;;  %v7156_v33 = vld [vmem:[#allocation146_spill] sm:$0xff] }
 0x2fe   : > { %2945 = vst.msk [vmem:[%s6060_s7 + $0x94] sm:$0xf] %vm2907_vm0, %v2876_v54  ;;  %v2839_v58 = vpack.c.bf16 %v2771_v51, %v2771_v51  ;;  %v2026_v30 = vsel %vm1996_vm7, %v1957_v60, %v7148_v16  ;;  %v2215_v34 = vsel %vm2203_vm11, %v2146_v0, %v7149_v26  ;;  %v7150_v54 = vld [vmem:[#allocation34_spill] sm:$0xff]  ;;  %v7155_v43 = vld [vmem:[#allocation15_spill] sm:$0xff] }
 0x2ff   : > { %2926 = vst.msk [vmem:[%s6060_s7 + $0x48] sm:$0xf] %vm2907_vm0, %v2857_v1  ;;  %v2095_v51 = vsel %vm2065_vm8, %v2026_v30, %v7150_v54  ;;  %v7157_v37 = vld [vmem:[#allocation191_spill] sm:$0xff] }
 0x300   : > { %2908 = vst.msk [vmem:[%s6060_s7] sm:$0xf] %vm2907_vm0, %v2839_v58  ;;  %v2648_v22 = vpop.f32.mrf.mxu1  ;;  %v7164_v57 = vld [vmem:[#allocation103_spill] sm:$0xff] }
 0x301   : > { %v2603_v3 = vpop.f32.mrf.mxu0  ;;  %v2649_v6 = vadd.f32 %v6034_v31, %v2648_v22  ;;  %v1550_v21 = vpop.permute.xlu1 %1549  ;;  %v7151_v22 = vld [vmem:[#allocation159_spill] sm:$0xff] }
 0x302   : > { %v2604_v2 = vadd.f32 %v6034_v31, %v2603_v3  ;;  %v1534_v23 = vpop.permute.xlu0 %1533  ;;  %v2336_v36 = vsel %vm2272_vm12, %v2267_v63, %v1550_v21  ;;  %v2164_v3 = vsel %vm2134_vm9, %v2095_v51, %v7151_v22  ;;  %v7152_v21 = vld [vmem:[#allocation200_spill] sm:$0xff] }
 0x303   : > { %v2790_v44 = vmax.f32 %v2649_v6, 0.0  ;;  %v2320_v5 = vsel %vm2272_vm12, %v7141_v41, %v1534_v23  ;;  %v1888_v9 = vpop.permute.xlu2 %1887  ;;  %v2233_v23 = vsel %vm2203_vm11, %v2164_v3, %v7152_v21  ;;  %v7158_v21 = vld [vmem:[#allocation64_spill] sm:$0xff] }
 0x304   : > { %v2772_v40 = vmax.f32 %v2604_v2, 0.0  ;;  %v2389_v56 = vsel %vm2341_vm13, %v2320_v5, %v6140_v32 }
 0x305   : > { %v2858_v13 = vpack.c.bf16 %v2790_v44, %v2790_v44 }
 0x306   : > { %v2840_v59 = vpack.c.bf16 %v2772_v40, %v2772_v40 }
 0x307   : > { %2927 = vst.msk [vmem:[%s6060_s7 + $0x4c] sm:$0xf] %vm2907_vm0, %v2858_v13 }
 0x308   : > { %2909 = vst.msk [vmem:[%s6060_s7 + $0x4] sm:$0xf] %vm2907_vm0, %v2840_v59 }
 0x309   : > { %v1906_v42 = vpop.permute.xlu1 %1905 }
 0x30a   : > { %v1781_v39 = vpop.permute.xlu0 %1780  ;;  %v2458_v55 = vsel %vm2410_vm14, %v2389_v56, %v1906_v42 }
 0x30b   : > { %v2405_v48 = vsel %vm2341_vm13, %v2336_v36, %v1781_v39  ;;  %3300 = vmatmul.msk.bf16.gmra.mxu2 %vm2519_vm15, %v2458_v55  ;;  %v1552_v24 = vpop.permute.xlu2 %1551 }
 0x30c   : > { %v2474_v25 = vsel %vm2410_vm14, %v2405_v48, %v1922_v38 }
 0x30d   : > { %3308 = vmatmul.msk.bf16.gmra.mxu3 %vm2519_vm15, %v2474_v25 }
 0x30e   : > { %v2736_v53 = vpop.f32.mrf.mxu3 }
 0x30f   : > { %v2696_v50 = vpop.f32.mrf.mxu2  ;;  %v2737_v62 = vadd.f32 %v6034_v31, %v2736_v53 }
 0x310   : > { %v2697_v18 = vadd.f32 %v6034_v31, %v2696_v50 }
 0x311   : > { %v2825_v32 = vmax.f32 %v2737_v62, 0.0  ;;  %v1516_v14 = vpop.permute.xlu1 %1515 }
 0x312   : > { %v2809_v45 = vmax.f32 %v2697_v18, 0.0  ;;  %v1498_v27 = vpop.permute.xlu0 %1497  ;;  %v2302_v19 = vsel %vm2272_vm12, %v2233_v23, %v1516_v14 }
 0x313   : > { %v2893_v12 = vpack.c.bf16 %v2825_v32, %v2825_v32  ;;  %v2284_v38 = vsel %vm2272_vm12, %v2215_v34, %v1498_v27  ;;  %v1908_v18 = vpop.permute.xlu2 %1907 }
 0x314   : > { %v2877_v28 = vpack.c.bf16 %v2809_v45, %v2809_v45  ;;  %v2353_v59 = vsel %vm2341_vm13, %v2284_v38, %v1729_v52  ;;  %v7154_v45 = vld [vmem:[#allocation52_spill] sm:$0xff] }
 0x315   : > { %2962 = vst.msk [vmem:[%s6060_s7 + $0xd8] sm:$0xf] %vm2907_vm0, %v2893_v12  ;;  %v2062_v12 = vsel %vm1996_vm7, %v1993_v49, %v7155_v43  ;;  %v7166_v43 = vld [vmem:[#allocation187_spill] sm:$0xff] }
 0x316   : > { %2946 = vst.msk [vmem:[%s6060_s7 + $0x98] sm:$0xf] %vm2907_vm0, %v2877_v28  ;;  %v2738_v46 = vpop.f32.mrf.mxu3  ;;  %v2131_v28 = vsel %vm2065_vm8, %v2062_v12, %v7156_v33 }
 0x317   : > { %v2698_v1 = vpop.f32.mrf.mxu2  ;;  %v2739_v58 = vadd.f32 %v6034_v31, %v2738_v46  ;;  %v2200_v60 = vsel %vm2134_vm9, %v2131_v28, %v7157_v37 }
 0x318   : > { %v2699_v6 = vadd.f32 %v6034_v31, %v2698_v1  ;;  %v2651_v2 = vpop.f32.mrf.mxu1 }
 0x319   : > { %v2826_v44 = vmax.f32 %v2739_v58, 0.0  ;;  %v2606_v40 = vpop.f32.mrf.mxu0  ;;  %v2652_v4 = vadd.f32 %v6034_v31, %v2651_v2  ;;  %v1870_v47 = vpop.permute.xlu1 %1869  ;;  %v3489_v2 = vld [vmem:[%s3602_s25 + $0x30] sm:$0xff] }
 0x31a   : > { %v2810_v29 = vmax.f32 %v2699_v6, 0.0  ;;  %v2607_v13 = vadd.f32 %v6034_v31, %v2606_v40  ;;  %v1747_v7 = vpop.permute.xlu0 %1746  ;;  %v2422_v11 = vsel %vm2410_vm14, %v2353_v59, %v1870_v47  ;;  %v1941_v23 = vsel %vm1927_vm6, %v3489_v2, %v7158_v21  ;;  %v7169_v2 = vld [vmem:[#allocation14_spill] sm:$0xff] }
 0x31b   : > { %v2894_v20 = vpack.c.bf16 %v2826_v44, %v2826_v44  ;;  %v2791_v41 = vmax.f32 %v2652_v4, 0.0  ;;  %v2371_v5 = vsel %vm2341_vm13, %v2302_v19, %v1747_v7  ;;  %3282 = vmatmul.msk.bf16.gmra.mxu0 %vm2519_vm15, %v2422_v11  ;;  %v1518_v16 = vpop.permute.xlu2 %1517  ;;  %v7159_v44 = vld [vmem:[#allocation95_spill] sm:$0xff]  ;;  %v7161_v7 = vld [vmem:[#allocation168_spill] sm:$0xff] }
 0x31c   : > { %v2878_v15 = vpack.c.bf16 %v2810_v29, %v2810_v29  ;;  %v2773_v63 = vmax.f32 %v2607_v13, 0.0  ;;  %v2440_v36 = vsel %vm2410_vm14, %v2371_v5, %v1888_v9  ;;  %v2010_v40 = vsel %vm1996_vm7, %v1941_v23, %v7159_v44  ;;  %v7160_v19 = vld [vmem:[#allocation119_spill] sm:$0xff]  ;;  %v7170_v23 = vld [vmem:[#allocation128_spill] sm:$0xff] }
 0x31d   : > { %2963 = vst.msk [vmem:[%s6060_s7 + $0xdc] sm:$0xf] %vm2907_vm0, %v2894_v20  ;;  %v2859_v42 = vpack.c.bf16 %v2791_v41, %v2791_v41  ;;  %3291 = vmatmul.msk.bf16.gmra.mxu1 %vm2519_vm15, %v2440_v36  ;;  %v2079_v29 = vsel %vm2065_vm8, %v2010_v40, %v7160_v19  ;;  %v7162_v41 = vld [vmem:[#allocation198_spill] sm:$0xff]  ;;  %v7171_v40 = vld [vmem:[#allocation196_spill] sm:$0xff] }
 0x31e   : > { %2947 = vst.msk [vmem:[%s6060_s7 + $0x9c] sm:$0xf] %vm2907_vm0, %v2878_v15  ;;  %v2841_v52 = vpack.c.bf16 %v2773_v63, %v2773_v63  ;;  %v2148_v59 = vsel %vm2134_vm9, %v2079_v29, %v7161_v7 }
 0x31f   : > { %2928 = vst.msk [vmem:[%s6060_s7 + $0x50] sm:$0xf] %vm2907_vm0, %v2859_v42  ;;  %v2217_v5 = vsel %vm2203_vm11, %v2148_v59, %v7162_v41 }
 0x320   : > { %2910 = vst.msk [vmem:[%s6060_s7 + $0x8] sm:$0xf] %vm2907_vm0, %v2841_v52  ;;  %v2653_v39 = vpop.f32.mrf.mxu1 }
 0x321   : > { %v2608_v56 = vpop.f32.mrf.mxu0  ;;  %v2654_v48 = vadd.f32 %v6034_v31, %v2653_v39  ;;  %v1536_v25 = vpop.permute.xlu1 %1535 }
 0x322   : > { %v2609_v55 = vadd.f32 %v6034_v31, %v2608_v56  ;;  %v1460_v53 = vpop.permute.xlu0 %1459  ;;  %v2322_v14 = vsel %vm2272_vm12, %v7154_v45, %v1536_v25 }
 0x323   : > { %v2792_v50 = vmax.f32 %v2654_v48, 0.0  ;;  %v2269_v35 = vsel %vm2203_vm11, %v2200_v60, %v1460_v53  ;;  %v1872_v11 = vpop.permute.xlu2 %1871 }
 0x324   : > { %v2774_v62 = vmax.f32 %v2609_v55, 0.0  ;;  %v2338_v46 = vsel %vm2272_vm12, %v2269_v35, %v1552_v24 }
 0x325   : > { %v2860_v9 = vpack.c.bf16 %v2792_v50, %v2792_v50  ;;  %v3490_v50 = vld [vmem:[%s3602_s25 + $0x78] sm:$0xff] }
 0x326   : > { %v2842_v32 = vpack.c.bf16 %v2774_v62, %v2774_v62  ;;  %v7163_v62 = vld [vmem:[#allocation73_spill] sm:$0xff] }
 0x327   : > { %2929 = vst.msk [vmem:[%s6060_s7 + $0x54] sm:$0xf] %vm2907_vm0, %v2860_v9 }
 0x328   : > { %2911 = vst.msk [vmem:[%s6060_s7 + $0xc] sm:$0xf] %vm2907_vm0, %v2842_v32 }
 0x329   : > { %v1783_v27 = vpop.permute.xlu1 %1782 }
 0x32a   : > { %v1767_v61 = vpop.permute.xlu0 %1766  ;;  %v2407_v51 = vsel %vm2341_vm13, %v2338_v46, %v1783_v27 }
 0x32b   : > { %v2391_v10 = vsel %vm2341_vm13, %v2322_v14, %v1767_v61  ;;  %v7165_v14 = vld [vmem:[#allocation24_spill] sm:$0xff] }
 0x32c   : > { %v2460_v17 = vsel %vm2410_vm14, %v2391_v10, %v1908_v18  ;;  %v1959_v18 = vsel %vm1927_vm6, %v3490_v50, %v7163_v62  ;;  %v7167_v10 = vld [vmem:[#allocation155_spill] sm:$0xff] }
 0x32d   : > { %3301 = vmatmul.msk.bf16.gmra.mxu2 %vm2519_vm15, %v2460_v17  ;;  %v2028_v49 = vsel %vm1996_vm7, %v1959_v18, %v7164_v57  ;;  %v3492_v57 = vld [vmem:[%s3602_s25 + $0x80] sm:$0xff] }
 0x32e   : > { %v2741_v0 = vpop.f32.mrf.mxu3  ;;  %v2097_v27 = vsel %vm2065_vm8, %v2028_v49, %v7165_v14  ;;  %v7173_v49 = vld [vmem:[#allocation72_spill] sm:$0xff] }
 0x32f   : > { %v2701_v30 = vpop.f32.mrf.mxu2  ;;  %v2742_v26 = vadd.f32 %v6034_v31, %v2741_v0  ;;  %v2166_v12 = vsel %vm2134_vm9, %v2097_v27, %v7166_v43 }
 0x330   : > { %v2702_v34 = vadd.f32 %v6034_v31, %v2701_v30  ;;  %v2235_v33 = vsel %vm2203_vm11, %v2166_v12, %v7167_v10  ;;  %v7174_v12 = vld [vmem:[#allocation94_spill] sm:$0xff] }
 0x331   : > { %v2827_v54 = vmax.f32 %v2742_v26, 0.0  ;;  %v1500_v1 = vpop.permute.xlu1 %1499  ;;  %v2304_v17 = vsel %vm2272_vm12, %v2235_v33, %v1518_v16  ;;  %v3491_v16 = vld [vmem:[%s3602_s25 + $0x108] sm:$0xff] }
 0x332   : > { %v2811_v38 = vmax.f32 %v2702_v34, 0.0  ;;  %v1924_v58 = vpop.permute.xlu0 %1923  ;;  %v2286_v42 = vsel %vm2272_vm12, %v2217_v5, %v1500_v1  ;;  %v1538_v34 = vpop.permute.xlu2 %1537 }
 0x333   : > { %v2895_v22 = vpack.c.bf16 %v2827_v54, %v2827_v54  ;;  %v2476_v3 = vsel %vm2410_vm14, %v2407_v51, %v1924_v58  ;;  %v7168_v58 = vld [vmem:[#allocation90_spill] sm:$0xff] }
 0x334   : > { %v2879_v6 = vpack.c.bf16 %v2811_v38, %v2811_v38  ;;  %3309 = vmatmul.msk.bf16.gmra.mxu3 %vm2519_vm15, %v2476_v3 }
 0x335   : > { %2964 = vst.msk [vmem:[%s6060_s7 + $0xe0] sm:$0xf] %vm2907_vm0, %v2895_v22  ;;  %v1995_v22 = vsel %vm1927_vm6, %v3491_v16, %v7168_v58  ;;  %v7180_v58 = vld [vmem:[#allocation197_spill] sm:$0xff] }
 0x336   : > { %2948 = vst.msk [vmem:[%s6060_s7 + $0xa0] sm:$0xf] %vm2907_vm0, %v2879_v6  ;;  %v2743_v4 = vpop.f32.mrf.mxu3  ;;  %v2064_v21 = vsel %vm1996_vm7, %v1995_v22, %v7169_v2 }
 0x337   : > { %v2703_v13 = vpop.f32.mrf.mxu2  ;;  %v2744_v47 = vadd.f32 %v6034_v31, %v2743_v4  ;;  %v2133_v44 = vsel %vm2065_vm8, %v2064_v21, %v7170_v23 }
 0x338   : > { %v2704_v24 = vadd.f32 %v6034_v31, %v2703_v13  ;;  %v2656_v20 = vpop.f32.mrf.mxu1  ;;  %v2202_v4 = vsel %vm2134_vm9, %v2133_v44, %v7171_v40  ;;  %v7182_v44 = vld [vmem:[#allocation194_spill] sm:$0xff] }
 0x339   : > { %v2828_v15 = vmax.f32 %v2744_v47, 0.0  ;;  %v2611_v63 = vpop.f32.mrf.mxu0  ;;  %v2657_v36 = vadd.f32 %v6034_v31, %v2656_v20  ;;  %v1749_v56 = vpop.permute.xlu1 %1748  ;;  %v7172_v20 = vld [vmem:[#allocation131_spill] sm:$0xff] }
 0x33a   : > { %v2812_v52 = vmax.f32 %v2704_v24, 0.0  ;;  %v2612_v39 = vadd.f32 %v6034_v31, %v2611_v63  ;;  %v1731_v48 = vpop.permute.xlu0 %1730  ;;  %v2373_v35 = vsel %vm2341_vm13, %v2304_v17, %v1749_v56  ;;  %v1785_v19 = vpop.permute.xlu2 %1784  ;;  %v2324_v41 = vsel %vm2272_vm12, %v7172_v20, %v1538_v34  ;;  %v3493_v17 = vld [vmem:[%s3602_s25 + $0x38] sm:$0xff]  ;;  %v7177_v34 = vld [vmem:[#allocation86_spill] sm:$0xff] }
 0x33b   : > { %v2896_v55 = vpack.c.bf16 %v2828_v15, %v2828_v15  ;;  %v2793_v25 = vmax.f32 %v2657_v36, 0.0  ;;  %v2355_v53 = vsel %vm2341_vm13, %v2286_v42, %v1731_v48 }
 0x33c   : > { %v2880_v9 = vpack.c.bf16 %v2812_v52, %v2812_v52  ;;  %v2775_v32 = vmax.f32 %v2612_v39, 0.0  ;;  %v2424_v8 = vsel %vm2410_vm14, %v2355_v53, %v1872_v11 }
 0x33d   : > { %2965 = vst.msk [vmem:[%s6060_s7 + $0xe4] sm:$0xf] %vm2907_vm0, %v2896_v55  ;;  %v2861_v45 = vpack.c.bf16 %v2793_v25, %v2793_v25  ;;  %3283 = vmatmul.msk.bf16.gmra.mxu0 %vm2519_vm15, %v2424_v8 }
 0x33e   : > { %2949 = vst.msk [vmem:[%s6060_s7 + $0xa4] sm:$0xf] %vm2907_vm0, %v2880_v9  ;;  %v2843_v61 = vpack.c.bf16 %v2775_v32, %v2775_v32 }
 0x33f   : > { %2930 = vst.msk [vmem:[%s6060_s7 + $0x58] sm:$0xf] %vm2907_vm0, %v2861_v45  ;;  %v1961_v45 = vsel %vm1927_vm6, %v3492_v57, %v7173_v49 }
 0x340   : > { %2912 = vst.msk [vmem:[%s6060_s7 + $0x10] sm:$0xf] %vm2907_vm0, %v2843_v61  ;;  %v2658_v28 = vpop.f32.mrf.mxu1  ;;  %v2030_v10 = vsel %vm1996_vm7, %v1961_v45, %v7174_v12 }
 0x341   : > { %v2613_v37 = vpop.f32.mrf.mxu0  ;;  %v2659_v60 = vadd.f32 %v6034_v31, %v2658_v28  ;;  %v1462_v30 = vpop.permute.xlu1 %1461 }
 0x342   : > { %v2614_v0 = vadd.f32 %v6034_v31, %v2613_v37  ;;  %v1890_v26 = vpop.permute.xlu0 %1889  ;;  %v2271_v29 = vsel %vm2203_vm11, %v2202_v4, %v1462_v30  ;;  %v1502_v25 = vpop.permute.xlu2 %1501  ;;  %v7175_v37 = vld [vmem:[#allocation63_spill] sm:$0xff] }
 0x343   : > { %v2794_v46 = vmax.f32 %v2659_v60, 0.0  ;;  %v2442_v54 = vsel %vm2410_vm14, %v2373_v35, %v1890_v26  ;;  %v1943_v60 = vsel %vm1927_vm6, %v3493_v17, %v7175_v37  ;;  %v7176_v35 = vld [vmem:[#allocation46_spill] sm:$0xff] }
 0x344   : > { %v2776_v51 = vmax.f32 %v2614_v0, 0.0  ;;  %3292 = vmatmul.msk.bf16.gmra.mxu1 %vm2519_vm15, %v2442_v54  ;;  %v2099_v0 = vsel %vm2065_vm8, %v2030_v10, %v7176_v35  ;;  %v7178_v54 = vld [vmem:[#allocation186_spill] sm:$0xff] }
 0x345   : > { %v2862_v38 = vpack.c.bf16 %v2794_v46, %v2794_v46  ;;  %v2012_v46 = vsel %vm1996_vm7, %v1943_v60, %v7177_v34 }
 0x346   : > { %v2844_v1 = vpack.c.bf16 %v2776_v51, %v2776_v51  ;;  %v2168_v51 = vsel %vm2134_vm9, %v2099_v0, %v7178_v54 }
 0x347   : > { %2931 = vst.msk [vmem:[%s6060_s7 + $0x5c] sm:$0xf] %vm2907_vm0, %v2862_v38  ;;  %v2237_v22 = vsel %vm2203_vm11, %v2168_v51, %v7180_v58 }
 0x348   : > { %2913 = vst.msk [vmem:[%s6060_s7 + $0x14] sm:$0xf] %vm2907_vm0, %v2844_v1  ;;  %v7179_v1 = vld [vmem:[#allocation33_spill] sm:$0xff] }
 0x349   : > { %v1769_v3 = vpop.permute.xlu1 %1768  ;;  %v2081_v16 = vsel %vm2065_vm8, %v2012_v46, %v7179_v1 }
 0x34a   : > { %v1554_v6 = vpop.permute.xlu0 %1553  ;;  %v2393_v11 = vsel %vm2341_vm13, %v2324_v41, %v1769_v3  ;;  %v1751_v23 = vpop.permute.xlu2 %1750 }
 0x34b   : > { %v2340_v47 = vsel %vm2272_vm12, %v2271_v29, %v1554_v6  ;;  %v7181_v6 = vld [vmem:[#allocation167_spill] sm:$0xff] }
 0x34c   : > { %v2409_v42 = vsel %vm2341_vm13, %v2340_v47, %v1785_v19  ;;  %v2150_v2 = vsel %vm2134_vm9, %v2081_v16, %v7181_v6 }
 0x34d   : > { %v2219_v40 = vsel %vm2203_vm11, %v2150_v2, %v7182_v44 }
 0x34e   : > { %v2746_v13 = vpop.f32.mrf.mxu3  ;;  %v2288_v19 = vsel %vm2272_vm12, %v2219_v40, %v1502_v25 }
 0x34f   : > { %v2706_v7 = vpop.f32.mrf.mxu2  ;;  %v2747_v59 = vadd.f32 %v6034_v31, %v2746_v13 }
 0x350   : > { %v2707_v24 = vadd.f32 %v6034_v31, %v2706_v7 }
 0x351   : > { %v2829_v5 = vmax.f32 %v2747_v59, 0.0  ;;  %v1926_v63 = vpop.permute.xlu1 %1925 }
 0x352   : > { %v2813_v15 = vmax.f32 %v2707_v24, 0.0  ;;  %v1910_v36 = vpop.permute.xlu0 %1909  ;;  %v2478_v56 = vsel %vm2410_vm14, %v2409_v42, %v1926_v63 }
 0x353   : > { %v2897_v52 = vpack.c.bf16 %v2829_v5, %v2829_v5  ;;  %v2462_v39 = vsel %vm2410_vm14, %v2393_v11, %v1910_v36  ;;  %3310 = vmatmul.msk.bf16.gmra.mxu3 %vm2519_vm15, %v2478_v56 }
 0x354   : > { %v2881_v48 = vpack.c.bf16 %v2813_v15, %v2813_v15  ;;  %3302 = vmatmul.msk.bf16.gmra.mxu2 %vm2519_vm15, %v2462_v39 }
 0x355   : > { %2966 = vst.msk [vmem:[%s6060_s7 + $0xe8] sm:$0xf] %vm2907_vm0, %v2897_v52 }
 0x356   : > { %2950 = vst.msk [vmem:[%s6060_s7 + $0xa8] sm:$0xf] %vm2907_vm0, %v2881_v48  ;;  %v2748_v55 = vpop.f32.mrf.mxu3 }
 0x357   : > { %v2708_v53 = vpop.f32.mrf.mxu2  ;;  %v2749_v50 = vadd.f32 %v6034_v31, %v2748_v55 }
 0x358   : > { %v2709_v62 = vadd.f32 %v6034_v31, %v2708_v53  ;;  %v2661_v18 = vpop.f32.mrf.mxu1 }
 0x359   : > { %v2830_v9 = vmax.f32 %v2749_v50, 0.0  ;;  %v2616_v32 = vpop.f32.mrf.mxu0  ;;  %v2662_v8 = vadd.f32 %v6034_v31, %v2661_v18  ;;  %v1733_v61 = vpop.permute.xlu1 %1732 }
 0x35a   : > { %v2814_v14 = vmax.f32 %v2709_v62, 0.0  ;;  %v2617_v27 = vadd.f32 %v6034_v31, %v2616_v32  ;;  %v1520_v43 = vpop.permute.xlu0 %1519  ;;  %v2357_v47 = vsel %vm2341_vm13, %v2288_v19, %v1733_v61 }
 0x35b   : > { %v2898_v33 = vpack.c.bf16 %v2830_v9, %v2830_v9  ;;  %v2795_v28 = vmax.f32 %v2662_v8, 0.0  ;;  %v2306_v21 = vsel %vm2272_vm12, %v2237_v22, %v1520_v43 }
 0x35c   : > { %v2882_v30 = vpack.c.bf16 %v2814_v14, %v2814_v14  ;;  %v2777_v26 = vmax.f32 %v2617_v27, 0.0  ;;  %v2375_v7 = vsel %vm2341_vm13, %v2306_v21, %v1751_v23 }
 0x35d   : > { %2967 = vst.msk [vmem:[%s6060_s7 + $0xec] sm:$0xf] %vm2907_vm0, %v2898_v33  ;;  %v2863_v38 = vpack.c.bf16 %v2795_v28, %v2795_v28 }
 0x35e   : > { %2951 = vst.msk [vmem:[%s6060_s7 + $0xac] sm:$0xf] %vm2907_vm0, %v2882_v30  ;;  %v2845_v3 = vpack.c.bf16 %v2777_v26, %v2777_v26 }
 0x35f   : > { %2932 = vst.msk [vmem:[%s6060_s7 + $0x60] sm:$0xf] %vm2907_vm0, %v2863_v38 }
 0x360   : > { %2914 = vst.msk [vmem:[%s6060_s7 + $0x18] sm:$0xf] %vm2907_vm0, %v2845_v3  ;;  %v2663_v4 = vpop.f32.mrf.mxu1 }
 0x361   : > { %v2618_v29 = vpop.f32.mrf.mxu0  ;;  %v2664_v13 = vadd.f32 %v6034_v31, %v2663_v4  ;;  %v1892_v24 = vpop.permute.xlu1 %1891 }
 0x362   : > { %v2619_v59 = vadd.f32 %v6034_v31, %v2618_v29  ;;  %v1874_v20 = vpop.permute.xlu0 %1873  ;;  %v2444_v11 = vsel %vm2410_vm14, %v2375_v7, %v1892_v24 }
 0x363   : > { %v2796_v41 = vmax.f32 %v2664_v13, 0.0  ;;  %v2426_v5 = vsel %vm2410_vm14, %v2357_v47, %v1874_v20  ;;  %3293 = vmatmul.msk.bf16.gmra.mxu1 %vm2519_vm15, %v2444_v11 }
 0x364   : > { %v2778_v15 = vmax.f32 %v2619_v59, 0.0  ;;  %3284 = vmatmul.msk.bf16.gmra.mxu0 %vm2519_vm15, %v2426_v5 }
 0x365   : > { %v2864_v63 = vpack.c.bf16 %v2796_v41, %v2796_v41 }
 0x366   : > { %v2846_v36 = vpack.c.bf16 %v2778_v15, %v2778_v15 }
 0x367   : > { %2933 = vst.msk [vmem:[%s6060_s7 + $0x64] sm:$0xf] %vm2907_vm0, %v2864_v63 }
 0x368   : > { %2915 = vst.msk [vmem:[%s6060_s7 + $0x1c] sm:$0xf] %vm2907_vm0, %v2846_v36 }
 0x36e   : > { %v2751_v42 = vpop.f32.mrf.mxu3 }
 0x36f   : > { %v2711_v52 = vpop.f32.mrf.mxu2  ;;  %v2752_v39 = vadd.f32 %v6034_v31, %v2751_v42 }
 0x370   : > { %v2712_v56 = vadd.f32 %v6034_v31, %v2711_v52 }
 0x371   : > { %v2831_v48 = vmax.f32 %v2752_v39, 0.0 }
 0x372   : > { %v2815_v55 = vmax.f32 %v2712_v56, 0.0 }
 0x373   : > { %v2899_v25 = vpack.c.bf16 %v2831_v48, %v2831_v48 }
 0x374   : > { %v2883_v53 = vpack.c.bf16 %v2815_v55, %v2815_v55 }
 0x375   : > { %2968 = vst.msk [vmem:[%s6060_s7 + $0xf0] sm:$0xf] %vm2907_vm0, %v2899_v25 }
 0x376   : > { %2952 = vst.msk [vmem:[%s6060_s7 + $0xb0] sm:$0xf] %vm2907_vm0, %v2883_v53  ;;  %v2753_v50 = vpop.f32.mrf.mxu3 }
 0x377   : > { %v2713_v62 = vpop.f32.mrf.mxu2  ;;  %v2754_v18 = vadd.f32 %v6034_v31, %v2753_v50 }
 0x378   : > { %v2714_v9 = vadd.f32 %v6034_v31, %v2713_v62  ;;  %v2666_v57 = vpop.f32.mrf.mxu1 }
 0x379   : > { %v2832_v32 = vmax.f32 %v2754_v18, 0.0  ;;  %v2621_v8 = vpop.f32.mrf.mxu0  ;;  %v2667_v14 = vadd.f32 %v6034_v31, %v2666_v57 }
 0x37a   : > { %v2816_v49 = vmax.f32 %v2714_v9, 0.0  ;;  %v2622_v45 = vadd.f32 %v6034_v31, %v2621_v8 }
 0x37b   : > { %v2900_v27 = vpack.c.bf16 %v2832_v32, %v2832_v32  ;;  %v2797_v12 = vmax.f32 %v2667_v14, 0.0 }
 0x37c   : > { %v2884_v61 = vpack.c.bf16 %v2816_v49, %v2816_v49  ;;  %v2779_v43 = vmax.f32 %v2622_v45, 0.0 }
 0x37d   : > { %2969 = vst.msk [vmem:[%s6060_s7 + $0xf4] sm:$0xf] %vm2907_vm0, %v2900_v27  ;;  %v2865_v33 = vpack.c.bf16 %v2797_v12, %v2797_v12 }
 0x37e   : > { %2953 = vst.msk [vmem:[%s6060_s7 + $0xb4] sm:$0xf] %vm2907_vm0, %v2884_v61  ;;  %v2847_v10 = vpack.c.bf16 %v2779_v43, %v2779_v43 }
 0x37f   : > { %2934 = vst.msk [vmem:[%s6060_s7 + $0x68] sm:$0xf] %vm2907_vm0, %v2865_v33 }
 0x380   : > { %2916 = vst.msk [vmem:[%s6060_s7 + $0x20] sm:$0xf] %vm2907_vm0, %v2847_v10  ;;  %v2668_v17 = vpop.f32.mrf.mxu1 }
 0x381   : > { %v2623_v28 = vpop.f32.mrf.mxu0  ;;  %v2669_v60 = vadd.f32 %v6034_v31, %v2668_v17 }
 0x382   : > { %v2624_v37 = vadd.f32 %v6034_v31, %v2623_v28 }
 0x383   : > { %v2798_v0 = vmax.f32 %v2669_v60, 0.0 }
 0x384   : > { %v2780_v35 = vmax.f32 %v2624_v37, 0.0 }
 0x385   : > { %v2866_v26 = vpack.c.bf16 %v2798_v0, %v2798_v0 }
 0x386   : > { %v2848_v30 = vpack.c.bf16 %v2780_v35, %v2780_v35 }
 0x387   : > { %2935 = vst.msk [vmem:[%s6060_s7 + $0x6c] sm:$0xf] %vm2907_vm0, %v2866_v26 }
 0x388   : > { %2917 = vst.msk [vmem:[%s6060_s7 + $0x24] sm:$0xf] %vm2907_vm0, %v2848_v30 }
 0x38e   : > { %v2716_v34 = vpop.f32.mrf.mxu2 }
 0x38f   : > { %v2717_v46 = vadd.f32 %v6034_v31, %v2716_v34 }
 0x390   : > { %v2756_v54 = vpop.f32.mrf.mxu3 }
 0x391   : > { %v2757_v51 = vadd.f32 %v6034_v31, %v2756_v54  ;;  %v2817_v38 = vmax.f32 %v2717_v46, 0.0 }
 0x393   : > { %v2833_v1 = vmax.f32 %v2757_v51, 0.0  ;;  %v2885_v16 = vpack.c.bf16 %v2817_v38, %v2817_v38 }
 0x395   : > { %v2901_v58 = vpack.c.bf16 %v2833_v1, %v2833_v1  ;;  %2954 = vst.msk [vmem:[%s6060_s7 + $0xb8] sm:$0xf] %vm2907_vm0, %v2885_v16 }
 0x396   : > { %v2718_v22 = vpop.f32.mrf.mxu2 }
 0x397   : > { %2970 = vst.msk [vmem:[%s6060_s7 + $0xf8] sm:$0xf] %vm2907_vm0, %v2901_v58  ;;  %v2719_v3 = vadd.f32 %v6034_v31, %v2718_v22 }
 0x398   : > { %v2758_v6 = vpop.f32.mrf.mxu3  ;;  %v2626_v21 = vpop.f32.mrf.mxu0 }
 0x399   : > { %v2759_v2 = vadd.f32 %v6034_v31, %v2758_v6  ;;  %v2818_v23 = vmax.f32 %v2719_v3, 0.0  ;;  %v2627_v44 = vadd.f32 %v6034_v31, %v2626_v21 }
 0x39a   : > { %v2671_v40 = vpop.f32.mrf.mxu1 }
 0x39b   : > { %v2834_v4 = vmax.f32 %v2759_v2, 0.0  ;;  %v2672_v19 = vadd.f32 %v6034_v31, %v2671_v40  ;;  %v2886_v29 = vpack.c.bf16 %v2818_v23, %v2818_v23  ;;  %v2781_v13 = vmax.f32 %v2627_v44, 0.0  ;;  %v3494_v2 = vld [vmem:[%s6522_s2] ss:$0 sm:$0xff] }
 0x39d   : > { %v2902_v47 = vpack.c.bf16 %v2834_v4, %v2834_v4  ;;  %v2799_v7 = vmax.f32 %v2672_v19, 0.0  ;;  %2955 = vst.msk [vmem:[%s6060_s7 + $0xbc] sm:$0xf] %vm2907_vm0, %v2886_v29  ;;  %v2849_v59 = vpack.c.bf16 %v2781_v13, %v2781_v13 }
 0x39f   : > { %2971 = vst.msk [vmem:[%s6060_s7 + $0xfc] sm:$0xf] %vm2907_vm0, %v2902_v47  ;;  %v2867_v24 = vpack.c.bf16 %v2799_v7, %v2799_v7 }
 0x3a0   : > { %2918 = vst.msk [vmem:[%s6060_s7 + $0x28] sm:$0xf] %vm2907_vm0, %v2849_v59  ;;  %v2628_v20 = vpop.f32.mrf.mxu0 }
 0x3a1   : > { %2936 = vst.msk [vmem:[%s6060_s7 + $0x70] sm:$0xf] %vm2907_vm0, %v2867_v24  ;;  %v2629_v41 = vadd.f32 %v6034_v31, %v2628_v20 }
 0x3a2   : > { %v2673_v5 = vpop.f32.mrf.mxu1 }
 0x3a3   : > { %v2674_v11 = vadd.f32 %v6034_v31, %v2673_v5  ;;  %v2782_v15 = vmax.f32 %v2629_v41, 0.0 }
 0x3a5   : > { %v2800_v63 = vmax.f32 %v2674_v11, 0.0  ;;  %v2850_v36 = vpack.c.bf16 %v2782_v15, %v2782_v15 }
 0x3a7   : > { %v2868_v42 = vpack.c.bf16 %v2800_v63, %v2800_v63  ;;  %2919 = vst.msk [vmem:[%s6060_s7 + $0x2c] sm:$0xf] %vm2907_vm0, %v2850_v36 }
 0x3a9   : > { %2937 = vst.msk [vmem:[%s6060_s7 + $0x74] sm:$0xf] %vm2907_vm0, %v2868_v42 }
 0x3b0   : > { %v2721_v52 = vpop.f32.mrf.mxu2 }
 0x3b1   : > { %v2722_v39 = vadd.f32 %v6034_v31, %v2721_v52 }
 0x3b3   : > { %v2819_v56 = vmax.f32 %v2722_v39, 0.0 }
 0x3b5   : > { %v2887_v48 = vpack.c.bf16 %v2819_v56, %v2819_v56 }
 0x3b7   : > { %2956 = vst.msk [vmem:[%s6060_s7 + $0xc0] sm:$0xf] %vm2907_vm0, %v2887_v48  ;;  %v2761_v55 = vpop.f32.mrf.mxu3 }
 0x3b8   : > { %v2762_v25 = vadd.f32 %v6034_v31, %v2761_v55  ;;  %v2723_v53 = vpop.f32.mrf.mxu2 }
 0x3b9   : > { %v2724_v50 = vadd.f32 %v6034_v31, %v2723_v53 }
 0x3ba   : > { %v2835_v62 = vmax.f32 %v2762_v25, 0.0  ;;  %v2631_v18 = vpop.f32.mrf.mxu0 }
 0x3bb   : > { %v2820_v9 = vmax.f32 %v2724_v50, 0.0  ;;  %v2632_v32 = vadd.f32 %v6034_v31, %v2631_v18 }
 0x3bc   : > { %v2903_v8 = vpack.c.bf16 %v2835_v62, %v2835_v62 }
 0x3bd   : > { %v2888_v57 = vpack.c.bf16 %v2820_v9, %v2820_v9  ;;  %v2783_v49 = vmax.f32 %v2632_v32, 0.0 }
 0x3be   : > { %2972 = vst.msk [vmem:[%s6060_s7 + $0x100] sm:$0xf] %vm2907_vm0, %v2903_v8 }
 0x3bf   : > { %2957 = vst.msk [vmem:[%s6060_s7 + $0xc4] sm:$0xf] %vm2907_vm0, %v2888_v57  ;;  %v2851_v45 = vpack.c.bf16 %v2783_v49, %v2783_v49  ;;  %v2763_v14 = vpop.f32.mrf.mxu3 }
 0x3c0   : > { %v2764_v27 = vadd.f32 %v6034_v31, %v2763_v14 }
 0x3c1   : > { %2920 = vst.msk [vmem:[%s6060_s7 + $0x30] sm:$0xf] %vm2907_vm0, %v2851_v45  ;;  %v2676_v61 = vpop.f32.mrf.mxu1 }
 0x3c2   : > { %v2836_v43 = vmax.f32 %v2764_v27, 0.0  ;;  %v2677_v12 = vadd.f32 %v6034_v31, %v2676_v61  ;;  %v2633_v10 = vpop.f32.mrf.mxu0 }
 0x3c3   : > { %v2634_v33 = vadd.f32 %v6034_v31, %v2633_v10 }
 0x3c4   : > { %v2904_v28 = vpack.c.bf16 %v2836_v43, %v2836_v43  ;;  %v2801_v17 = vmax.f32 %v2677_v12, 0.0 }
 0x3c5   : > { %v2784_v37 = vmax.f32 %v2634_v33, 0.0 }
 0x3c6   : > { %2973 = vst.msk [vmem:[%s6060_s7 + $0x104] sm:$0xf] %vm2907_vm0, %v2904_v28  ;;  %v2869_v60 = vpack.c.bf16 %v2801_v17, %v2801_v17 }
 0x3c7   : > { %v2852_v35 = vpack.c.bf16 %v2784_v37, %v2784_v37 }
 0x3c8   : > { %2938 = vst.msk [vmem:[%s6060_s7 + $0x78] sm:$0xf] %vm2907_vm0, %v2869_v60 }
 0x3c9   : > { %2921 = vst.msk [vmem:[%s6060_s7 + $0x34] sm:$0xf] %vm2907_vm0, %v2852_v35  ;;  %v2678_v0 = vpop.f32.mrf.mxu1 }
 0x3ca   : > { %v2679_v30 = vadd.f32 %v6034_v31, %v2678_v0 }
 0x3cc   : > { %v2802_v26 = vmax.f32 %v2679_v30, 0.0 }
 0x3ce   : > { %v2870_v34 = vpack.c.bf16 %v2802_v26, %v2802_v26 }
 0x3d0   : > { %2939 = vst.msk [vmem:[%s6060_s7 + $0x7c] sm:$0xf] %vm2907_vm0, %v2870_v34 }
 0x3d6   : > { %v2766_v54 = vpop.f32.mrf.mxu3 }
 0x3d7   : > { %v2726_v46 = vpop.f32.mrf.mxu2  ;;  %v2767_v38 = vadd.f32 %v6034_v31, %v2766_v54 }
 0x3d8   : > { %v2727_v51 = vadd.f32 %v6034_v31, %v2726_v46 }
 0x3d9   : > { %v2837_v16 = vmax.f32 %v2767_v38, 0.0 }
 0x3da   : > { %v2821_v1 = vmax.f32 %v2727_v51, 0.0 }
 0x3db   : > { %v2905_v22 = vpack.c.bf16 %v2837_v16, %v2837_v16 }
 0x3dc   : > { %v2889_v58 = vpack.c.bf16 %v2821_v1, %v2821_v1 }
 0x3dd   : > { %2974 = vst.msk [vmem:[%s6060_s7 + $0x108] sm:$0xf] %vm2907_vm0, %v2905_v22 }
 0x3de   : > { %2958 = vst.msk [vmem:[%s6060_s7 + $0xc8] sm:$0xf] %vm2907_vm0, %v2889_v58  ;;  %v2768_v6 = vpop.f32.mrf.mxu3 }
 0x3df   : > { %v2728_v3 = vpop.f32.mrf.mxu2  ;;  %v2769_v23 = vadd.f32 %v3494_v2, %v2768_v6 }
 0x3e0   : > { %v2729_v21 = vadd.f32 %v3494_v2, %v2728_v3  ;;  %v2681_v44 = vpop.f32.mrf.mxu1 }
 0x3e1   : > { %v2636_v31 = vpop.f32.mrf.mxu0  ;;  %v2838_v4 = vmax.f32 %v2769_v23, 0.0  ;;  %v2682_v29 = vadd.f32 %v3494_v2, %v2681_v44 }
 0x3e2   : > { %v2822_v40 = vmax.f32 %v2729_v21, 0.0  ;;  %v2637_v19 = vadd.f32 %v3494_v2, %v2636_v31 }
 0x3e3   : > { %v2906_v47 = vpack.c.bf16 %v2838_v4, %v2838_v4  ;;  %v2803_v59 = vmax.f32 %v2682_v29, 0.0 }
 0x3e4   : > { %v2890_v13 = vpack.c.bf16 %v2822_v40, %v2822_v40  ;;  %v2785_v7 = vmax.f32 %v2637_v19, 0.0 }
 0x3e5   : > { %v2871_v20 = vpack.c.bf16 %v2803_v59, %v2803_v59  ;;  %2975 = vst.msk [vmem:[%s6060_s7 + $0x10c] sm:$0xf] %vm2907_vm0, %v2906_v47 }
 0x3e6   : > { %2959 = vst.msk [vmem:[%s6060_s7 + $0xcc] sm:$0xf] %vm2907_vm0, %v2890_v13  ;;  %v2853_v24 = vpack.c.bf16 %v2785_v7, %v2785_v7 }
 0x3e7   : > { %2940 = vst.msk [vmem:[%s6060_s7 + $0x80] sm:$0xf] %vm2907_vm0, %v2871_v20 }
 0x3e8   : > { %2922 = vst.msk [vmem:[%s6060_s7 + $0x38] sm:$0xf] %vm2907_vm0, %v2853_v24  ;;  %v2683_v5 = vpop.f32.mrf.mxu1 }
 0x3e9   : > { %v2638_v41 = vpop.f32.mrf.mxu0  ;;  %v2684_v15 = vadd.f32 %v3494_v2, %v2683_v5 }
 0x3ea   : > { %v2639_v11 = vadd.f32 %v3494_v2, %v2638_v41 }
 0x3eb   : > { %v2804_v36 = vmax.f32 %v2684_v15, 0.0 }
 0x3ec   : > { %v2786_v63 = vmax.f32 %v2639_v11, 0.0 }
 0x3ed   : > { %v2872_v52 = vpack.c.bf16 %v2804_v36, %v2804_v36 }
 0x3ee   : > { %v2854_v42 = vpack.c.bf16 %v2786_v63, %v2786_v63 }
 0x3ef   : > { %2941 = vst.msk [vmem:[%s6060_s7 + $0x84] sm:$0xf] %vm2907_vm0, %v2872_v52 }
 0x3f0   : > { %2923 = vst.msk [vmem:[%s6060_s7 + $0x3c] sm:$0xf] %vm2907_vm0, %v2854_v42 }
 0x3f1 PF: > { %s13_s16 = sadd.s32 1, %s3533_s16   ;;  %s7183_s12 = smov %s3525_s14 }
 0x3f2   : > { %p10_p7 = scmp.ge.s32.totalorder %s13_s16, 6   ;;  %s7184_s13 = smov %s3529_s15 }
 0x3f3   : > { %s7185_s14 = smov %s7188_s17  ;;  %s7186_s15 = smov %s7192_s18 }
 0x3f4   :  { %12 = sbr.rel (!%p10_p7) target bundleno = 3 (0x3), region = 68 }

</bundles_post_ra>
